<compile_context>
chip_gen: v6e
topology: v6e:2x2x1
jax: 0.10.0
libtpu: 0.0.40
codegen_flags: <defaults>
</compile_context>

<pallas_src>
import functools

import jax
import jax.numpy as jnp
from jax import lax
from jax.experimental import pallas as pl
from jax.experimental.pallas import tpu as pltpu

_LANE = 128            # MXU / vreg lane width; one output block = 128 samples
_HALO = 128            # causal history per block (supports iir_len - 1 <= 128)
_ALPHA_MIN = 1e-30     # keeps log(alpha) finite (avoids 0 * -inf = NaN at k = 0)


def _round_up(x: int, m: int) -> int:
    return ((x + m - 1) // m) * m


def _toeplitz_bands(z_alpha, iir_len):
    """(Bp,1) coefficients -> (Bp, 256, 128) stacked [T_prev ; T_cur] banded Toeplitz."""
    alpha = jax.nn.sigmoid(z_alpha.astype(jnp.float32))
    alpha = jnp.clip(alpha, _ALPHA_MIN, 1.0 - 1e-5)                            # (Bp, 1)
    taps = jnp.arange(iir_len, dtype=jnp.float32)[None, :]
    h = (1.0 - alpha) * jnp.exp(taps * jnp.log(alpha))                         # (Bp, N)
    # T[b, k, n] = h[b, n - k + 128]; rows 0..127 hit the previous block, 128..255 current.
    d = jnp.arange(_LANE)[None, :] - jnp.arange(2 * _LANE)[:, None] + _HALO    # (256, 128)
    valid = (d >= 0) & (d < iir_len)
    hg = h[:, jnp.clip(d, 0, iir_len - 1)]                                     # (Bp, 256, 128)
    return jnp.where(valid[None, :, :], hg, 0.0)


def _toeplitz_fir_kernel(t_ref, halo_ref, x_ref, o_ref):
    j = pl.program_id(1)
    x = x_ref[...]                                           # (bb, nb, 128) current lane tile
    halo = halo_ref[...]                                     # (bb, 128) last block of prev tile
    halo = jnp.where(j == 0, jnp.zeros_like(halo), halo)     # causal zero history for tile 0
    # prev[:, m] = block m-1 of the (halo ++ tile) sequence
    prev = jnp.concatenate([halo[:, None, :], x], axis=1)[:, :-1, :]           # (bb, nb, 128)
    window = jnp.concatenate([prev, x], axis=2)                                # (bb, nb, 256)
    y = jnp.einsum("bmk,bkn->bmn", window, t_ref[...],
                   preferred_element_type=jnp.float32,
                   precision=lax.Precision.HIGHEST)                            # (bb, nb, 128)
    o_ref[...] = y.astype(o_ref.dtype)


def truncated_one_pole_iir_filter(input_signals, z_alpha, *, iir_len=64,
                                  block_len=16384, batch_tile=16):
    """
    Args:
      input_signals: (B, L) float32 batch of signals.
      z_alpha:       (B, 1) float32 pre-sigmoid one-pole coefficients.
      iir_len:       truncated impulse length N (this kernel supports N <= 129).
      block_len:     lane tile length (rounded to a multiple of 1024).
      batch_tile:    batch tile (rounded to a multiple of 8).
    Returns:
      (B, L) float32 smoothed signals.
    """
    B, L = input_signals.shape
    assert z_alpha.shape == (B, 1)
    assert 1 <= iir_len <= _HALO + 1, "direct Toeplitz kernel supports iir_len - 1 <= 128"

    x = input_signals.astype(jnp.float32)
    z = z_alpha.astype(jnp.float32)

    # Lane tile: multiple of 1024 so the blocked (nb, 128) view stays (8,128)-aligned.
    t = _round_up(max(_LANE, min(int(block_len), _round_up(L, _LANE))), 1024)
    lp = _round_up(L, t)
    nb = t // _LANE                      # 128-sample blocks per lane tile (multiple of 8)
    nt = lp // t                         # lane tiles

    bp = _round_up(B, 8)                 # batch padded to full sublanes
    bb = max(8, (min(int(batch_tile), bp) // 8) * 8)
    while bp % bb:
        bb -= 8

    # Exactly one pad of the signal (batch rows + ragged tail in a single copy).
    xp = jnp.pad(x, ((0, bp - B), (0, lp - L)))              # (Bp, Lp)
    xb = xp.reshape(bp, lp // _LANE, _LANE)                  # free (bitcast) blocked view
    toep = _toeplitz_bands(jnp.pad(z, ((0, bp - B), (0, 0))), iir_len)   # (Bp, 256, 128)

    grid = (bp // bb, nt)

    out = pl.pallas_call(
        _toeplitz_fir_kernel,
        out_shape=jax.ShapeDtypeStruct((bp, lp // _LANE, _LANE), jnp.float32),
        grid=grid,
        in_specs=[
            # Toeplitz bands: resident across all lane tiles of a batch tile.
            pl.BlockSpec((bb, 2 * _LANE, _LANE), lambda i, j: (i, 0, 0)),
            # Causal halo: last 128 samples of the previous lane tile (same buffer, 2-D view).
            pl.BlockSpec((bb, _LANE),
                         lambda i, j, nb=nb: (i, jnp.maximum(j * nb - 1, 0))),
            # Current lane tile, pre-blocked to (bb, nb, 128) so no in-kernel relayout.
            pl.BlockSpec((bb, nb, _LANE), lambda i, j: (i, j, 0)),
        ],
        out_specs=pl.BlockSpec((bb, nb, _LANE), lambda i, j: (i, j, 0)),
        compiler_params=pltpu.CompilerParams(
            dimension_semantics=("parallel", "parallel"),
            vmem_limit_bytes=40 * 1024 * 1024),
    )(toep, xp, xb)

    return out.reshape(bp, lp)[:B, :L]


def _reference(input_signals, z_alpha, iir_len):
    """Pure-JAX reference mirroring the PyTorch module (f32 multiply/add, no MXU)."""
    alpha = jnp.clip(jax.nn.sigmoid(z_alpha.astype(jnp.float32)), _ALPHA_MIN, 1.0 - 1e-5)
    taps = jnp.arange(iir_len, dtype=jnp.float32)[None, :]
    h = (1.0 - alpha) * jnp.exp(taps * jnp.log(alpha))                         # (B, N)
    B, L = input_signals.shape
    xpad = jnp.pad(input_signals.astype(jnp.float32), ((0, 0), (iir_len - 1, 0)))
    idx = (iir_len - 1) + jnp.arange(L)[:, None] - jnp.arange(iir_len)[None, :]
    gathered = xpad[:, idx]                                                    # (B, L, N)
    return (gathered * h[:, None, :]).sum(axis=-1)


if __name__ == "__main__":
    # Small but non-trivial: ragged L exercises the padded tail, B=2 exercises the
    # sublane batch padding; the first config uses block_len=1024 so the lane grid has
    # several tiles and the cross-tile halo path is actually used.
    B, L = 2, 3000
    key = jax.random.PRNGKey(0)
    k1, k2 = jax.random.split(key)
    input_signals = jax.random.normal(k1, (B, L), dtype=jnp.float32)
    z_alpha = jax.random.normal(k2, (B, 1), dtype=jnp.float32)

    configs = [
        dict(iir_len=32, block_len=1024, batch_tile=8),   # multi-tile halo path
        dict(iir_len=129),                                # default tiles, longest impulse
    ]
    for cfg in configs:
        fn = jax.jit(functools.partial(truncated_one_pole_iir_filter, **cfg))
        out = jax.block_until_ready(fn(input_signals, z_alpha))
        ref = _reference(input_signals, z_alpha, cfg["iir_len"])
        assert out.shape == (B, L) and out.dtype == jnp.float32
        assert jnp.allclose(out, ref, rtol=5e-4, atol=1e-5), f"mismatch vs reference: {cfg}"

    print("KERNEL_OK")
</pallas_src>

<mosaic_0001>
module attributes {stable_mosaic.version = 11 : i64} {
  func.func @_toeplitz_fir_kernel(%arg0: i32, %arg1: i32, %arg2: memref<8x256x128xf32, #tpu.memory_space<vmem>>, %arg3: memref<8x128xf32, #tpu.memory_space<vmem>>, %arg4: memref<8x8x128xf32, #tpu.memory_space<vmem>>, %arg5: memref<8x8x128xf32, #tpu.memory_space<vmem>>) attributes {dimension_semantics = [#tpu.dimension_semantics<parallel>, #tpu.dimension_semantics<parallel>], iteration_bounds = array<i64: 1, 3>, scalar_prefetch = 0 : i64, scratch_operands = 0 : i64, tpu.core_type = #tpu.core_type<tc>, window_params = [{transform_indices = @transform_0, window_bounds = array<i64: 8, 256, 128>}, {transform_indices = @transform_1, window_bounds = array<i64: 8, 128>}, {transform_indices = @transform_2, window_bounds = array<i64: 8, 8, 128>}, {transform_indices = @transform_3, window_bounds = array<i64: 8, 8, 128>}]} {
    %c0 = arith.constant 0 : index
    %c0_0 = arith.constant 0 : index
    %c0_1 = arith.constant 0 : index
    %0 = vector.load %arg4[%c0, %c0_0, %c0_1] : memref<8x8x128xf32, #tpu.memory_space<vmem>>, vector<8x8x128xf32>
    %c0_2 = arith.constant 0 : index
    %c0_3 = arith.constant 0 : index
    %1 = vector.load %arg3[%c0_2, %c0_3] : memref<8x128xf32, #tpu.memory_space<vmem>>, vector<8x128xf32>
    %c0_i32 = arith.constant 0 : i32
    %2 = arith.cmpi eq, %arg1, %c0_i32 : i32
    %cst = arith.constant 0.000000e+00 : f32
    %3 = vector.broadcast %cst : f32 to vector<8x128xf32>
    %4 = arith.select %2, %3, %1 : vector<8x128xf32>
    %5 = vector.shape_cast %4 : vector<8x128xf32> to vector<8x1x128xf32>
    %6 = tpu.concatenate %5, %0 in 1 : vector<8x1x128xf32>, vector<8x8x128xf32> -> vector<8x9x128xf32>
    %7 = vector.extract_strided_slice %6 {offsets = [0, 0, 0], sizes = [8, 8, 128], strides = [1, 1, 1]} : vector<8x9x128xf32> to vector<8x8x128xf32>
    %8 = tpu.concatenate %7, %0 in 2 : vector<8x8x128xf32>, vector<8x8x128xf32> -> vector<8x8x256xf32>
    %c0_4 = arith.constant 0 : index
    %c0_5 = arith.constant 0 : index
    %c0_6 = arith.constant 0 : index
    %9 = vector.load %arg2[%c0_4, %c0_5, %c0_6] : memref<8x256x128xf32, #tpu.memory_space<vmem>>, vector<8x256x128xf32>
    "tpu.trace_start"() <{level = 10 : i32, message = "bmk,bkn->bmn"}> : () -> ()
    %cst_7 = arith.constant dense<0.000000e+00> : vector<8x8x128xf32>
    %10 = tpu.matmul %8, %9, %cst_7 {dimension_numbers = #tpu.dot_dimension_numbers<[2], [1], [1], [2], [0, 0, 0, 1, 1, 2], [0], [0]>, precision = #tpu.contract_precision<fp32>} : vector<8x8x256xf32>, vector<8x256x128xf32>, vector<8x8x128xf32> -> vector<8x8x128xf32>
    "tpu.trace_stop"() : () -> ()
    %c0_8 = arith.constant 0 : index
    %c0_9 = arith.constant 0 : index
    %c0_10 = arith.constant 0 : index
    %11 = vector.load %arg5[%c0_8, %c0_9, %c0_10] : memref<8x8x128xf32, #tpu.memory_space<vmem>>, vector<8x8x128xf32>
    tpu.vector_store %arg5[%c0_8, %c0_9, %c0_10], %10 {strides = array<i32>} : memref<8x8x128xf32, #tpu.memory_space<vmem>>, vector<8x8x128xf32>,
    return
  }
  func.func @transform_0(%arg0: i32, %arg1: i32) -> (i32, i32, i32) {
    %c0_i32 = arith.constant 0 : i32
    %c0_i32_0 = arith.constant 0 : i32
    %c0_i32_1 = arith.constant 0 : i32
    return %arg0, %c0_i32, %c0_i32_0 : i32, i32, i32
  }
  func.func @transform_1(%arg0: i32, %arg1: i32) -> (i32, i32) {
    %c8_i32 = arith.constant 8 : i32
    %0 = arith.muli %arg1, %c8_i32 : i32
    %c1_i32 = arith.constant 1 : i32
    %1 = arith.subi %0, %c1_i32 : i32
    %c0_i32 = arith.constant 0 : i32
    %2 = arith.maxsi %1, %c0_i32 : i32
    %c0_i32_0 = arith.constant 0 : i32
    return %arg0, %2 : i32, i32
  }
  func.func @transform_2(%arg0: i32, %arg1: i32) -> (i32, i32, i32) {
    %c0_i32 = arith.constant 0 : i32
    %c0_i32_0 = arith.constant 0 : i32
    return %arg0, %arg1, %c0_i32 : i32, i32, i32
  }
  func.func @transform_3(%arg0: i32, %arg1: i32) -> (i32, i32, i32) {
    %c0_i32 = arith.constant 0 : i32
    %c0_i32_0 = arith.constant 0 : i32
    return %arg0, %arg1, %c0_i32 : i32, i32, i32
  }
}

</mosaic_0001>

<bundles_post_ra>
// kernel: truncated_one_pole_iir_filter.1
= control target key start
LH: loop header
LB: loop body
LE: loop exit
PB: predicated region body
PF: predicated region fallthrough
CT: control target
= control target key end

     0   :  { %s9592_s12 = smov 0   ;;  %s9594_s13 = smov 0   ;;  %s15302_s0 = inlined_call_operand.vmem [shape: f32[8,256,128], index: 0, kind: input, shape index: {}]   ;;  %s15303_s1 = inlined_call_operand.vmem [shape: f32[8,3072], index: 1, kind: input, shape index: {}]   ;;  %s15304_s2 = inlined_call_operand.vmem [shape: f32[8,24,128], index: 2, kind: input, shape index: {}]   ;;  %s15305_s3 = inlined_call_operand.vmem [shape: f32[8,24,128], index: 3, kind: output, shape index: {}]  }
   0x1   :  { %s9596_s14 = smov 0   ;;  %s9598_s15 = smov 0  }
   0x2   :  { %s9600_s16 = smov 0  }
   0x3 LB: > { %s22_s17 = sadd.s32 1, %s9565_s15  ;;  %s7773_s18 = sadd.s32 4294967295, %s9569_s16   ;;  %s9569_s16 = sphi %s9600_s16, %s13_s16   ;;  %s9565_s15 = sphi %s9598_s15, %s16813_s15   ;;  %s9561_s14 = sphi %s9596_s14, %s16812_s14   ;;  %s9557_s13 = sphi %s9594_s13, %s16811_s13   ;;  %s9553_s12 = sphi %s9592_s12, %s16810_s12  }
   0x4   : > { %p23_p0 = scmp.ge.s32.totalorder %s22_s17, 3  ;;  %p103_p1 = scmp.ne.s32.totalorder %s9557_s13, %s9553_s12 }
   0x5   : > { %p104_p2 = scmp.eq.s32.totalorder %s9569_s16, 0  ;;  %p135_p4 = scmp.eq.s32.totalorder %s7773_s18, 2 }
   0x6   : > { %s16815_s17 = smov (%p23_p0, %s22_s17), 0  ;;  %s96_s20 = sadd.s32 1, %s9557_s13 }
   0x7   : > { %p105_p3 = por %p104_p2, %p103_p1  ;;  %s92_s19 = ssub.s32 %s9565_s15, %s16815_s17 }
   0x8   : > { %p94_p5 = scmp.eq.s32.totalorder %s92_s19, 0  ;;  %p9627_p6 = por %p135_p4, %p103_p1 }
   0x9   : > { %p7781_p7 = scmp.ge.s32.totalorder %s9569_s16, 3 }
   0xa   : > { %s9632_s22 = scalar_select %p94_p5, %s9557_s13, %s96_s20  }
   0xb   : > { %167 = sbr.rel (%p7781_p7) target bundleno = 24 (0x18), region = 20 }
  0x10   : > { %189 = sbr.rel (!%p105_p3) target bundleno = 24 (0x18), region = 28  ;;  %s191_s23 = sand.u32 (%p105_p3), 1, %s9557_s13  }
  0x11   : > { %s7783_s24 = sshll.u32 (%p105_p3), %s9565_s15, 3  ;;  %s7782_s25 = sshll.u32 (%p105_p3), %s191_s23, 6 }
  0x12   : > { %s198_s28 = scalar_lea.vmem (%p105_p3), %s15304_s2, %s7783_s24  ;;  %s193_s29 = scalar_lea.vmem (%p105_p3), [#allocation2], %s7782_s25 }
  0x13   : > { %v241_v0 = vld [vmem:[%s198_s28] sm:$0xff] (%p105_p3)  ;;  %v243_v1 = vld [vmem:[%s198_s28 + $0x18] sm:$0xff] (%p105_p3)  ;;  %v245_v2 = vld [vmem:[%s198_s28 + $0x30] sm:$0xff] (%p105_p3) }
  0x14   : > { %242 = vst [vmem:[%s193_s29] sm:$0xff] (%p105_p3), %v241_v0  ;;  %244 = vst [vmem:[%s193_s29 + $0x8] sm:$0xff] (%p105_p3), %v243_v1  ;;  %v247_v3 = vld [vmem:[%s198_s28 + $0x48] sm:$0xff] (%p105_p3)  ;;  %v249_v4 = vld [vmem:[%s198_s28 + $0x60] sm:$0xff] (%p105_p3) }
  0x15   : > { %246 = vst [vmem:[%s193_s29 + $0x10] sm:$0xff] %v245_v2  ;;  %v251_v5 = vld [vmem:[%s198_s28 + $0x78] sm:$0xff]  ;;  %248 = vst [vmem:[%s193_s29 + $0x18] sm:$0xff] %v247_v3  ;;  %v253_v6 = vld [vmem:[%s198_s28 + $0x90] sm:$0xff] }
  0x16   : > { %250 = vst [vmem:[%s193_s29 + $0x20] sm:$0xff] %v249_v4  ;;  %252 = vst [vmem:[%s193_s29 + $0x28] sm:$0xff] %v251_v5  ;;  %v255_v7 = vld [vmem:[%s198_s28 + $0xa8] sm:$0xff] }
  0x17   : > { %254 = vst [vmem:[%s193_s29 + $0x30] sm:$0xff] %v253_v6  ;;  %256 = vst [vmem:[%s193_s29 + $0x38] sm:$0xff] %v255_v7 }
  0x18 PF: > { %p7784_p8 = scmp.ge.s32.totalorder %s9569_s16, 1  ;;  %p261_p9 = scmp.lt.s32.totalorder %s9569_s16, 4 }
  0x1a   : > { %p262_p10 = pnand %p7784_p8, %p261_p9 }
  0x1c   : > { %265 = sbr.rel (%p262_p10) target bundleno = 1091 (0x443), region = 66 }
  0x21   : > { %v469_v8 = vld [vmem:[%s15302_s0 + $0xf8] sm:$0xff]  ;;  %v468_v10 = vld [vmem:[%s15302_s0 + $0xf0] sm:$0xff]  ;;  %v467_v15 = vld [vmem:[%s15302_s0 + $0xe8] sm:$0xff]  ;;  %s7787_s11 = sshll.u32 %s9561_s14, 3  ;;  %s268_s29 = sand.u32 1, %s9553_s12   ;;  %vm429_vm0 = vcmask 1040384  }
  0x22   : > { %v453_v9 = vld [vmem:[%s15302_s0 + $0x78] sm:$0xff]  ;;  %v9651_v11 = vand.u32 4294901760, %v469_v8  ;;  %v9655_v13 = vand.u32 4294901760, %v468_v10  ;;  %v452_v14 = vld [vmem:[%s15302_s0 + $0x70] sm:$0xff]  ;;  %v451_v16 = vld [vmem:[%s15302_s0 + $0x68] sm:$0xff]  ;;  %v9668_v18 = vand.u32 4294901760, %v467_v15 }
  0x23   : > { %v9653_v12 = vand.u32 4294901760, %v453_v9  ;;  %v9666_v17 = vand.u32 4294901760, %v452_v14  ;;  %v9670_v19 = vand.u32 4294901760, %v451_v16  ;;  %v466_v20 = vld [vmem:[%s15302_s0 + $0xe0] sm:$0xff]  ;;  %v465_v22 = vld [vmem:[%s15302_s0 + $0xd8] sm:$0xff]  ;;  %v9699_v28 = vld [vmem:[%s15302_s0 + $0xd0] sm:$0xff] }
  0x24   : > { %v450_v21 = vld [vmem:[%s15302_s0 + $0x60] sm:$0xff]  ;;  %7801 = vmatprep.subr.mxu0 %v9651_v11  ;;  %v9682_v23 = vand.u32 4294901760, %v466_v20  ;;  %v9686_v25 = vand.u32 4294901760, %v465_v22  ;;  %v9689_v26 = vsub.f32 %v469_v8, %v9651_v11  ;;  %v9694_v27 = vld [vmem:[%s15302_s0 + $0x58] sm:$0xff]  ;;  %v9704_v29 = vld [vmem:[%s15302_s0 + $0x50] sm:$0xff]  ;;  %v9714_v32 = vand.u32 4294901760, %v9699_v28 }
  0x25   : > { %v9684_v24 = vand.u32 4294901760, %v450_v21  ;;  %7802 = vmatpush3.msra.mxu0 %v9653_v12  ;;  %v9708_v30 = vand.u32 4294901760, %v9694_v27  ;;  %v9711_v31 = vsub.f32 %v453_v9, %v9653_v12  ;;  %v9717_v33 = vsub.f32 %v468_v10, %v9655_v13  ;;  %v9722_v34 = vld [vmem:[%s15302_s0 + $0xc8] sm:$0xff]  ;;  %v9732_v36 = vld [vmem:[%s15302_s0 + $0xc0] sm:$0xff]  ;;  %v9784_v54 = vld [vmem:[%s15302_s0 + $0xb8] sm:$0xff]  ;;  %s9921_s24 = sadd.s32 4294967295, %s7787_s11 }
  0x26   : > { %15848 = vst [vmem:[#allocation4_spill] sm:$0xff] %v9689_v26  ;;  %v9727_v35 = vld [vmem:[%s15302_s0 + $0x48] sm:$0xff]  ;;  %7803 = vmatprep.subr.mxu0 %v9655_v13  ;;  %v15319_v37 = vand.u32 4294901760, %v9689_v26  ;;  %v9737_v38 = vand.u32 4294901760, %v9704_v29  ;;  %v9740_v39 = vsub.f32 %v452_v14, %v9666_v17  ;;  %v9743_v40 = vand.u32 4294901760, %v9722_v34  ;;  %v9757_v45 = vld [vmem:[%s15302_s0 + $0x40] sm:$0xff] }
  0x27   : > { %7804 = vmatpush3.msra.mxu0 %v9666_v17  ;;  %v15318_v41 = vand.u32 4294901760, %v9711_v31  ;;  %v15317_v42 = vand.u32 4294901760, %v9717_v33  ;;  %v9749_v43 = vsub.f32 %v467_v15, %v9668_v18  ;;  %v9752_v44 = vand.u32 4294901760, %v9727_v35  ;;  %v9797_v59 = vld [vmem:[%s15302_s0 + $0x38] sm:$0xff]  ;;  %v9807_v0 = vld [vmem:[%s15302_s0 + $0xb0] sm:$0xff]  ;;  %v9837_v10 = vld [vmem:[%s15302_s0 + $0xa8] sm:$0xff] }
  0x28   : > { %7805 = vmatprep.subr.mxu0 %v9668_v18  ;;  %v922_v46 = vsub.f32 %v9689_v26, %v15319_v37  ;;  %v15315_v47 = vand.u32 4294901760, %v9740_v39  ;;  %v9765_v48 = vsub.f32 %v451_v16, %v9670_v19  ;;  %v9768_v49 = vand.u32 4294901760, %v9732_v36  ;;  %v9822_v5 = vld [vmem:[%s15302_s0 + $0x30] sm:$0xff]  ;;  %p317_p11 = scmp.gt.s32.totalorder %s9921_s24, 0  ;;  %s9993_s6 = sshll.u32 %s268_s29, 6 }
  0x29   : > { %7806 = vmatpush3.msra.mxu0 %v9670_v19  ;;  %v810_v50 = vsub.f32 %v9711_v31, %v15318_v41  ;;  %v929_v51 = vsub.f32 %v9717_v33, %v15317_v42  ;;  %v15313_v52 = vand.u32 4294901760, %v9749_v43  ;;  %v9779_v53 = vsub.f32 %v466_v20, %v9682_v23  ;;  %v9980_v41 = vld [vmem:[%s15302_s0 + $0x88] sm:$0xff]  ;;  %p342_p12 = scmp.eq.s32.totalorder %s9561_s14, 0  ;;  %p7789_p13 = scmp.lt.s32.totalorder %s9921_s24, 23 }
  0x2a   : > { %7807 = vmatprep.subr.mxu0 %v9682_v23  ;;  %v923_v55 = vand.u32 4294901760, %v922_v46  ;;  %v817_v56 = vsub.f32 %v9740_v39, %v15315_v47  ;;  %v15311_v57 = vand.u32 4294901760, %v9765_v48  ;;  %v9792_v58 = vand.u32 4294901760, %v9757_v45  ;;  %s318_s18 = scalar_select %p317_p11, %s9921_s24, 0 }
  0x2b   : > { %7808 = vmatpush3.msra.mxu0 %v9684_v24  ;;  %v811_v60 = vand.u32 4294901760, %v810_v50  ;;  %v930_v61 = vand.u32 4294901760, %v929_v51  ;;  %v936_v62 = vsub.f32 %v9749_v43, %v15313_v52  ;;  %v15310_v63 = vand.u32 4294901760, %v9779_v53  ;;  %v9951_v52 = vld [vmem:[%s15302_s0 + $0x90] sm:$0xff]  ;;  %s10090_s23 = scalar_lea.vmem [#allocation2], %s9993_s6  ;;  %s7609_s29 = scalar_lea.vmem (%p9627_p6), %s15305_s3, %s7787_s11 }
  0x2c   : > { %7809 = vmatprep.subr.mxu0 %v9686_v25  ;;  %7836 = vmatprep.subr.mxu1 %v923_v55  ;;  %v818_v1 = vand.u32 4294901760, %v817_v56  ;;  %v824_v2 = vsub.f32 %v9765_v48, %v15311_v57  ;;  %v9814_v3 = vsub.f32 %v450_v21, %v9684_v24  ;;  %v9817_v4 = vand.u32 4294901760, %v9784_v54  ;;  %v9851_v21 = vld [vmem:[%s15302_s0 + $0x28] sm:$0xff]  ;;  %v9935_v57 = vld [vmem:[%s15302_s0 + $0x18] sm:$0xff]  ;;  %s16817_s18 = smov (!%p7789_p13, %s318_s18), 23 }
  0x2d   : > { %7810 = vmatpush3.msra.mxu0 %v9708_v30  ;;  %7837 = vmatpush3.msra.mxu1 %v811_v60  ;;  %v937_v6 = vand.u32 4294901760, %v936_v62  ;;  %v943_v7 = vsub.f32 %v9779_v53, %v15310_v63  ;;  %v9829_v8 = vsub.f32 %v465_v22, %v9686_v25  ;;  %v9832_v9 = vand.u32 4294901760, %v9797_v59  ;;  %s7794_s24 = sshll.u32 %s16817_s18, 3 }
  0x2e   : > { %7811 = vmatprep.subr.mxu0 %v9714_v32  ;;  %7838 = vmatprep.subr.mxu1 %v930_v61  ;;  %v825_v14 = vand.u32 4294901760, %v824_v2  ;;  %v15309_v15 = vand.u32 4294901760, %v9814_v3  ;;  %v9843_v16 = vsub.f32 %v9694_v27, %v9708_v30  ;;  %v9846_v20 = vand.u32 4294901760, %v9807_v0  ;;  %s10127_s25 = scalar_select %p342_p12, 0, 255 }
  0x2f   : > { %15849 = vst [vmem:[#allocation5_spill] sm:$0xff] %v9832_v9  ;;  %7812 = vmatpush3.msra.mxu0 %v9737_v38  ;;  %7839 = vmatpush3.msra.mxu1 %v818_v1  ;;  %v944_v22 = vand.u32 4294901760, %v943_v7  ;;  %v15306_v46 = vand.u32 4294901760, %v9829_v8  ;;  %v9857_v50 = vsub.f32 %v9699_v28, %v9714_v32  ;;  %v9860_v27 = vand.u32 4294901760, %v9822_v5  ;;  %v9877_v28 = vld [vmem:[%s15302_s0 + $0xa0] sm:$0xff]  ;;  %s10140_s28 = scalar_lea.vmem %s15303_s1, %s7794_s24  ;;  %s11931_s24 = scalar_lea.vmem [#allocation3], %s9993_s6 }
  0x30   : > { %15850 = vst [vmem:[#allocation6_spill] sm:$0xff] %v9846_v20  ;;  %7813 = vmatprep.subr.mxu0 %v9743_v40  ;;  %7840 = vmatprep.subr.mxu1 %v937_v6  ;;  %v831_v51 = vsub.f32 %v9814_v3, %v15309_v15  ;;  %v15307_v55 = vand.u32 4294901760, %v9843_v16  ;;  %v9869_v56 = vsub.f32 %v9704_v29, %v9737_v38  ;;  %v9872_v60 = vand.u32 4294901760, %v9837_v10 }
  0x31   : > { %15851 = vst [vmem:[#allocation7_spill] sm:$0xff] %v9860_v27  ;;  %7814 = vmatpush3.msra.mxu0 %v9752_v44  ;;  %7841 = vmatpush3.msra.mxu1 %v825_v14  ;;  %v950_v61 = vsub.f32 %v9829_v8, %v15306_v46  ;;  %v15308_v62 = vand.u32 4294901760, %v9857_v50  ;;  %v9887_v29 = vsub.f32 %v9722_v34, %v9743_v40  ;;  %v9890_v1 = vand.u32 4294901760, %v9851_v21  ;;  %v9904_v34 = vld [vmem:[%s15302_s0 + $0x20] sm:$0xff] }
  0x32   : > { %7815 = vmatprep.subr.mxu0 %v9768_v49  ;;  %7842 = vmatprep.subr.mxu1 %v944_v22  ;;  %v832_v2 = vand.u32 4294901760, %v831_v51  ;;  %v838_v6 = vsub.f32 %v9843_v16, %v15307_v55  ;;  %v15312_v7 = vand.u32 4294901760, %v9869_v56  ;;  %v9899_v14 = vsub.f32 %v9727_v35, %v9752_v44  ;;  %v9917_v35 = vld [vmem:[%s15302_s0 + $0x98] sm:$0xff] }
  0x33   : > { %15852 = vst [vmem:[#allocation8_spill] sm:$0xff] %v9890_v1  ;;  %7816 = vmatpush3.msra.mxu0 %v9792_v58  ;;  %v951_v46 = vand.u32 4294901760, %v950_v61  ;;  %v957_v22 = vsub.f32 %v9857_v50, %v15308_v62  ;;  %v15314_v51 = vand.u32 4294901760, %v9887_v29  ;;  %v9912_v55 = vand.u32 4294901760, %v9877_v28 }
  0x34   : > { %15853 = vst [vmem:[#allocation9_spill] sm:$0xff] %v9899_v14  ;;  %7843 = vmatpush3.msra.mxu1 %v832_v2  ;;  %7817 = vmatprep.subr.mxu0 %v9817_v4  ;;  %v839_v61 = vand.u32 4294901760, %v838_v6  ;;  %v845_v62 = vsub.f32 %v9869_v56, %v15312_v7  ;;  %v15316_v15 = vand.u32 4294901760, %v9899_v14  ;;  %v9930_v63 = vsub.f32 %v9732_v36, %v9768_v49 }
  0x35   : > { %7844 = vmatprep.subr.mxu1 %v951_v46  ;;  %7818 = vmatpush3.msra.mxu0 %v9832_v9  ;;  %v958_v2 = vand.u32 4294901760, %v957_v22  ;;  %v964_v6 = vsub.f32 %v9887_v29, %v15314_v51  ;;  %v9942_v7 = vand.u32 4294901760, %v9904_v34  ;;  %v9946_v36 = vsub.f32 %v9757_v45, %v9792_v58  ;;  %v9965_v45 = vld [vmem:[%s15302_s0 + $0x10] sm:$0xff] }
  0x36   : > { %15854 = vst [vmem:[#allocation10_spill] sm:$0xff] %v9930_v63  ;;  %7845 = vmatpush3.msra.mxu1 %v839_v61  ;;  %7819 = vmatprep.subr.mxu0 %v9846_v20  ;;  %v846_v46 = vand.u32 4294901760, %v845_v62  ;;  %v852_v22 = vsub.f32 %v9899_v14, %v15316_v15  ;;  %v15320_v51 = vand.u32 4294901760, %v9930_v63  ;;  %v9960_v47 = vand.u32 4294901760, %v9917_v35 }
  0x37   : > { %15855 = vst [vmem:[#allocation11_spill] sm:$0xff] %v9942_v7  ;;  %15856 = vst [vmem:[#allocation12_spill] sm:$0xff] %v9946_v36  ;;  %7846 = vmatprep.subr.mxu1 %v958_v2  ;;  %7820 = vmatpush3.msra.mxu0 %v9860_v27  ;;  %v965_v62 = vand.u32 4294901760, %v964_v6  ;;  %v15323_v61 = vand.u32 4294901760, %v9946_v36  ;;  %v9972_v15 = vsub.f32 %v9784_v54, %v9817_v4  ;;  %v9975_v42 = vand.u32 4294901760, %v9935_v57 }
  0x38   : > { %7847 = vmatpush3.msra.mxu1 %v846_v46  ;;  %7821 = vmatprep.subr.mxu0 %v9872_v60  ;;  %v853_v2 = vand.u32 4294901760, %v852_v22  ;;  %v971_v6 = vsub.f32 %v9930_v63, %v15320_v51  ;;  %v9988_v54 = vsub.f32 %v9797_v59, %v9832_v9  ;;  %v9991_v37 = vand.u32 4294901760, %v9951_v52  ;;  %v10011_v63 = vld [vmem:[%s15302_s0 + $0x8] sm:$0xff] }
  0x39   : > { %15857 = vst [vmem:[#allocation13_spill] sm:$0xff] %v9972_v15  ;;  %7848 = vmatprep.subr.mxu1 %v965_v62  ;;  %7822 = vmatpush3.msra.mxu0 %v9890_v1  ;;  %v859_v46 = vsub.f32 %v9946_v36, %v15323_v61  ;;  %v10003_v59 = vsub.f32 %v9807_v0, %v9846_v20  ;;  %v10006_v51 = vand.u32 4294901760, %v9965_v45  ;;  %v10021_v0 = vand.u32 4294901760, %v9980_v41  ;;  %v10026_v36 = vld [vmem:[%s15302_s0 + $0x80] sm:$0xff] }
  0x3a   : > { %15858 = vst [vmem:[#allocation14_spill] sm:$0xff] %v9988_v54  ;;  %7849 = vmatpush3.msra.mxu1 %v853_v2  ;;  %7823 = vmatprep.subr.mxu0 %v9912_v55  ;;  %v972_v62 = vand.u32 4294901760, %v971_v6  ;;  %v10018_v22 = vsub.f32 %v9822_v5, %v9860_v27  ;;  %v15863_v6 = vand.u32 4294901760, %v9972_v15  ;;  %v10038_v27 = vsub.f32 %v9837_v10, %v9872_v60  ;;  %v10055_v10 = vld [vmem:[%s15302_s0] sm:$0xff] }
  0x3b   : > { %15859 = vst [vmem:[#allocation15_spill] sm:$0xff] %v10003_v59  ;;  %15860 = vst [vmem:[#allocation16_spill] sm:$0xff] %v10006_v51  ;;  %7824 = vmatpush3.msra.mxu0 %v9942_v7  ;;  %v860_v2 = vand.u32 4294901760, %v859_v46  ;;  %v15340_v5 = vand.u32 4294901760, %v10003_v59  ;;  %v15865_v20 = vand.u32 4294901760, %v9988_v54  ;;  %v10046_v9 = vand.u32 4294901760, %v10011_v63 }
  0x3c   : > { %15861 = vst [vmem:[#allocation17_spill] sm:$0xff] %v10018_v22  ;;  %15862 = vst [vmem:[#allocation18_spill] sm:$0xff] %v10021_v0  ;;  %v978_v61 = vsub.f32 %v9972_v15, %v15863_v6  ;;  %7850 = vmatprep.subr.mxu1 %v972_v62  ;;  %7825 = vmatprep.subr.mxu0 %v9960_v47  ;;  %v10050_v6 = vsub.f32 %v9851_v21, %v9890_v1  ;;  %v15343_v46 = vand.u32 4294901760, %v10038_v27 }
  0x3d   : > { %15864 = vst [vmem:[#allocation19_spill] sm:$0xff] %v10038_v27  ;;  %v866_v14 = vsub.f32 %v9988_v54, %v15865_v20  ;;  %15866 = vst [vmem:[#allocation20_spill] sm:$0xff] %v10046_v9  ;;  %7851 = vmatpush3.msra.mxu1 %v860_v2  ;;  %7826 = vmatpush3.msra.mxu0 %v9975_v42  ;;  %v985_v20 = vsub.f32 %v10003_v59, %v15340_v5  ;;  %v10063_v54 = vand.u32 4294901760, %v10026_v36 }
  0x3e   : > { %v979_v62 = vand.u32 4294901760, %v978_v61  ;;  %7827 = vmatprep.subr.mxu0 %v9991_v37  ;;  %v15868_v1 = vand.u32 4294901760, %v10018_v22  ;;  %v15350_v61 = vand.u32 4294901760, %v10050_v6  ;;  %v10072_v15 = vsub.f32 %v9877_v28, %v9912_v55  ;;  %v10093_v28 = vld [vmem:[%s10090_s23] sm:$0xff] }
  0x3f   : > { %15867 = vst [vmem:[#allocation21_spill] sm:$0xff] %v10063_v54  ;;  %v867_v21 = vand.u32 4294901760, %v866_v14  ;;  %v986_v5 = vand.u32 4294901760, %v985_v20  ;;  %7828 = vmatpush3.msra.mxu0 %v10006_v51  ;;  %v992_v14 = vsub.f32 %v10038_v27, %v15343_v46  ;;  %v10083_v59 = vand.u32 4294901760, %v10055_v10 }
  0x40   : > { %v873_v2 = vsub.f32 %v10018_v22, %v15868_v1  ;;  %15869 = vst [vmem:[#allocation22_spill] sm:$0xff] %v10072_v15  ;;  %7852 = vmatprep.subr.mxu1 %v979_v62  ;;  %v10087_v1 = vsub.f32 %v9904_v34, %v9942_v7  ;;  %7829 = vmatprep.subr.mxu0 %v10021_v0  ;;  %v15351_v46 = vand.u32 4294901760, %v10072_v15  ;;  %v352_v27 = vlaneseq }
  0x41   : > { %15870 = vst [vmem:[#allocation23_spill] sm:$0xff] %v10083_v59  ;;  %7853 = vmatpush3.msra.mxu1 %v867_v21  ;;  %v880_v20 = vsub.f32 %v10050_v6, %v15350_v61  ;;  %v993_v34 = vand.u32 4294901760, %v992_v14  ;;  %7830 = vmatpush3.msra.mxu0 %v10046_v9  ;;  %v10103_v22 = vand.u32 4294901760, %v10093_v28  ;;  %v10107_v21 = vsub.f32 %v9917_v35, %v9960_v47 }
  0x42   : > { %v874_v62 = vand.u32 4294901760, %v873_v2  ;;  %7854 = vmatprep.subr.mxu1 %v986_v5  ;;  %v15354_v7 = vand.u32 4294901760, %v10087_v1  ;;  %7831 = vmatprep.subr.mxu0 %v10063_v54  ;;  %v999_v5 = vsub.f32 %v10072_v15, %v15351_v46  ;;  %v413_v14 = vrot.slane %v10093_v28, 7 }
  0x43   : > { %15871 = vst [vmem:[#allocation24_spill] sm:$0xff] %v10103_v22  ;;  %15872 = vst [vmem:[#allocation25_spill] sm:$0xff] %v10107_v21  ;;  %v881_v2 = vand.u32 4294901760, %v880_v20  ;;  %7832 = vmatpush3.msra.mxu0 %v10083_v59  ;;  %v10121_v35 = vsub.f32 %v10093_v28, %v10103_v22  ;;  %v10131_v46 = vsub.f32 %v9935_v57, %v9975_v42  ;;  %1031 = vmatprep.mubr.f32.mxu1 %v10103_v22  ;;  %v9524_v57 = vld [vmem:[%s10140_s28] sm:%s10127_s25] }
  0x44   : > { %7855 = vmatpush3.msra.mxu1 %v874_v62  ;;  %v887_v61 = vsub.f32 %v10087_v1, %v15354_v7  ;;  %v15355_v62 = vand.u32 4294901760, %v10107_v21  ;;  %v1000_v20 = vand.u32 4294901760, %v999_v5  ;;  %7871 = vmatprep.subr.mxu0 %v9689_v26  ;;  %v10150_v5 = vsub.f32 %v9965_v45, %v10006_v51 }
  0x45   : > { %7856 = vmatprep.subr.mxu1 %v993_v34  ;;  %v353_v34 = vshrl.u32 %v352_v27, 7  ;;  %v792_v7 = vand.u32 4294901760, %v10121_v35 }
  0x46   : > { %7857 = vmatpush3.msra.mxu1 %v881_v2  ;;  %v888_v15 = vand.u32 4294901760, %v887_v61  ;;  %v1006_v28 = vsub.f32 %v10107_v21, %v15355_v62  ;;  %v9571_v2 = vmov 1966171168   ;;  %v10146_v61 = vsub.f32 %v9951_v52, %v9991_v37 }
  0x47   : > { %v350_v27 = vunpack.c.l.s4 %v9571_v2  ;;  %7858 = vmatprep.subr.mxu1 %v1000_v20  ;;  %v10154_v62 = vsub.f32 %v9980_v41, %v10021_v0  ;;  %v793_v2 = vsub.f32 %v10121_v35, %v792_v7  ;;  %v10159_v20 = vsub.f32 %v10011_v63, %v10046_v9 }
  0x48   : > { %7859 = vmatpush3.msra.mxu1 %v888_v15  ;;  %v1007_v26 = vand.u32 4294901760, %v1006_v28  ;;  %v15873_v52 = vand.u32 4294901760, %v10131_v46  ;;  %v15368_v45 = vand.u32 4294901760, %v10146_v61  ;;  %v15367_v51 = vand.u32 4294901760, %v10150_v5 }
  0x49   : > { %v351_v22 = vunpack.c.0.s8 %v350_v27  ;;  %v15370_v41 = vand.u32 4294901760, %v10154_v62  ;;  %v794_v15 = vand.u32 4294901760, %v793_v2  ;;  %v15369_v28 = vand.u32 4294901760, %v10159_v20 }
  0x4a   : > { %v894_v21 = vsub.f32 %v10131_v46, %v15873_v52  ;;  %7860 = vmatprep.subr.mxu1 %v1007_v26  ;;  %v10174_v63 = vsub.f32 %v10026_v36, %v10063_v54  ;;  %v1013_v52 = vsub.f32 %v10146_v61, %v15368_v45  ;;  %v901_v9 = vsub.f32 %v10150_v5, %v15367_v51 }
  0x4b   : > { %v10169_v0 = vsub.s32 %v351_v22, %v353_v34  ;;  %v1020_v26 = vsub.f32 %v10154_v62, %v15370_v41  ;;  %795 = vmatprep.mubr.f32.mxu0 %v794_v15  ;;  %v908_v36 = vsub.f32 %v10159_v20, %v15369_v28  ;;  %v10194_v34 = vsub.f32 %v10055_v10, %v10083_v59 }
  0x4c   : > { %v895_v27 = vand.u32 4294901760, %v894_v21  ;;  %v15372_v21 = vand.u32 4294901760, %v10174_v63  ;;  %v1014_v2 = vand.u32 4294901760, %v1013_v52  ;;  %v902_v51 = vand.u32 4294901760, %v901_v9 }
  0x4d   : > { %15874 = vst [vmem:[#allocation26_spill] sm:$0xff] %v10169_v0  ;;  %v10186_v22 = vrot.slane %v9524_v57, %v10169_v0  ;;  %v1021_v45 = vand.u32 4294901760, %v1020_v26  ;;  %v909_v57 = vand.u32 4294901760, %v908_v36  ;;  %v15371_v41 = vand.u32 4294901760, %v10194_v34 }
  0x4e   : > { %7861 = vmatpush3.msra.mxu1 %v895_v27  ;;  %v1027_v28 = vsub.f32 %v10174_v63, %v15372_v21  ;;  %v15888_v21 = vld [vmem:[#allocation11_spill] sm:$0xff] }
  0x4f   : > { %v10198_v15 = vrot.slane %v10186_v22, %v10169_v0  ;;  %7862 = vmatprep.subr.mxu1 %v1014_v2  ;;  %v915_v9 = vsub.f32 %v10194_v34, %v15371_v41  ;;  %v15887_v41 = vld [vmem:[#allocation17_spill] sm:$0xff]  ;;  %v15891_v0 = vld [vmem:[#allocation16_spill] sm:$0xff] }
  0x50   : > { %7863 = vmatpush3.msra.mxu1 %v902_v51  ;;  %v1028_v27 = vand.u32 4294901760, %v1027_v28  ;;  %v15879_v28 = vld [vmem:[#allocation6_spill] sm:$0xff] }
  0x51   : > { %15875 = vst [vmem:[#allocation27_spill] sm:$0xff] %v10198_v15  ;;  %v430_v10 = vsel %vm429_vm0, %v10198_v15, %v413_v14  ;;  %7864 = vmatprep.subr.mxu1 %v1021_v45  ;;  %v916_v36 = vand.u32 4294901760, %v915_v9  ;;  %v15878_v45 = vld [vmem:[#allocation9_spill] sm:$0xff]  ;;  %v15890_v15 = vld [vmem:[#allocation22_spill] sm:$0xff] }
  0x52   : > { %v10206_v52 = vand.u32 4294901760, %v430_v10  ;;  %7865 = vmatpush3.msra.mxu1 %v909_v57  ;;  %v15880_v57 = vld [vmem:[#allocation10_spill] sm:$0xff]  ;;  %v15883_v9 = vld [vmem:[#allocation13_spill] sm:$0xff] }
  0x53   : > { %7866 = vmatprep.subr.mxu1 %v1028_v27  ;;  %v15882_v27 = vld [vmem:[#allocation12_spill] sm:$0xff] }
  0x54   : > { %15876 = vst [vmem:[#allocation28_spill] sm:$0xff] %v10206_v52  ;;  %v10212_v26 = vsub.f32 %v430_v10, %v10206_v52  ;;  %7867 = vmatpush3.msra.mxu1 %v916_v36  ;;  %v15881_v10 = vld [vmem:[#allocation7_spill] sm:$0xff]  ;;  %v15884_v36 = vld [vmem:[#allocation8_spill] sm:$0xff] }
  0x55   : > { %1033 = vmatmul.mubr.f32.vlgmr.msra.gmra.mxu1 %v10206_v52  ;;  %7906 = vmatprep.subr.mxu1 %v9651_v11  ;;  %v15893_v52 = vld [vmem:[#allocation18_spill] sm:$0xff] }
  0x56   : > { %v15373_v2 = vand.u32 4294901760, %v10212_v26  ;;  %7907 = vmatpush3.msra.mxu1 %v9653_v12  ;;  %1275 = vmatprep.mubr.f32.mxu1 %v792_v7  ;;  %v15877_v7 = vld [vmem:[#allocation5_spill] sm:$0xff] }
  0x57   : > { %7908 = vmatprep.subr.mxu1 %v9655_v13 }
  0x58   : > { %v799_v51 = vsub.f32 %v10212_v26, %v15373_v2  ;;  %7909 = vmatpush3.msra.mxu1 %v9666_v17  ;;  %v15889_v2 = vld [vmem:[#allocation19_spill] sm:$0xff] }
  0x59   : > { %7910 = vmatprep.subr.mxu1 %v9668_v18 }
  0x5a   : > { %v800_v14 = vand.u32 4294901760, %v799_v51  ;;  %7911 = vmatpush3.msra.mxu1 %v9670_v19  ;;  %v15885_v51 = vld [vmem:[#allocation14_spill] sm:$0xff] }
  0x5b   : > { %7912 = vmatprep.subr.mxu1 %v9682_v23 }
  0x5c   : > { %801 = vmatmul.mubr.f32.vlgmr.msra.gmra.mxu0 %v800_v14  ;;  %7913 = vmatpush3.msra.mxu1 %v9684_v24  ;;  %v15886_v14 = vld [vmem:[#allocation15_spill] sm:$0xff] }
  0x5d   : > { %7872 = vmatpush3.msra.mxu0 %v9711_v31  ;;  %7914 = vmatprep.subr.mxu1 %v9686_v25 }
  0x5e   : > { %7873 = vmatprep.subr.mxu0 %v9717_v33  ;;  %7915 = vmatpush3.msra.mxu1 %v9708_v30 }
  0x5f   : > { %7874 = vmatpush3.msra.mxu0 %v9740_v39  ;;  %7916 = vmatprep.subr.mxu1 %v9714_v32 }
  0x60   : > { %7875 = vmatprep.subr.mxu0 %v9749_v43  ;;  %7917 = vmatpush3.msra.mxu1 %v9737_v38 }
  0x61   : > { %7876 = vmatpush3.msra.mxu0 %v9765_v48  ;;  %7918 = vmatprep.subr.mxu1 %v9743_v40 }
  0x62   : > { %7877 = vmatprep.subr.mxu0 %v9779_v53  ;;  %7919 = vmatpush3.msra.mxu1 %v9752_v44 }
  0x63   : > { %7878 = vmatpush3.msra.mxu0 %v9814_v3  ;;  %7920 = vmatprep.subr.mxu1 %v9768_v49 }
  0x64   : > { %7879 = vmatprep.subr.mxu0 %v9829_v8  ;;  %7921 = vmatpush3.msra.mxu1 %v9792_v58 }
  0x65   : > { %7880 = vmatpush3.msra.mxu0 %v9843_v16  ;;  %7922 = vmatprep.subr.mxu1 %v9817_v4 }
  0x66   : > { %7881 = vmatprep.subr.mxu0 %v9857_v50  ;;  %7923 = vmatpush3.msra.mxu1 %v15877_v7 }
  0x67   : > { %7882 = vmatpush3.msra.mxu0 %v9869_v56  ;;  %7924 = vmatprep.subr.mxu1 %v15879_v28 }
  0x68   : > { %7883 = vmatprep.subr.mxu0 %v9887_v29  ;;  %7925 = vmatpush3.msra.mxu1 %v15881_v10 }
  0x69   : > { %7884 = vmatpush3.msra.mxu0 %v15878_v45  ;;  %7926 = vmatprep.subr.mxu1 %v9872_v60 }
  0x6a   : > { %7885 = vmatprep.subr.mxu0 %v15880_v57  ;;  %7927 = vmatpush3.msra.mxu1 %v15884_v36 }
  0x6b   : > { %7886 = vmatpush3.msra.mxu0 %v15882_v27  ;;  %7928 = vmatprep.subr.mxu1 %v9912_v55 }
  0x6c   : > { %7887 = vmatprep.subr.mxu0 %v15883_v9  ;;  %1168 = vmatprep.mubr.f32.mxu0 %v10121_v35  ;;  %v15892_v35 = vld [vmem:[#allocation25_spill] sm:$0xff] }
  0x6d   : > { %7888 = vmatpush3.msra.mxu0 %v15885_v51  ;;  %7929 = vmatpush3.msra.mxu1 %v15888_v21  ;;  %v15894_v21 = vld [vmem:[#allocation20_spill] sm:$0xff] }
  0x6e   : > { %7889 = vmatprep.subr.mxu0 %v15886_v14  ;;  %7930 = vmatprep.subr.mxu1 %v9960_v47 }
  0x6f   : > { %7890 = vmatpush3.msra.mxu0 %v15887_v41  ;;  %7931 = vmatpush3.msra.mxu1 %v9975_v42 }
  0x70   : > { %7891 = vmatprep.subr.mxu0 %v15889_v2  ;;  %7932 = vmatprep.subr.mxu1 %v9991_v37 }
  0x71   : > { %7892 = vmatpush3.msra.mxu0 %v10050_v6  ;;  %7933 = vmatpush3.msra.mxu1 %v15891_v0  ;;  %v15895_v0 = vand.u32 4294901760, %v10212_v26 }
  0x72   : > { %7893 = vmatprep.subr.mxu0 %v15890_v15  ;;  %7934 = vmatprep.subr.mxu1 %v15893_v52 }
  0x73   : > { %7894 = vmatpush3.msra.mxu0 %v10087_v1  ;;  %7935 = vmatpush3.msra.mxu1 %v15894_v21  ;;  %v15898_v21 = vand.u32 4294901760, %v9711_v31  ;;  %v485_v31 = vld [vmem:[%s15302_s0 + $0x178] sm:$0xff] }
  0x74   : > { %7895 = vmatprep.subr.mxu0 %v15892_v35  ;;  %7936 = vmatprep.subr.mxu1 %v10063_v54 }
  0x75   : > { %7896 = vmatpush3.msra.mxu0 %v10131_v46  ;;  %7937 = vmatpush3.msra.mxu1 %v10083_v59  ;;  %v15896_v59 = vld [vmem:[#allocation4_spill] sm:$0xff] }
  0x76   : > { %7897 = vmatprep.subr.mxu0 %v10146_v61  ;;  %1279 = vmatmul.mubr.f32.vlgmr.msra.gmra.mxu1 %v15895_v0  ;;  %v15897_v54 = vand.u32 4294901760, %v15896_v59 }
  0x77   : > { %7898 = vmatpush3.msra.mxu0 %v10150_v5  ;;  %7976 = vmatprep.subr.mxu1 %v9651_v11  ;;  %v15899_v11 = vand.u32 4294901760, %v9717_v33  ;;  %v10318_v33 = vand.u32 4294901760, %v485_v31 }
  0x78   : > { %7899 = vmatprep.subr.mxu0 %v10154_v62  ;;  %7977 = vmatpush3.msra.mxu1 %v9653_v12  ;;  %v15900_v12 = vand.u32 4294901760, %v9740_v39  ;;  %v15905_v39 = vand.u32 4294901760, %v9829_v8 }
  0x79   : > { %7900 = vmatpush3.msra.mxu0 %v10159_v20  ;;  %7978 = vmatprep.subr.mxu1 %v9655_v13  ;;  %v15901_v13 = vand.u32 4294901760, %v9749_v43  ;;  %v10346_v8 = vsub.f32 %v485_v31, %v10318_v33 }
  0x7a   : > { %7901 = vmatprep.subr.mxu0 %v10174_v63  ;;  %7979 = vmatpush3.msra.mxu1 %v9666_v17  ;;  %v15902_v17 = vand.u32 4294901760, %v9765_v48  ;;  %v15906_v48 = vand.u32 4294901760, %v9843_v16  ;;  %v15910_v16 = vand.u32 4294901760, %v9887_v29  ;;  %v498_v29 = vld [vmem:[%s15302_s0 + $0x1e0] sm:$0xff] }
  0x7b   : > { %7902 = vmatpush3.msra.mxu0 %v10194_v34  ;;  %7980 = vmatprep.subr.mxu1 %v9668_v18  ;;  %v501_v18 = vld [vmem:[%s15302_s0 + $0x1f8] sm:$0xff] }
  0x7c   : > { %1171 = vmatmul.mubr.f32.vlgmr.msra.gmra.mxu0 %v10212_v26  ;;  %7941 = vmatprep.subr.mxu0 %v15897_v54  ;;  %v10326_v43 = vand.u32 4294901760, %v501_v18  ;;  %v15915_v26 = vand.u32 4294901760, %v15882_v27  ;;  %v15917_v27 = vand.u32 4294901760, %v15885_v51 }
  0x7d   : > { %7942 = vmatpush3.msra.mxu0 %v15898_v21  ;;  %7981 = vmatpush3.msra.mxu1 %v9670_v19  ;;  %v15903_v19 = vand.u32 4294901760, %v9779_v53  ;;  %v481_v21 = vld [vmem:[%s15302_s0 + $0x158] sm:$0xff] }
  0x7e   : > { %7943 = vmatprep.subr.mxu0 %v15899_v11  ;;  %7982 = vmatprep.subr.mxu1 %v9682_v23  ;;  %v15904_v23 = vand.u32 4294901760, %v9814_v3  ;;  %v15908_v3 = vand.u32 4294901760, %v9869_v56  ;;  %v15911_v56 = vand.u32 4294901760, %v15878_v45  ;;  %v15916_v11 = vand.u32 4294901760, %v15883_v9 }
  0x7f   : > { %7944 = vmatpush3.msra.mxu0 %v15900_v12  ;;  %7983 = vmatpush3.msra.mxu1 %v9684_v24  ;;  %v484_v24 = vld [vmem:[%s15302_s0 + $0x170] sm:$0xff]  ;;  %v10396_v12 = vand.u32 4294901760, %v498_v29 }
  0x80   : > { %7945 = vmatprep.subr.mxu0 %v15901_v13  ;;  %7984 = vmatprep.subr.mxu1 %v9686_v25  ;;  %v500_v25 = vld [vmem:[%s15302_s0 + $0x1f0] sm:$0xff]  ;;  %v10337_v53 = vand.u32 4294901760, %v484_v24 }
  0x81   : > { %7946 = vmatpush3.msra.mxu0 %v15902_v17  ;;  %7985 = vmatpush3.msra.mxu1 %v9708_v30  ;;  %v15907_v30 = vand.u32 4294901760, %v9857_v50  ;;  %v482_v50 = vld [vmem:[%s15302_s0 + $0x160] sm:$0xff]  ;;  %v10407_v17 = vand.u32 4294901760, %v481_v21 }
  0x82   : > { %7947 = vmatprep.subr.mxu0 %v15903_v19  ;;  %7986 = vmatprep.subr.mxu1 %v9714_v32  ;;  %v499_v32 = vld [vmem:[%s15302_s0 + $0x1e8] sm:$0xff]  ;;  %v10374_v59 = vsub.f32 %v484_v24, %v10337_v53  ;;  %v10387_v45 = vand.u32 4294901760, %v482_v50  ;;  %v15921_v19 = vand.u32 4294901760, %v15887_v41 }
  0x83   : > { %7948 = vmatpush3.msra.mxu0 %v15904_v23  ;;  %7987 = vmatpush3.msra.mxu1 %v9737_v38  ;;  %v10348_v38 = vand.u32 4294901760, %v500_v25  ;;  %v10365_v54 = vand.u32 4294901760, %v499_v32  ;;  %15919 = vst [vmem:[#allocation7_spill] sm:$0xff] %v10407_v17  ;;  %v479_v41 = vld [vmem:[%s15302_s0 + $0x148] sm:$0xff] }
  0x84   : > { %7949 = vmatprep.subr.mxu0 %v15905_v39  ;;  %7988 = vmatprep.subr.mxu1 %v9743_v40  ;;  %v483_v40 = vld [vmem:[%s15302_s0 + $0x168] sm:$0xff]  ;;  %v10426_v23 = vsub.f32 %v482_v50, %v10387_v45 }
  0x85   : > { %7950 = vmatpush3.msra.mxu0 %v15906_v48  ;;  %7989 = vmatpush3.msra.mxu1 %v9752_v44  ;;  %15909 = vst [vmem:[#allocation5_spill] sm:$0xff] %v10348_v38  ;;  %v10360_v44 = vsub.f32 %v501_v18, %v10326_v43  ;;  %15912 = vst [vmem:[#allocation9_spill] sm:$0xff] %v10365_v54  ;;  %v10376_v0 = vand.u32 4294901760, %v483_v40  ;;  %v10413_v9 = vsub.f32 %v499_v32, %v10365_v54  ;;  %v495_v39 = vld [vmem:[%s15302_s0 + $0x1c8] sm:$0xff]  ;;  %v15955_v32 = vld [vmem:[#allocation28_spill] sm:$0xff] }
  0x86   : > { %7951 = vmatprep.subr.mxu0 %v15907_v30  ;;  %7990 = vmatprep.subr.mxu1 %v9768_v49  ;;  %v15913_v49 = vand.u32 4294901760, %v15880_v57  ;;  %v10391_v57 = vsub.f32 %v500_v25, %v10348_v38  ;;  %v15920_v18 = vand.u32 4294901760, %v15886_v14  ;;  %v10453_v30 = vsub.f32 %v498_v29, %v10396_v12  ;;  %v15930_v29 = vld [vmem:[#allocation11_spill] sm:$0xff] }
  0x87   : > { %7952 = vmatpush3.msra.mxu0 %v15908_v3  ;;  %7991 = vmatpush3.msra.mxu1 %v9792_v58  ;;  %15914 = vst [vmem:[#allocation6_spill] sm:$0xff] %v10376_v0  ;;  %v497_v58 = vld [vmem:[%s15302_s0 + $0x1d8] sm:$0xff]  ;;  %v15388_v13 = vand.u32 4294901760, %v10360_v44  ;;  %v10419_v51 = vsub.f32 %v483_v40, %v10376_v0  ;;  %v15925_v3 = vand.u32 4294901760, %v10050_v6  ;;  %v15382_v40 = vand.u32 4294901760, %v10413_v9 }
  0x88   : > { %7953 = vmatprep.subr.mxu0 %v15910_v16  ;;  %7992 = vmatprep.subr.mxu1 %v9817_v4  ;;  %v15385_v4 = vand.u32 4294901760, %v10346_v8  ;;  %v10405_v31 = vand.u32 4294901760, %v497_v58  ;;  %v478_v16 = vld [vmem:[%s15302_s0 + $0x140] sm:$0xff] }
  0x89   : > { %7954 = vmatpush3.msra.mxu0 %v15911_v56  ;;  %7993 = vmatpush3.msra.mxu1 %v15877_v7  ;;  %v496_v7 = vld [vmem:[%s15302_s0 + $0x1d0] sm:$0xff]  ;;  %v10448_v25 = vsub.f32 %v10360_v44, %v15388_v13  ;;  %v15929_v56 = vand.u32 4294901760, %v15890_v15  ;;  %v15933_v15 = vand.u32 4294901760, %v10087_v1  ;;  %v15935_v1 = vand.u32 4294901760, %v15892_v35 }
  0x8a   : > { %7955 = vmatprep.subr.mxu0 %v15913_v49  ;;  %7994 = vmatprep.subr.mxu1 %v15879_v28  ;;  %15918 = vst [vmem:[#allocation10_spill] sm:$0xff] %v10405_v31  ;;  %v480_v28 = vld [vmem:[%s15302_s0 + $0x150] sm:$0xff]  ;;  %v10431_v14 = vsub.f32 %v10346_v8, %v15385_v4  ;;  %v10433_v24 = vand.u32 4294901760, %v496_v7  ;;  %v10468_v50 = vsub.f32 %v497_v58, %v10405_v31  ;;  %v10478_v49 = vand.u32 4294901760, %v495_v39  ;;  %v494_v58 = vld [vmem:[%s15302_s0 + $0x1c0] sm:$0xff] }
  0x8b   : > { %7956 = vmatpush3.msra.mxu0 %v15915_v26  ;;  %7995 = vmatpush3.msra.mxu1 %v15881_v10  ;;  %v15383_v10 = vand.u32 4294901760, %v10374_v59  ;;  %v10450_v48 = vand.u32 4294901760, %v480_v28  ;;  %v15387_v26 = vand.u32 4294901760, %v10419_v51  ;;  %v10518_v35 = vsub.f32 %v10413_v9, %v15382_v40 }
  0x8c   : > { %7957 = vmatprep.subr.mxu0 %v15916_v11  ;;  %7996 = vmatprep.subr.mxu1 %v9872_v60  ;;  %15922 = vst [vmem:[#allocation12_spill] sm:$0xff] %v10433_v24  ;;  %v15384_v60 = vand.u32 4294901760, %v10391_v57  ;;  %15928 = vst [vmem:[#allocation14_spill] sm:$0xff] %v10468_v50  ;;  %v15942_v4 = vand.u32 4294901760, %v10150_v5  ;;  %v476_v5 = vld [vmem:[%s15302_s0 + $0x130] sm:$0xff] }
  0x8d   : > { %7958 = vmatpush3.msra.mxu0 %v15917_v27  ;;  %7997 = vmatpush3.msra.mxu1 %v15884_v36  ;;  %v15923_v36 = vand.u32 4294901760, %v15889_v2  ;;  %15924 = vst [vmem:[#allocation13_spill] sm:$0xff] %v10450_v48  ;;  %v15926_v2 = vld [vmem:[#allocation24_spill] sm:$0xff]  ;;  %v10476_v6 = vsub.f32 %v10374_v59, %v15383_v10  ;;  %15931 = vst [vmem:[#allocation15_spill] sm:$0xff] %v10478_v49  ;;  %v10539_v10 = vsub.f32 %v10419_v51, %v15387_v26 }
  0x8e   : > { %7959 = vmatprep.subr.mxu0 %v15920_v18  ;;  %7998 = vmatprep.subr.mxu1 %v9912_v55  ;;  %v10461_v55 = vsub.f32 %v481_v21, %v10407_v17  ;;  %v10480_v21 = vand.u32 4294901760, %v479_v41  ;;  %v10493_v27 = vsub.f32 %v10391_v57, %v15384_v60  ;;  %v15386_v18 = vand.u32 4294901760, %v10426_v23 }
  0x8f   : > { %7960 = vmatpush3.msra.mxu0 %v15921_v19  ;;  %1445 = vmatprep.mubr.f32.mxu0 %v15926_v2  ;;  %v477_v19 = vld [vmem:[%s15302_s0 + $0x138] sm:$0xff]  ;;  %v10612_v11 = vand.u32 4294901760, %v476_v5 }
  0x90   : > { %7961 = vmatprep.subr.mxu0 %v15923_v36  ;;  %15927 = vst [vmem:[#allocation8_spill] sm:$0xff] %v10461_v55  ;;  %7999 = vmatpush3.msra.mxu1 %v15930_v29  ;;  %15932 = vst [vmem:[#allocation17_spill] sm:$0xff] %v10480_v21  ;;  %v10500_v36 = vsub.f32 %v496_v7, %v10433_v24  ;;  %v10510_v29 = vand.u32 4294901760, %v478_v16  ;;  %v10525_v7 = vld [vmem:[%s15302_s0 + $0x1b8] sm:$0xff]  ;;  %v10534_v40 = vsub.f32 %v479_v41, %v10480_v21  ;;  %v10555_v41 = vld [vmem:[%s15302_s0 + $0x1b0] sm:$0xff] }
  0x91   : > { %7962 = vmatpush3.msra.mxu0 %v15925_v3  ;;  %8000 = vmatprep.subr.mxu1 %v9960_v47  ;;  %v10507_v3 = vsub.f32 %v480_v28, %v10450_v48  ;;  %v15390_v28 = vand.u32 4294901760, %v10468_v50  ;;  %v10541_v60 = vand.u32 4294901760, %v477_v19  ;;  %v10576_v13 = vand.u32 4294901760, %v10525_v7 }
  0x92   : > { %7963 = vmatprep.subr.mxu0 %v15929_v56  ;;  %15934 = vst [vmem:[#allocation19_spill] sm:$0xff] %v10500_v36  ;;  %8001 = vmatpush3.msra.mxu1 %v9975_v42  ;;  %v15389_v56 = vand.u32 4294901760, %v10453_v30  ;;  %15937 = vst [vmem:[#allocation25_spill] sm:$0xff] %v10510_v29  ;;  %v10520_v42 = vand.u32 4294901760, %v494_v58  ;;  %v10573_v26 = vsub.f32 %v478_v16, %v10510_v29  ;;  %v15954_v47 = vand.u32 4294901760, %v10194_v34 }
  0x93   : > { %7964 = vmatpush3.msra.mxu0 %v15933_v15  ;;  %15936 = vst [vmem:[#allocation22_spill] sm:$0xff] %v10507_v3  ;;  %v15938_v15 = vand.u32 4294901760, %v10131_v46  ;;  %8002 = vmatprep.subr.mxu1 %v9991_v37  ;;  %v15939_v46 = vand.u32 4294901760, %v10146_v61  ;;  %v15940_v37 = vld [vmem:[#allocation16_spill] sm:$0xff]  ;;  %15941 = vst [vmem:[#allocation18_spill] sm:$0xff] %v10534_v40  ;;  %v1792_v61 = vand.u32 4294901760, %v10493_v27 }
  0x94   : > { %7965 = vmatprep.subr.mxu0 %v15935_v1  ;;  %v15391_v1 = vand.u32 4294901760, %v10461_v55  ;;  %8003 = vmatpush3.msra.mxu1 %v15940_v37  ;;  %v15392_v37 = vand.u32 4294901760, %v10500_v36  ;;  %v15945_v27 = vld [vmem:[#allocation20_spill] sm:$0xff]  ;;  %15946 = vst [vmem:[#allocation24_spill] sm:$0xff] %v10573_v26  ;;  %15947 = vst [vmem:[#allocation11_spill] sm:$0xff] %v10576_v13 }
  0x95   : > { %7966 = vmatpush3.msra.mxu0 %v15938_v15  ;;  %8004 = vmatprep.subr.mxu1 %v15893_v52  ;;  %v10562_v52 = vsub.f32 %v495_v39, %v10478_v49  ;;  %v15948_v39 = vand.u32 4294901760, %v10159_v20  ;;  %v475_v20 = vld [vmem:[%s15302_s0 + $0x128] sm:$0xff]  ;;  %v10610_v15 = vand.u32 4294901760, %v10555_v41 }
  0x96   : > { %7967 = vmatprep.subr.mxu0 %v15939_v46  ;;  %v10550_v46 = vsub.f32 %v10426_v23, %v15386_v18  ;;  %8005 = vmatpush3.msra.mxu1 %v15945_v27  ;;  %v10570_v18 = vsub.f32 %v10453_v30, %v15389_v56  ;;  %v10586_v27 = vsub.f32 %v10468_v50, %v15390_v28  ;;  %v491_v56 = vld [vmem:[%s15302_s0 + $0x1a8] sm:$0xff]  ;;  %v1687_v28 = vand.u32 4294901760, %v10539_v10 }
  0x97   : > { %7968 = vmatpush3.msra.mxu0 %v15942_v4  ;;  %15943 = vst [vmem:[#allocation4_spill] sm:$0xff] %v10562_v52  ;;  %v15944_v4 = vand.u32 4294901760, %v10154_v62  ;;  %v15949_v62 = vld [vmem:[#allocation21_spill] sm:$0xff]  ;;  %v10591_v16 = vsub.f32 %v10461_v55, %v15391_v1  ;;  %v10607_v1 = vsub.f32 %v477_v19, %v10541_v60  ;;  %1549 = vmatprep.mubr.f32.mxu1 %v15926_v2  ;;  %v15956_v2 = vand.u32 4294901760, %v10507_v3 }
  0x98   : > { %8006 = vmatprep.subr.mxu1 %v15949_v62  ;;  %v15952_v62 = vld [vmem:[#allocation23_spill] sm:$0xff]  ;;  %v10624_v10 = vsub.f32 %v10500_v36, %v15392_v37  ;;  %v1806_v34 = vand.u32 4294901760, %v10570_v18  ;;  %v10639_v37 = vand.u32 4294901760, %v491_v56  ;;  %v10657_v55 = vsub.f32 %v476_v5, %v10612_v11  ;;  %v334_v18 = vld [vmem:[%s10090_s23 + $0x8] sm:$0xff] }
  0x99   : > { %7969 = vmatprep.subr.mxu0 %v15944_v4  ;;  %v1799_v4 = vand.u32 4294901760, %v10518_v35  ;;  %v10600_v35 = vsub.f32 %v494_v58, %v10520_v42  ;;  %8007 = vmatpush3.msra.mxu1 %v15952_v62  ;;  %15953 = vst [vmem:[#allocation20_spill] sm:$0xff] %v10607_v1  ;;  %v474_v58 = vld [vmem:[%s15302_s0 + $0x120] sm:$0xff]  ;;  %v10664_v19 = vsub.f32 %v10525_v7, %v10576_v13  ;;  %v15961_v50 = vand.u32 4294901760, %v10431_v14 }
  0x9a   : > { %7970 = vmatpush3.msra.mxu0 %v15948_v39  ;;  %v15951_v39 = vand.u32 4294901760, %v10174_v63  ;;  %v490_v62 = vld [vmem:[%s15302_s0 + $0x1a0] sm:$0xff]  ;;  %v10641_v63 = vand.u32 4294901760, %v475_v20  ;;  %1551 = vmatmul.mubr.f32.vlgmr.msra.gmra.mxu1 %v15955_v32  ;;  %v10648_v36 = vand.u32 4294901760, %v474_v58  ;;  %v15965_v7 = vand.u32 4294901760, %v10476_v6 }
  0x9b   : > { %15950 = vst [vmem:[#allocation16_spill] sm:$0xff] %v10600_v35  ;;  %v15970_v6 = vand.u32 4294901760, %v10573_v26 }
  0x9c   : > { %7971 = vmatprep.subr.mxu0 %v15951_v39  ;;  %15957 = vst [vmem:[#allocation21_spill] sm:$0xff] %v10641_v63  ;;  %v1813_v39 = vand.u32 4294901760, %v10586_v27  ;;  %15958 = vst [vmem:[#allocation23_spill] sm:$0xff] %v10648_v36 }
  0x9d   : > { %7972 = vmatpush3.msra.mxu0 %v15954_v47  ;;  %v10637_v47 = vsub.f32 %v10507_v3, %v15956_v2  ;;  %v473_v2 = vld [vmem:[%s15302_s0 + $0x118] sm:$0xff]  ;;  %v15959_v3 = vand.u32 4294901760, %v10448_v25  ;;  %v1820_v25 = vand.u32 4294901760, %v10624_v10 }
  0x9e   : > { %1447 = vmatmul.mubr.f32.vlgmr.msra.gmra.mxu0 %v15955_v32  ;;  %8011 = vmatprep.subr.mxu0 %v10326_v43  ;;  %v10659_v32 = vand.u32 4294901760, %v490_v62  ;;  %v489_v10 = vld [vmem:[%s15302_s0 + $0x198] sm:$0xff] }
  0x9f   : > { %8012 = vmatpush3.msra.mxu0 %v10318_v33  ;;  %8046 = vmatprep.subr.mxu1 %v15959_v3  ;;  %v15962_v3 = vand.u32 4294901760, %v10562_v52  ;;  %v1708_v14 = vand.u32 4294901760, %v10637_v47  ;;  %v10705_v47 = vsub.f32 %v474_v58, %v10648_v36  ;;  %v15972_v58 = vand.u32 4294901760, %v10607_v1 }
  0xa0   : > { %8013 = vmatprep.subr.mxu0 %v10348_v38  ;;  %15960 = vst [vmem:[#allocation28_spill] sm:$0xff] %v10659_v32  ;;  %8047 = vmatpush3.msra.mxu1 %v15961_v50  ;;  %v15963_v38 = vand.u32 4294901760, %v10534_v40  ;;  %v10685_v50 = vsub.f32 %v475_v20, %v10641_v63 }
  0xa1   : > { %8014 = vmatpush3.msra.mxu0 %v10337_v53  ;;  %v10674_v5 = vsub.f32 %v10562_v52, %v15962_v3  ;;  %8048 = vmatprep.subr.mxu1 %v1792_v61  ;;  %v10690_v3 = vand.u32 4294901760, %v473_v2  ;;  %v15966_v61 = vand.u32 4294901760, %v10600_v35  ;;  %v414_v52 = vrot.slane %v334_v18, 7 }
  0xa2   : > { %v10679_v27 = vsub.f32 %v10534_v40, %v15963_v38  ;;  %8015 = vmatprep.subr.mxu0 %v10365_v54  ;;  %v10694_v38 = vsub.f32 %v10555_v41, %v10610_v15  ;;  %8049 = vmatpush3.msra.mxu1 %v15965_v7  ;;  %v472_v40 = vld [vmem:[%s15302_s0 + $0x110] sm:$0xff]  ;;  %v10720_v7 = vsub.f32 %v10573_v26, %v15970_v6  ;;  %v10734_v6 = vand.u32 4294901760, %v489_v10 }
  0xa3   : > { %8016 = vmatpush3.msra.mxu0 %v10376_v0  ;;  %v10702_v20 = vsub.f32 %v10600_v35, %v15966_v61  ;;  %v15967_v41 = vld [vmem:[#allocation26_spill] sm:$0xff]  ;;  %v15968_v0 = vcombine.high %v10186_v22, %v10186_v22  ;;  %8050 = vmatprep.subr.mxu1 %v1799_v4  ;;  %v10727_v35 = vsub.f32 %v491_v56, %v10639_v37  ;;  %v10729_v22 = vand.u32 4294901760, %v334_v18 }
  0xa4   : > { %15964 = vst [vmem:[#allocation29_spill] sm:$0xff] %v10694_v38  ;;  %8017 = vmatprep.subr.mxu0 %v10396_v12  ;;  %v488_v61 = vld [vmem:[%s15302_s0 + $0x190] sm:$0xff]  ;;  %8051 = vmatpush3.msra.mxu1 %v1687_v28  ;;  %v1715_v4 = vand.u32 4294901760, %v10679_v27  ;;  %v10743_v56 = vsub.f32 %v473_v2, %v10690_v3  ;;  %v10746_v28 = vand.u32 4294901760, %v472_v40  ;;  %v487_v27 = vld [vmem:[%s15302_s0 + $0x188] sm:$0xff]  ;;  %v10786_v26 = vsub.f32 %v489_v10, %v10734_v6 }
  0xa5   : > { %v10714_v54 = vrot.slane %v15968_v0, %v15967_v41  ;;  %15971 = vst [vmem:[#allocation31_spill] sm:$0xff] %v10729_v22  ;;  %8018 = vmatpush3.msra.mxu0 %v10387_v45  ;;  %v1827_v0 = vand.u32 4294901760, %v10674_v5  ;;  %v10739_v41 = vsub.f32 %v10607_v1, %v15972_v58  ;;  %8052 = vmatprep.subr.mxu1 %v1806_v34  ;;  %v15973_v58 = vand.u32 4294901760, %v10550_v46  ;;  %v486_v46 = vld [vmem:[%s15302_s0 + $0x180] sm:$0xff] }
  0xa6   : > { %8019 = vmatprep.subr.mxu0 %v10405_v31  ;;  %v10752_v5 = vsub.f32 %v490_v62, %v10659_v32  ;;  %v1834_v34 = vand.u32 4294901760, %v10702_v20  ;;  %v10758_v2 = vand.u32 4294901760, %v488_v61  ;;  %v1722_v62 = vand.u32 4294901760, %v10720_v7  ;;  %v471_v20 = vld [vmem:[%s15302_s0 + $0x108] sm:$0xff]  ;;  %1893 = vmatprep.mubr.f32.mxu1 %v10729_v22 }
  0xa7   : > { %15969 = vst [vmem:[#allocation30_spill] sm:$0xff] %v10714_v54  ;;  %8020 = vmatpush3.msra.mxu0 %v10407_v17  ;;  %8053 = vmatpush3.msra.mxu1 %v15973_v58  ;;  %v431_v1 = vsel %vm429_vm0, %v10714_v54, %v414_v52  ;;  %v15974_v31 = vand.u32 4294901760, %v10664_v19  ;;  %v10773_v58 = vsub.f32 %v334_v18, %v10729_v22  ;;  %v15975_v52 = vand.u32 4294901760, %v10591_v16  ;;  %v16011_v22 = vld [vmem:[#allocation17_spill] sm:$0xff] }
  0xa8   : > { %8021 = vmatprep.subr.mxu0 %v10433_v24  ;;  %8054 = vmatprep.subr.mxu1 %v1813_v39  ;;  %v1729_v39 = vand.u32 4294901760, %v10739_v41  ;;  %v10779_v7 = vand.u32 4294901760, %v487_v27  ;;  %v15976_v18 = vand.u32 4294901760, %v10694_v38  ;;  %v10793_v41 = vsub.f32 %v472_v40, %v10746_v28 }
  0xa9   : > { %v1840_v17 = vsub.f32 %v10664_v19, %v15974_v31  ;;  %8022 = vmatpush3.msra.mxu0 %v10450_v48  ;;  %8055 = vmatpush3.msra.mxu1 %v15975_v52  ;;  %v470_v31 = vld [vmem:[%s15302_s0 + $0x100] sm:$0xff]  ;;  %v10799_v54 = vand.u32 4294901760, %v431_v1  ;;  %v15981_v48 = vand.u32 4294901760, %v10752_v5 }
  0xaa   : > { %8023 = vmatprep.subr.mxu0 %v10478_v49  ;;  %8056 = vmatprep.subr.mxu1 %v1820_v25  ;;  %v1847_v16 = vsub.f32 %v10694_v38, %v15976_v18  ;;  %v15978_v25 = vand.u32 4294901760, %v10657_v55  ;;  %v10805_v49 = vand.u32 4294901760, %v471_v20  ;;  %v10809_v18 = vsub.f32 %v488_v61, %v10758_v2 }
  0xab   : > { %15977 = vst [vmem:[#allocation32_spill] sm:$0xff] %v10799_v54  ;;  %8024 = vmatpush3.msra.mxu0 %v10480_v21  ;;  %8057 = vmatpush3.msra.mxu1 %v1708_v14  ;;  %v1841_v52 = vand.u32 4294901760, %v1840_v17  ;;  %v15979_v38 = vand.u32 4294901760, %v10727_v35  ;;  %v10815_v14 = vand.u32 4294901760, %v486_v46  ;;  %v10822_v40 = vand.u32 4294901760, %v470_v31 }
  0xac   : > { %v1735_v10 = vsub.f32 %v10657_v55, %v15978_v25  ;;  %8025 = vmatprep.subr.mxu0 %v10520_v42  ;;  %8058 = vmatprep.subr.mxu1 %v1827_v0  ;;  %v15980_v25 = vand.u32 4294901760, %v10685_v50  ;;  %v10826_v17 = vsub.f32 %v487_v27, %v10779_v7  ;;  %v10838_v27 = vsub.f32 %v471_v20, %v10805_v49 }
  0xad   : > { %v1854_v21 = vsub.f32 %v10727_v35, %v15979_v38  ;;  %8026 = vmatpush3.msra.mxu0 %v10510_v29  ;;  %8059 = vmatpush3.msra.mxu1 %v1715_v4  ;;  %v1848_v38 = vand.u32 4294901760, %v1847_v16  ;;  %v1861_v29 = vsub.f32 %v10752_v5, %v15981_v48  ;;  %v10833_v4 = vsub.f32 %v431_v1, %v10799_v54 }
  0xae   : > { %v1742_v61 = vsub.f32 %v10685_v50, %v15980_v25  ;;  %8027 = vmatprep.subr.mxu0 %v10576_v13  ;;  %8060 = vmatprep.subr.mxu1 %v1834_v34  ;;  %v1736_v0 = vand.u32 4294901760, %v1735_v10  ;;  %v15982_v13 = vand.u32 4294901760, %v10705_v47  ;;  %v15983_v1 = vand.u32 4294901760, %v10773_v58 }
  0xaf   : > { %8028 = vmatpush3.msra.mxu0 %v10541_v60  ;;  %8061 = vmatpush3.msra.mxu1 %v1722_v62  ;;  %v1855_v48 = vand.u32 4294901760, %v1854_v21  ;;  %v10850_v10 = vsub.f32 %v486_v46, %v10815_v14  ;;  %v15985_v16 = vand.u32 4294901760, %v10786_v26  ;;  %v15986_v62 = vand.u32 4294901760, %v10743_v56 }
  0xb0   : > { %v1749_v34 = vsub.f32 %v10705_v47, %v15982_v13  ;;  %8029 = vmatprep.subr.mxu0 %v10610_v15  ;;  %8062 = vmatprep.subr.mxu1 %v1841_v52  ;;  %v1655_v25 = vsub.f32 %v10773_v58, %v15983_v1  ;;  %v1743_v20 = vand.u32 4294901760, %v1742_v61  ;;  %v10854_v13 = vsub.f32 %v470_v31, %v10822_v40 }
  0xb1   : > { %15984 = vst [vmem:[#allocation33_spill] sm:$0xff] %v10850_v10  ;;  %8030 = vmatpush3.msra.mxu0 %v10612_v11  ;;  %8063 = vmatpush3.msra.mxu1 %v1729_v39  ;;  %v1868_v21 = vsub.f32 %v10786_v26, %v15985_v16  ;;  %v1862_v1 = vand.u32 4294901760, %v1861_v29  ;;  %v1756_v39 = vsub.f32 %v10743_v56, %v15986_v62  ;;  %v15987_v61 = vand.u32 4294901760, %v10809_v18 }
  0xb2   : > { %8031 = vmatprep.subr.mxu0 %v10639_v37  ;;  %8064 = vmatprep.subr.mxu1 %v1848_v38  ;;  %v1750_v31 = vand.u32 4294901760, %v1749_v34  ;;  %v1656_v29 = vand.u32 4294901760, %v1655_v25  ;;  %v15988_v38 = vand.u32 4294901760, %v10793_v41  ;;  %v15989_v34 = vand.u32 4294901760, %v10826_v17 }
  0xb3   : > { %8032 = vmatpush3.msra.mxu0 %v10641_v63  ;;  %8065 = vmatpush3.msra.mxu1 %v1736_v0  ;;  %v1875_v16 = vsub.f32 %v10809_v18, %v15987_v61  ;;  %v1869_v0 = vand.u32 4294901760, %v1868_v21  ;;  %v15990_v25 = vand.u32 4294901760, %v10833_v4  ;;  %v15992_v52 = vand.u32 4294901760, %v10850_v10 }
  0xb4   : > { %8033 = vmatprep.subr.mxu0 %v10659_v32  ;;  %8066 = vmatprep.subr.mxu1 %v1855_v48  ;;  %v1763_v46 = vsub.f32 %v10793_v41, %v15988_v38  ;;  %v1882_v61 = vsub.f32 %v10826_v17, %v15989_v34  ;;  %v1757_v38 = vand.u32 4294901760, %v1756_v39 }
  0xb5   : > { %8034 = vmatpush3.msra.mxu0 %v10648_v36  ;;  %8067 = vmatpush3.msra.mxu1 %v1743_v20  ;;  %v1661_v48 = vsub.f32 %v10833_v4, %v15990_v25  ;;  %v1876_v62 = vand.u32 4294901760, %v1875_v16  ;;  %v15991_v20 = vand.u32 4294901760, %v10838_v27  ;;  %v15993_v25 = vand.u32 4294901760, %v10854_v13 }
  0xb6   : > { %8035 = vmatprep.subr.mxu0 %v10734_v6  ;;  %8068 = vmatprep.subr.mxu1 %v1862_v1  ;;  %v1764_v34 = vand.u32 4294901760, %v1763_v46  ;;  %v1889_v1 = vsub.f32 %v10850_v10, %v15992_v52  ;;  %v1883_v39 = vand.u32 4294901760, %v1882_v61  ;;  %v15996_v61 = vld [vmem:[#allocation8_spill] sm:$0xff] }
  0xb7   : > { %8036 = vmatpush3.msra.mxu0 %v10690_v3  ;;  %8069 = vmatpush3.msra.mxu1 %v1750_v31  ;;  %v1770_v21 = vsub.f32 %v10838_v27, %v15991_v20  ;;  %v1777_v31 = vsub.f32 %v10854_v13, %v15993_v25  ;;  %v1662_v16 = vand.u32 4294901760, %v1661_v48  ;;  %v15997_v48 = vld [vmem:[#allocation19_spill] sm:$0xff]  ;;  %v15999_v20 = vld [vmem:[#allocation22_spill] sm:$0xff] }
  0xb8   : > { %8037 = vmatprep.subr.mxu0 %v10758_v2  ;;  %1657 = vmatprep.mubr.f32.mxu0 %v1656_v29  ;;  %v1890_v52 = vand.u32 4294901760, %v1889_v1  ;;  %v16002_v1 = vld [vmem:[#allocation18_spill] sm:$0xff] }
  0xb9   : > { %8038 = vmatpush3.msra.mxu0 %v10746_v28  ;;  %8070 = vmatprep.subr.mxu1 %v1869_v0  ;;  %v1771_v46 = vand.u32 4294901760, %v1770_v21  ;;  %v1778_v29 = vand.u32 4294901760, %v1777_v31  ;;  %v15995_v0 = vld [vmem:[#allocation5_spill] sm:$0xff]  ;;  %v16000_v21 = vld [vmem:[#allocation6_spill] sm:$0xff]  ;;  %v16005_v31 = vld [vmem:[#allocation24_spill] sm:$0xff] }
  0xba   : > { %8039 = vmatprep.subr.mxu0 %v10779_v7  ;;  %8071 = vmatpush3.msra.mxu1 %v1757_v38  ;;  %v15998_v38 = vld [vmem:[#allocation9_spill] sm:$0xff]  ;;  %v16004_v25 = vld [vmem:[#allocation10_spill] sm:$0xff] }
  0xbb   : > { %8040 = vmatpush3.msra.mxu0 %v10805_v49  ;;  %8072 = vmatprep.subr.mxu1 %v1876_v62  ;;  %v15994_v62 = vld [vmem:[#allocation14_spill] sm:$0xff] }
  0xbc   : > { %8041 = vmatprep.subr.mxu0 %v10815_v14  ;;  %8073 = vmatpush3.msra.mxu1 %v1764_v34  ;;  %v16001_v34 = vld [vmem:[#allocation4_spill] sm:$0xff] }
  0xbd   : > { %8042 = vmatpush3.msra.mxu0 %v10822_v40  ;;  %8074 = vmatprep.subr.mxu1 %v1883_v39  ;;  %v16003_v39 = vld [vmem:[#allocation16_spill] sm:$0xff] }
  0xbe   : > { %8081 = vmatprep.subr.mxu0 %v10360_v44  ;;  %1663 = vmatmul.mubr.f32.vlgmr.msra.gmra.mxu0 %v1662_v16  ;;  %v16006_v16 = vld [vmem:[#allocation7_spill] sm:$0xff] }
  0xbf   : > { %8082 = vmatpush3.msra.mxu0 %v10346_v8  ;;  %8075 = vmatpush3.msra.mxu1 %v1771_v46  ;;  %v16007_v46 = vld [vmem:[#allocation20_spill] sm:$0xff] }
  0xc0   : > { %8083 = vmatprep.subr.mxu0 %v10391_v57  ;;  %8076 = vmatprep.subr.mxu1 %v1890_v52  ;;  %v16008_v52 = vld [vmem:[#allocation13_spill] sm:$0xff] }
  0xc1   : > { %8084 = vmatpush3.msra.mxu0 %v10374_v59  ;;  %8077 = vmatpush3.msra.mxu1 %v1778_v29  ;;  %v16009_v29 = vld [vmem:[#allocation29_spill] sm:$0xff] }
  0xc2   : > { %8085 = vmatprep.subr.mxu0 %v10413_v9  ;;  %1895 = vmatmul.mubr.f32.vlgmr.msra.gmra.mxu1 %v10799_v54  ;;  %v16010_v54 = vld [vmem:[#allocation15_spill] sm:$0xff] }
  0xc3   : > { %8086 = vmatpush3.msra.mxu0 %v10419_v51  ;;  %8116 = vmatprep.subr.mxu1 %v10326_v43 }
  0xc4   : > { %8087 = vmatprep.subr.mxu0 %v10453_v30  ;;  %8117 = vmatpush3.msra.mxu1 %v10318_v33 }
  0xc5   : > { %8088 = vmatpush3.msra.mxu0 %v10426_v23  ;;  %8118 = vmatprep.subr.mxu1 %v15995_v0 }
  0xc6   : > { %8089 = vmatprep.subr.mxu0 %v15994_v62  ;;  %8119 = vmatpush3.msra.mxu1 %v10337_v53 }
  0xc7   : > { %8090 = vmatpush3.msra.mxu0 %v15996_v61  ;;  %8120 = vmatprep.subr.mxu1 %v15998_v38 }
  0xc8   : > { %8091 = vmatprep.subr.mxu0 %v15997_v48  ;;  %8121 = vmatpush3.msra.mxu1 %v16000_v21 }
  0xc9   : > { %8092 = vmatpush3.msra.mxu0 %v15999_v20  ;;  %8122 = vmatprep.subr.mxu1 %v10396_v12 }
  0xca   : > { %8093 = vmatprep.subr.mxu0 %v16001_v34  ;;  %8123 = vmatpush3.msra.mxu1 %v10387_v45 }
  0xcb   : > { %8094 = vmatpush3.msra.mxu0 %v16002_v1  ;;  %8124 = vmatprep.subr.mxu1 %v16004_v25 }
  0xcc   : > { %8095 = vmatprep.subr.mxu0 %v16003_v39  ;;  %8125 = vmatpush3.msra.mxu1 %v16006_v16  ;;  %v16012_v16 = vld [vmem:[#allocation25_spill] sm:$0xff] }
  0xcd   : > { %8096 = vmatpush3.msra.mxu0 %v16005_v31  ;;  %8126 = vmatprep.subr.mxu1 %v10433_v24  ;;  %v16013_v24 = vld [vmem:[#allocation11_spill] sm:$0xff] }
  0xce   : > { %8097 = vmatprep.subr.mxu0 %v10664_v19  ;;  %8127 = vmatpush3.msra.mxu1 %v16008_v52 }
  0xcf   : > { %8098 = vmatpush3.msra.mxu0 %v16007_v46  ;;  %8128 = vmatprep.subr.mxu1 %v16010_v54 }
  0xd0   : > { %8099 = vmatprep.subr.mxu0 %v16009_v29  ;;  %8129 = vmatpush3.msra.mxu1 %v16011_v22 }
  0xd1   : > { %8100 = vmatpush3.msra.mxu0 %v10657_v55  ;;  %8130 = vmatprep.subr.mxu1 %v10520_v42 }
  0xd2   : > { %8101 = vmatprep.subr.mxu0 %v10727_v35  ;;  %8131 = vmatpush3.msra.mxu1 %v16012_v16 }
  0xd3   : > { %8102 = vmatpush3.msra.mxu0 %v10685_v50  ;;  %8132 = vmatprep.subr.mxu1 %v16013_v24 }
  0xd4   : > { %8103 = vmatprep.subr.mxu0 %v10752_v5  ;;  %8133 = vmatpush3.msra.mxu1 %v10541_v60 }
  0xd5   : > { %8104 = vmatpush3.msra.mxu0 %v10705_v47  ;;  %8134 = vmatprep.subr.mxu1 %v10610_v15 }
  0xd6   : > { %8105 = vmatprep.subr.mxu0 %v10786_v26  ;;  %8135 = vmatpush3.msra.mxu1 %v10612_v11 }
  0xd7   : > { %8106 = vmatpush3.msra.mxu0 %v10743_v56  ;;  %8136 = vmatprep.subr.mxu1 %v10639_v37 }
  0xd8   : > { %8107 = vmatprep.subr.mxu0 %v10809_v18  ;;  %8137 = vmatpush3.msra.mxu1 %v10641_v63  ;;  %v16014_v63 = vand.u32 4294901760, %v10360_v44  ;;  %v16018_v44 = vand.u32 4294901760, %v10413_v9  ;;  %v16023_v9 = vand.u32 4294901760, %v10833_v4 }
  0xd9   : > { %8108 = vmatpush3.msra.mxu0 %v10793_v41  ;;  %8138 = vmatprep.subr.mxu1 %v10659_v32  ;;  %v16015_v32 = vand.u32 4294901760, %v10346_v8  ;;  %v16019_v8 = vand.u32 4294901760, %v10419_v51  ;;  %v16025_v51 = vand.u32 4294901760, %v15996_v61  ;;  %v531_v61 = vld [vmem:[%s15302_s0 + $0x2e8] sm:$0xff] }
  0xda   : > { %8109 = vmatprep.subr.mxu0 %v10826_v17  ;;  %2030 = vmatprep.mubr.f32.mxu0 %v10773_v58 }
  0xdb   : > { %8110 = vmatpush3.msra.mxu0 %v10838_v27  ;;  %8139 = vmatpush3.msra.mxu1 %v10648_v36  ;;  %v16017_v36 = vand.u32 4294901760, %v10374_v59  ;;  %v16021_v59 = vand.u32 4294901760, %v10773_v58  ;;  %v16030_v58 = vand.u32 4294901760, %v16003_v39 }
  0xdc   : > { %8111 = vmatprep.subr.mxu0 %v10850_v10  ;;  %8140 = vmatprep.subr.mxu1 %v10734_v6  ;;  %v16016_v10 = vand.u32 4294901760, %v10391_v57  ;;  %v16020_v57 = vand.u32 4294901760, %v10453_v30  ;;  %v16026_v30 = vand.u32 4294901760, %v15997_v48  ;;  %v16034_v48 = vld [vmem:[#allocation7_spill] sm:$0xff] }
  0xdd   : > { %8112 = vmatpush3.msra.mxu0 %v10854_v13  ;;  %8141 = vmatpush3.msra.mxu1 %v10690_v3 }
  0xde   : > { %2033 = vmatmul.mubr.f32.vlgmr.msra.gmra.mxu0 %v10833_v4  ;;  %8151 = vmatprep.subr.mxu0 %v16014_v63  ;;  %v16024_v63 = vand.u32 4294901760, %v15994_v62  ;;  %v16031_v4 = vand.u32 4294901760, %v16005_v31  ;;  %v16032_v62 = vand.u32 4294901760, %v10664_v19  ;;  %v515_v19 = vld [vmem:[%s15302_s0 + $0x268] sm:$0xff]  ;;  %v530_v31 = vld [vmem:[%s15302_s0 + $0x2e0] sm:$0xff] }
  0xdf   : > { %8152 = vmatpush3.msra.mxu0 %v16015_v32  ;;  %8142 = vmatprep.subr.mxu1 %v10758_v2  ;;  %v16028_v32 = vand.u32 4294901760, %v16001_v34 }
  0xe0   : > { %8153 = vmatprep.subr.mxu0 %v16016_v10  ;;  %8143 = vmatpush3.msra.mxu1 %v10746_v28  ;;  %v532_v10 = vld [vmem:[%s15302_s0 + $0x2f0] sm:$0xff] }
  0xe1   : > { %8154 = vmatpush3.msra.mxu0 %v16017_v36  ;;  %8144 = vmatprep.subr.mxu1 %v10779_v7  ;;  %v16022_v36 = vand.u32 4294901760, %v10426_v23  ;;  %v16027_v23 = vand.u32 4294901760, %v15999_v20  ;;  %v16035_v20 = vand.u32 4294901760, %v16009_v29  ;;  %v11043_v34 = vand.u32 4294901760, %v532_v10 }
  0xe2   : > { %8155 = vmatprep.subr.mxu0 %v16018_v44  ;;  %8145 = vmatpush3.msra.mxu1 %v10805_v49  ;;  %v11058_v29 = vand.u32 4294901760, %v515_v19  ;;  %v16042_v44 = vand.u32 4294901760, %v10685_v50  ;;  %v513_v50 = vld [vmem:[%s15302_s0 + $0x258] sm:$0xff] }
  0xe3   : > { %8156 = vmatpush3.msra.mxu0 %v16019_v8  ;;  %8146 = vmatprep.subr.mxu1 %v10815_v14 }
  0xe4   : > { %8157 = vmatprep.subr.mxu0 %v16020_v57  ;;  %8147 = vmatpush3.msra.mxu1 %v10822_v40  ;;  %16041 = vst [vmem:[#allocation8_spill] sm:$0xff] %v11058_v29  ;;  %v11078_v57 = vand.u32 4294901760, %v530_v31 }
  0xe5   : > { %2137 = vmatprep.mubr.f32.mxu1 %v16021_v59  ;;  %8158 = vmatpush3.msra.mxu0 %v16022_v36  ;;  %v16045_v59 = vand.u32 4294901760, %v10705_v47  ;;  %v16047_v47 = vand.u32 4294901760, %v10786_v26  ;;  %v16051_v26 = vand.u32 4294901760, %v10809_v18 }
  0xe6   : > { %2141 = vmatmul.mubr.f32.vlgmr.msra.gmra.mxu1 %v16023_v9  ;;  %8159 = vmatprep.subr.mxu0 %v16024_v63  ;;  %16044 = vst [vmem:[#allocation19_spill] sm:$0xff] %v11078_v57  ;;  %v512_v9 = vld [vmem:[%s15302_s0 + $0x250] sm:$0xff] }
  0xe7   : > { %8186 = vmatprep.subr.mxu1 %v10326_v43  ;;  %8160 = vmatpush3.msra.mxu0 %v16025_v51  ;;  %v16029_v43 = vand.u32 4294901760, %v16002_v1  ;;  %v16037_v1 = vand.u32 4294901760, %v10657_v55  ;;  %v514_v55 = vld [vmem:[%s15302_s0 + $0x260] sm:$0xff] }
  0xe8   : > { %8187 = vmatpush3.msra.mxu1 %v10318_v33  ;;  %8161 = vmatprep.subr.mxu0 %v16026_v30  ;;  %v533_v33 = vld [vmem:[%s15302_s0 + $0x2f8] sm:$0xff] }
  0xe9   : > { %8188 = vmatprep.subr.mxu1 %v15995_v0  ;;  %8162 = vmatpush3.msra.mxu0 %v16027_v23  ;;  %v11024_v0 = vand.u32 4294901760, %v533_v33  ;;  %v16049_v23 = vand.u32 4294901760, %v10743_v56 }
  0xea   : > { %8189 = vmatpush3.msra.mxu1 %v10337_v53  ;;  %8163 = vmatprep.subr.mxu0 %v16028_v32  ;;  %v517_v53 = vld [vmem:[%s15302_s0 + $0x278] sm:$0xff]  ;;  %v11115_v32 = vand.u32 4294901760, %v513_v50 }
  0xeb   : > { %8190 = vmatprep.subr.mxu1 %v15998_v38  ;;  %8164 = vmatpush3.msra.mxu0 %v16029_v43  ;;  %v11035_v38 = vand.u32 4294901760, %v517_v53 }
  0xec   : > { %8191 = vmatpush3.msra.mxu1 %v16000_v21  ;;  %8165 = vmatprep.subr.mxu0 %v16030_v58  ;;  %v16036_v21 = vld [vmem:[#allocation12_spill] sm:$0xff]  ;;  %16050 = vst [vmem:[#allocation6_spill] sm:$0xff] %v11115_v32  ;;  %v11127_v58 = vand.u32 4294901760, %v512_v9 }
  0xed   : > { %8192 = vmatprep.subr.mxu1 %v10396_v12  ;;  %8166 = vmatpush3.msra.mxu0 %v16031_v4  ;;  %v516_v12 = vld [vmem:[%s15302_s0 + $0x270] sm:$0xff]  ;;  %v11070_v8 = vsub.f32 %v517_v53, %v11035_v38  ;;  %v16054_v53 = vand.u32 4294901760, %v10793_v41 }
  0xee   : > { %8193 = vmatpush3.msra.mxu1 %v10387_v45  ;;  %8167 = vmatprep.subr.mxu0 %v16032_v62  ;;  %v16033_v45 = vand.u32 4294901760, %v16007_v46  ;;  %v11048_v39 = vand.u32 4294901760, %v516_v12  ;;  %v16040_v46 = vand.u32 4294901760, %v10727_v35  ;;  %v16043_v35 = vand.u32 4294901760, %v10752_v5  ;;  %16053 = vst [vmem:[#allocation18_spill] sm:$0xff] %v11127_v58 }
  0xef   : > { %8194 = vmatprep.subr.mxu1 %v16004_v25  ;;  %v11050_v25 = vand.u32 4294901760, %v531_v61  ;;  %v11092_v5 = vand.u32 4294901760, %v514_v55  ;;  %v15447_v43 = vand.u32 4294901760, %v11070_v8 }
  0xf0   : > { %8168 = vmatpush3.msra.mxu0 %v16033_v45  ;;  %8195 = vmatpush3.msra.mxu1 %v16034_v48  ;;  %16038 = vst [vmem:[#allocation14_spill] sm:$0xff] %v11048_v39  ;;  %v11090_v36 = vsub.f32 %v516_v12, %v11048_v39  ;;  %v16059_v48 = vld [vmem:[#allocation21_spill] sm:$0xff] }
  0xf1   : > { %8169 = vmatprep.subr.mxu0 %v16035_v20  ;;  %8196 = vmatprep.subr.mxu1 %v16036_v21  ;;  %16039 = vst [vmem:[#allocation5_spill] sm:$0xff] %v11050_v25  ;;  %16046 = vst [vmem:[#allocation9_spill] sm:$0xff] %v11092_v5  ;;  %v11101_v63 = vsub.f32 %v531_v61, %v11050_v25  ;;  %v11136_v4 = vsub.f32 %v514_v55, %v11092_v5  ;;  %v16060_v21 = vld [vmem:[#allocation33_spill] sm:$0xff]  ;;  %v526_v55 = vld [vmem:[%s15302_s0 + $0x2c0] sm:$0xff] }
  0xf2   : > { %8170 = vmatpush3.msra.mxu0 %v16037_v1  ;;  %8197 = vmatpush3.msra.mxu1 %v16008_v52  ;;  %v11064_v52 = vsub.f32 %v533_v33, %v11024_v0  ;;  %v15445_v18 = vand.u32 4294901760, %v11090_v36  ;;  %v11168_v20 = vsub.f32 %v11070_v8, %v15447_v43  ;;  %v16061_v1 = vand.u32 4294901760, %v16060_v21  ;;  %v11291_v21 = vld [vmem:[%s10090_s23 + $0x10] sm:$0xff] }
  0xf3   : > { %8171 = vmatprep.subr.mxu0 %v16040_v46  ;;  %8198 = vmatprep.subr.mxu1 %v16010_v54  ;;  %v529_v54 = vld [vmem:[%s15302_s0 + $0x2d8] sm:$0xff]  ;;  %v11179_v46 = vsub.f32 %v512_v9, %v11127_v58 }
  0xf4   : > { %8172 = vmatpush3.msra.mxu0 %v16042_v44  ;;  %8199 = vmatpush3.msra.mxu1 %v16011_v22  ;;  %v11084_v22 = vsub.f32 %v532_v10, %v11043_v34  ;;  %v11109_v51 = vand.u32 4294901760, %v529_v54  ;;  %v15449_v30 = vand.u32 4294901760, %v11064_v52  ;;  %v16055_v10 = vand.u32 4294901760, %v10826_v17  ;;  %v16057_v17 = vld [vmem:[#allocation27_spill] sm:$0xff] }
  0xf5   : > { %8173 = vmatprep.subr.mxu0 %v16043_v35  ;;  %8200 = vmatprep.subr.mxu1 %v10520_v42  ;;  %v528_v42 = vld [vmem:[%s15302_s0 + $0x2d0] sm:$0xff]  ;;  %v11197_v9 = vsub.f32 %v11090_v36, %v15445_v18  ;;  %v15454_v18 = vand.u32 4294901760, %v11179_v46 }
  0xf6   : > { %8174 = vmatpush3.msra.mxu0 %v16045_v59  ;;  %8201 = vmatpush3.msra.mxu1 %v16012_v16  ;;  %v11107_v16 = vsub.f32 %v515_v19, %v11058_v29  ;;  %16048 = vst [vmem:[#allocation22_spill] sm:$0xff] %v11109_v51  ;;  %v11124_v33 = vand.u32 4294901760, %v528_v42  ;;  %v15446_v56 = vand.u32 4294901760, %v11084_v22  ;;  %v11146_v62 = vsub.f32 %v11064_v52, %v15449_v30  ;;  %v16064_v59 = vld [vmem:[#allocation31_spill] sm:$0xff]  ;;  %v508_v30 = vld [vmem:[%s15302_s0 + $0x230] sm:$0xff] }
  0xf7   : > { %8175 = vmatprep.subr.mxu0 %v16047_v47  ;;  %8202 = vmatprep.subr.mxu1 %v16013_v24  ;;  %v527_v24 = vld [vmem:[%s15302_s0 + $0x2c8] sm:$0xff]  ;;  %v11155_v61 = vsub.f32 %v529_v54, %v11109_v51  ;;  %v11163_v19 = vsub.f32 %v513_v50, %v11115_v32  ;;  %v510_v54 = vld [vmem:[%s15302_s0 + $0x240] sm:$0xff]  ;;  %v16063_v50 = vand.u32 4294901760, %v10854_v13 }
  0xf8   : > { %8176 = vmatpush3.msra.mxu0 %v16049_v23  ;;  %8203 = vmatpush3.msra.mxu1 %v10541_v60  ;;  %16052 = vst [vmem:[#allocation4_spill] sm:$0xff] %v11124_v33  ;;  %v11130_v60 = vsub.f32 %v530_v31, %v11078_v57  ;;  %v11148_v41 = vand.u32 4294901760, %v527_v24  ;;  %v15443_v12 = vand.u32 4294901760, %v11107_v16  ;;  %v16062_v31 = vld [vmem:[#allocation28_spill] sm:$0xff]  ;;  %v11189_v35 = vsub.f32 %v528_v42, %v11124_v33 }
  0xf9   : > { %8177 = vmatprep.subr.mxu0 %v16051_v26  ;;  %8204 = vmatprep.subr.mxu1 %v10610_v15  ;;  %v15444_v15 = vand.u32 4294901760, %v11101_v63  ;;  %v15450_v42 = vand.u32 4294901760, %v11136_v4  ;;  %v16066_v26 = vld [vmem:[#allocation23_spill] sm:$0xff]  ;;  %v16067_v13 = vld [vmem:[#allocation32_spill] sm:$0xff] }
  0xfa   : > { %8178 = vmatpush3.msra.mxu0 %v16054_v53  ;;  %8205 = vmatpush3.msra.mxu1 %v10612_v11  ;;  %16056 = vst [vmem:[#allocation16_spill] sm:$0xff] %v11148_v41  ;;  %v511_v11 = vld [vmem:[%s15302_s0 + $0x248] sm:$0xff]  ;;  %v15448_v44 = vand.u32 4294901760, %v11130_v60  ;;  %v11301_v53 = vand.u32 4294901760, %v508_v30 }
  0xfb   : > { %8179 = vmatprep.subr.mxu0 %v16055_v10  ;;  %8206 = vmatprep.subr.mxu1 %v10639_v37  ;;  %v16058_v37 = vand.u32 4294901760, %v10838_v27  ;;  %v11176_v27 = vsub.f32 %v11084_v22, %v15446_v56  ;;  %v11202_v47 = vsub.f32 %v11101_v63, %v15444_v15  ;;  %v11204_v23 = vand.u32 4294901760, %v511_v11 }
  0xfc   : > { %8207 = vmatpush3.msra.mxu1 %v16059_v48  ;;  %2307 = vmatprep.mubr.f32.mxu0 %v16064_v59  ;;  %v11213_v10 = vsub.f32 %v11107_v16, %v15443_v12  ;;  %v11217_v48 = vsub.f32 %v527_v24, %v11148_v41  ;;  %v11236_v24 = vsub.f32 %v11130_v60, %v15448_v44  ;;  %v509_v12 = vld [vmem:[%s15302_s0 + $0x238] sm:$0xff]  ;;  %v15453_v15 = vand.u32 4294901760, %v11189_v35 }
  0xfd   : > { %8180 = vmatpush3.msra.mxu0 %v16058_v37  ;;  %8208 = vmatprep.subr.mxu1 %v16062_v31  ;;  %16065 = vst [vmem:[#allocation10_spill] sm:$0xff] %v11204_v23  ;;  %v15451_v37 = vand.u32 4294901760, %v11155_v61  ;;  %v11224_v31 = vand.u32 4294901760, %v510_v54  ;;  %v11248_v43 = vsub.f32 %v511_v11, %v11204_v23  ;;  %v11253_v44 = vsub.f32 %v11136_v4, %v15450_v42  ;;  %v524_v42 = vld [vmem:[%s15302_s0 + $0x2b0] sm:$0xff] }
  0xfe   : > { %8181 = vmatprep.subr.mxu0 %v16061_v1  ;;  %8209 = vmatpush3.msra.mxu1 %v16066_v26  ;;  %16068 = vst [vmem:[#allocation24_spill] sm:$0xff] %v11217_v48  ;;  %v11222_v1 = vand.u32 4294901760, %v526_v55  ;;  %v15452_v26 = vand.u32 4294901760, %v11163_v19  ;;  %v11280_v45 = vand.u32 4294901760, %v509_v12  ;;  %16074 = vst [vmem:[#allocation25_spill] sm:$0xff] %v11301_v53 }
  0xff   : > { %8182 = vmatpush3.msra.mxu0 %v16063_v50  ;;  %8210 = vmatprep.subr.mxu1 %v10734_v6  ;;  %16070 = vst [vmem:[#allocation13_spill] sm:$0xff] %v11224_v31  ;;  %v525_v50 = vld [vmem:[%s15302_s0 + $0x2b8] sm:$0xff]  ;;  %16071 = vst [vmem:[#allocation29_spill] sm:$0xff] %v11248_v43  ;;  %v11266_v11 = vsub.f32 %v11155_v61, %v15451_v37 }
 0x100   : > { %2309 = vmatmul.mubr.f32.vlgmr.msra.gmra.mxu0 %v16067_v13  ;;  %8221 = vmatprep.subr.mxu0 %v11024_v0  ;;  %16069 = vst [vmem:[#allocation20_spill] sm:$0xff] %v11222_v1  ;;  %v11261_v56 = vand.u32 4294901760, %v525_v50  ;;  %16073 = vst [vmem:[#allocation17_spill] sm:$0xff] %v11280_v45  ;;  %v11285_v37 = vsub.f32 %v11163_v19, %v15452_v26  ;;  %v11288_v6 = vsub.f32 %v526_v55, %v11222_v1 }
 0x101   : > { %8211 = vmatpush3.msra.mxu1 %v10690_v3  ;;  %8222 = vmatpush3.msra.mxu0 %v11035_v38  ;;  %v11306_v55 = vsub.f32 %v11179_v46, %v15454_v18  ;;  %v11311_v26 = vand.u32 4294901760, %v524_v42  ;;  %v16077_v18 = vand.u32 4294901760, %v11217_v48 }
 0x102   : > { %8212 = vmatprep.subr.mxu1 %v10758_v2  ;;  %8223 = vmatprep.subr.mxu0 %v11043_v34  ;;  %16072 = vst [vmem:[#allocation15_spill] sm:$0xff] %v11261_v56  ;;  %v11278_v2 = vsub.f32 %v510_v54, %v11224_v31  ;;  %v11299_v54 = vsub.f32 %v11189_v35, %v15453_v15  ;;  %v523_v15 = vld [vmem:[%s15302_s0 + $0x2a8] sm:$0xff] }
 0x103   : > { %8213 = vmatpush3.msra.mxu1 %v10746_v28  ;;  %8224 = vmatpush3.msra.mxu0 %v11048_v39  ;;  %v507_v28 = vld [vmem:[%s15302_s0 + $0x228] sm:$0xff]  ;;  %16075 = vst [vmem:[#allocation11_spill] sm:$0xff] %v11311_v26  ;;  %v11334_v3 = vsub.f32 %v525_v50, %v11261_v56  ;;  %v16079_v50 = vand.u32 4294901760, %v11146_v62  ;;  %v16086_v39 = vand.u32 4294901760, %v11197_v9 }
 0x104   : > { %8214 = vmatprep.subr.mxu1 %v10779_v7  ;;  %8225 = vmatprep.subr.mxu0 %v11050_v25  ;;  %v11316_v7 = vand.u32 4294901760, %v507_v28  ;;  %v16081_v25 = vand.u32 4294901760, %v11168_v20  ;;  %v16084_v20 = vand.u32 4294901760, %v11176_v27  ;;  %v16087_v27 = vand.u32 4294901760, %v11288_v6 }
 0x105   : > { %8215 = vmatpush3.msra.mxu1 %v10805_v49  ;;  %8226 = vmatpush3.msra.mxu0 %v11058_v29  ;;  %v11325_v49 = vsub.f32 %v11217_v48, %v16077_v18  ;;  %v506_v29 = vld [vmem:[%s15302_s0 + $0x220] sm:$0xff]  ;;  %v11340_v18 = vsub.f32 %v509_v12, %v11280_v45  ;;  %v11353_v12 = vand.u32 4294901760, %v523_v15 }
 0x106   : > { %8216 = vmatprep.subr.mxu1 %v10815_v14  ;;  %8227 = vmatprep.subr.mxu0 %v11078_v57  ;;  %16076 = vst [vmem:[#allocation7_spill] sm:$0xff] %v11316_v7  ;;  %v522_v57 = vld [vmem:[%s15302_s0 + $0x2a0] sm:$0xff]  ;;  %v11362_v62 = vsub.f32 %v507_v28, %v11316_v7  ;;  %v11371_v48 = vand.u32 4294901760, %v506_v29  ;;  %v521_v14 = vld [vmem:[%s15302_s0 + $0x298] sm:$0xff]  ;;  %v16088_v28 = vand.u32 4294901760, %v11278_v2 }
 0x107   : > { %8217 = vmatpush3.msra.mxu1 %v10822_v40  ;;  %2411 = vmatprep.mubr.f32.mxu1 %v16064_v59  ;;  %v415_v40 = vrot.slane %v11291_v21, 7  ;;  %16078 = vst [vmem:[#allocation12_spill] sm:$0xff] %v11340_v18  ;;  %16080 = vst [vmem:[#allocation27_spill] sm:$0xff] %v11353_v12  ;;  %v505_v59 = vld [vmem:[%s15302_s0 + $0x218] sm:$0xff]  ;;  %v11413_v9 = vand.u32 4294901760, %v521_v14 }
 0x108   : > { %8228 = vmatpush3.msra.mxu0 %v11092_v5  ;;  %2413 = vmatmul.mubr.f32.vlgmr.msra.gmra.mxu1 %v16067_v13  ;;  %v11350_v5 = vsub.f32 %v508_v30, %v11301_v53  ;;  %v11369_v13 = vand.u32 4294901760, %v522_v57  ;;  %16083 = vst [vmem:[#allocation21_spill] sm:$0xff] %v11371_v48 }
 0x109   : > { %8229 = vmatprep.subr.mxu0 %v11109_v51  ;;  %8256 = vmatprep.subr.mxu1 %v16079_v50  ;;  %v16082_v50 = vand.u32 4294901760, %v11248_v43  ;;  %v16085_v51 = vcombine.high %v16057_v17, %v16057_v17  ;;  %v16091_v17 = vand.u32 4294901760, %v11213_v10 }
 0x10a   : > { %8230 = vmatpush3.msra.mxu0 %v11115_v32  ;;  %8257 = vmatpush3.msra.mxu1 %v16081_v25  ;;  %v504_v25 = vld [vmem:[%s15302_s0 + $0x210] sm:$0xff]  ;;  %v11385_v32 = vsub.f32 %v524_v42, %v11311_v26  ;;  %v11402_v42 = vsub.f32 %v11278_v2, %v16088_v28  ;;  %v11418_v28 = vsub.f32 %v523_v15, %v11353_v12  ;;  %v16094_v15 = vand.u32 4294901760, %v11236_v24 }
 0x10b   : > { %v11367_v30 = vsub.f32 %v11248_v43, %v16082_v50  ;;  %8231 = vmatprep.subr.mxu0 %v11124_v33  ;;  %8258 = vmatprep.subr.mxu1 %v16084_v20  ;;  %v432_v43 = vsel %vm429_vm0, %v16085_v51, %v415_v40  ;;  %v11397_v20 = vsub.f32 %v11288_v6, %v16087_v27  ;;  %v11404_v50 = vand.u32 4294901760, %v505_v59  ;;  %v520_v51 = vld [vmem:[%s15302_s0 + $0x290] sm:$0xff] }
 0x10c   : > { %8232 = vmatpush3.msra.mxu0 %v11127_v58  ;;  %8259 = vmatpush3.msra.mxu1 %v16086_v39  ;;  %v16089_v39 = vand.u32 4294901760, %v11202_v47  ;;  %v11415_v40 = vand.u32 4294901760, %v504_v25  ;;  %v11421_v27 = vand.u32 4294901760, %v11291_v21  ;;  %v11428_v47 = vsub.f32 %v506_v29, %v11371_v48  ;;  %v519_v29 = vld [vmem:[%s15302_s0 + $0x288] sm:$0xff] }
 0x10d   : > { %8233 = vmatprep.subr.mxu0 %v11148_v41  ;;  %v2577_v41 = vand.u32 4294901760, %v11367_v30  ;;  %v11431_v58 = vand.u32 4294901760, %v432_v43  ;;  %v16095_v33 = vand.u32 4294901760, %v11334_v3  ;;  %v11441_v10 = vand.u32 4294901760, %v520_v51 }
 0x10e   : > { %8260 = vmatprep.subr.mxu1 %v16089_v39  ;;  %16090 = vst [vmem:[#allocation33_spill] sm:$0xff] %v11421_v27  ;;  %8234 = vmatpush3.msra.mxu0 %v11204_v23  ;;  %16092 = vst [vmem:[#allocation28_spill] sm:$0xff] %v11428_v47  ;;  %v16097_v24 = vand.u32 4294901760, %v11253_v44  ;;  %v11456_v39 = vsub.f32 %v505_v59, %v11404_v50  ;;  %v16098_v30 = vand.u32 4294901760, %v11340_v18  ;;  %v16099_v44 = vand.u32 4294901760, %v11266_v11  ;;  %v518_v59 = vld [vmem:[%s15302_s0 + $0x280] sm:$0xff] }
 0x10f   : > { %8261 = vmatpush3.msra.mxu1 %v16091_v17  ;;  %16093 = vst [vmem:[#allocation31_spill] sm:$0xff] %v11431_v58  ;;  %8235 = vmatprep.subr.mxu0 %v11222_v1  ;;  %v11439_v23 = vsub.f32 %v11334_v3, %v16095_v33  ;;  %16096 = vst [vmem:[#allocation23_spill] sm:$0xff] %v11441_v10  ;;  %v11448_v17 = vsub.f32 %v522_v57, %v11369_v13  ;;  %v2584_v33 = vand.u32 4294901760, %v11402_v42  ;;  %v503_v57 = vld [vmem:[%s15302_s0 + $0x208] sm:$0xff] }
 0x110   : > { %8262 = vmatprep.subr.mxu1 %v16094_v15  ;;  %8236 = vmatpush3.msra.mxu0 %v11224_v31  ;;  %v2696_v15 = vand.u32 4294901760, %v11397_v20  ;;  %v2590_v1 = vsub.f32 %v11340_v18, %v16098_v30  ;;  %v11468_v20 = vsub.f32 %v504_v25, %v11415_v40  ;;  %v502_v30 = vld [vmem:[%s15302_s0 + $0x200] sm:$0xff]  ;;  %v11482_v11 = vsub.f32 %v521_v14, %v11413_v9 }
 0x111   : > { %8263 = vmatpush3.msra.mxu1 %v16097_v24  ;;  %8237 = vmatprep.subr.mxu0 %v11261_v56  ;;  %v11479_v24 = vsub.f32 %v11291_v21, %v11421_v27  ;;  %v16100_v25 = vand.u32 4294901760, %v11285_v37  ;;  %v11490_v56 = vand.u32 4294901760, %v519_v29  ;;  %v11494_v18 = vsub.f32 %v432_v43, %v11431_v58 }
 0x112   : > { %8264 = vmatprep.subr.mxu1 %v16099_v44  ;;  %8238 = vmatpush3.msra.mxu0 %v11280_v45  ;;  %v16101_v44 = vand.u32 4294901760, %v11350_v5  ;;  %v16102_v21 = vand.u32 4294901760, %v11299_v54  ;;  %v2703_v14 = vand.u32 4294901760, %v11439_v23  ;;  %v16103_v37 = vand.u32 4294901760, %v11385_v32 }
 0x113   : > { %8265 = vmatpush3.msra.mxu1 %v16100_v25  ;;  %8239 = vmatprep.subr.mxu0 %v11311_v26  ;;  %v11503_v45 = vand.u32 4294901760, %v503_v57  ;;  %v16104_v43 = vand.u32 4294901760, %v11306_v55  ;;  %v11509_v31 = vand.u32 4294901760, %v518_v59  ;;  %v11511_v26 = vand.u32 4294901760, %v502_v30 }
 0x114   : > { %v2597_v42 = vsub.f32 %v11350_v5, %v16101_v44  ;;  %8266 = vmatprep.subr.mxu1 %v16102_v21  ;;  %v2709_v25 = vsub.f32 %v11385_v32, %v16103_v37  ;;  %8240 = vmatpush3.msra.mxu0 %v11301_v53  ;;  %v11515_v23 = vsub.f32 %v520_v51, %v11441_v10  ;;  %v16105_v21 = vand.u32 4294901760, %v11325_v49 }
 0x115   : > { %8267 = vmatpush3.msra.mxu1 %v16104_v43  ;;  %8241 = vmatprep.subr.mxu0 %v11353_v12  ;;  %v2591_v37 = vand.u32 4294901760, %v2590_v1  ;;  %v16106_v44 = vand.u32 4294901760, %v11418_v28  ;;  %v15497_v43 = vand.u32 4294901760, %v11479_v24  ;;  %v16107_v51 = vand.u32 4294901760, %v11362_v62 }
 0x116   : > { %8268 = vmatprep.subr.mxu1 %v16105_v21  ;;  %8242 = vmatpush3.msra.mxu0 %v11316_v7  ;;  %v2598_v54 = vand.u32 4294901760, %v2597_v42  ;;  %v11531_v1 = vsub.f32 %v519_v29, %v11490_v56  ;;  %v11535_v21 = vsub.f32 %v503_v57, %v11503_v45  ;;  %v16108_v53 = vand.u32 4294901760, %v11448_v17 }
 0x117   : > { %v2716_v55 = vsub.f32 %v11418_v28, %v16106_v44  ;;  %8269 = vmatpush3.msra.mxu1 %v2577_v41  ;;  %v2604_v12 = vsub.f32 %v11362_v62, %v16107_v51  ;;  %8243 = vmatprep.subr.mxu0 %v11369_v13  ;;  %v2710_v44 = vand.u32 4294901760, %v2709_v25  ;;  %v11543_v51 = vsub.f32 %v502_v30, %v11511_v26 }
 0x118   : > { %8270 = vmatprep.subr.mxu1 %v2696_v15  ;;  %v2723_v41 = vsub.f32 %v11448_v17, %v16108_v53  ;;  %8244 = vmatpush3.msra.mxu0 %v11371_v48  ;;  %v16110_v29 = vand.u32 4294901760, %v11428_v47  ;;  %v11550_v57 = vsub.f32 %v518_v59, %v11509_v31  ;;  %v16112_v30 = vand.u32 4294901760, %v11482_v11 }
 0x119   : > { %8271 = vmatpush3.msra.mxu1 %v2584_v33  ;;  %16109 = vst [vmem:[#allocation32_spill] sm:$0xff] %v11543_v51  ;;  %8245 = vmatprep.subr.mxu0 %v11413_v9  ;;  %v2717_v53 = vand.u32 4294901760, %v2716_v55  ;;  %v2517_v33 = vsub.f32 %v11479_v24, %v15497_v43  ;;  %v16113_v59 = vand.u32 4294901760, %v11494_v18  ;;  %v16114_v43 = vand.u32 4294901760, %v11456_v39 }
 0x11a   : > { %v2611_v15 = vsub.f32 %v11428_v47, %v16110_v29  ;;  %16111 = vst [vmem:[#allocation34_spill] sm:$0xff] %v11550_v57  ;;  %8272 = vmatprep.subr.mxu1 %v2703_v14  ;;  %v2730_v42 = vsub.f32 %v11482_v11, %v16112_v30  ;;  %8246 = vmatpush3.msra.mxu0 %v11404_v50  ;;  %v2605_v29 = vand.u32 4294901760, %v2604_v12  ;;  %v2724_v55 = vand.u32 4294901760, %v2723_v41 }
 0x11b   : > { %8273 = vmatpush3.msra.mxu1 %v2591_v37  ;;  %v2523_v25 = vsub.f32 %v11494_v18, %v16113_v59  ;;  %8247 = vmatprep.subr.mxu0 %v11441_v10  ;;  %v2618_v30 = vsub.f32 %v11456_v39, %v16114_v43  ;;  %v16115_v37 = vand.u32 4294901760, %v11515_v23  ;;  %v15501_v14 = vand.u32 4294901760, %v11550_v57 }
 0x11c   : > { %8274 = vmatprep.subr.mxu1 %v2710_v44  ;;  %8248 = vmatpush3.msra.mxu0 %v11415_v40  ;;  %v2612_v12 = vand.u32 4294901760, %v2611_v15  ;;  %v2518_v44 = vand.u32 4294901760, %v2517_v33  ;;  %v2731_v41 = vand.u32 4294901760, %v2730_v42  ;;  %v16116_v10 = vand.u32 4294901760, %v11468_v20 }
 0x11d   : > { %8275 = vmatpush3.msra.mxu1 %v2598_v54  ;;  %v2737_v59 = vsub.f32 %v11515_v23, %v16115_v37  ;;  %8249 = vmatprep.subr.mxu0 %v11490_v56  ;;  %v15500_v49 = vand.u32 4294901760, %v11543_v51  ;;  %v2524_v54 = vand.u32 4294901760, %v2523_v25  ;;  %v16117_v15 = vand.u32 4294901760, %v11531_v1 }
 0x11e   : > { %8276 = vmatprep.subr.mxu1 %v2717_v53  ;;  %v2625_v43 = vsub.f32 %v11468_v20, %v16116_v10  ;;  %8250 = vmatpush3.msra.mxu0 %v11503_v45  ;;  %v2619_v53 = vand.u32 4294901760, %v2618_v30  ;;  %v16118_v42 = vand.u32 4294901760, %v11535_v21  ;;  %v2751_v25 = vsub.f32 %v11550_v57, %v15501_v14  ;;  %v16136_v14 = vld [vmem:[#allocation17_spill] sm:$0xff] }
 0x11f   : > { %8277 = vmatpush3.msra.mxu1 %v2605_v29  ;;  %v2744_v37 = vsub.f32 %v11531_v1, %v16117_v15  ;;  %8251 = vmatprep.subr.mxu0 %v11509_v31  ;;  %v2738_v10 = vand.u32 4294901760, %v2737_v59  ;;  %v16122_v15 = vld [vmem:[#allocation29_spill] sm:$0xff] }
 0x120   : > { %8278 = vmatprep.subr.mxu1 %v2724_v55  ;;  %v2632_v33 = vsub.f32 %v11535_v21, %v16118_v42  ;;  %8252 = vmatpush3.msra.mxu0 %v11511_v26  ;;  %v2626_v29 = vand.u32 4294901760, %v2625_v43  ;;  %v2639_v55 = vsub.f32 %v11543_v51, %v15500_v49  ;;  %v2752_v59 = vand.u32 4294901760, %v2751_v25  ;;  %v16120_v43 = vld [vmem:[#allocation24_spill] sm:$0xff]  ;;  %v16125_v42 = vld [vmem:[#allocation9_spill] sm:$0xff]  ;;  %v16128_v25 = vld [vmem:[#allocation6_spill] sm:$0xff] }
 0x121   : > { %8279 = vmatpush3.msra.mxu1 %v2612_v12  ;;  %2519 = vmatprep.mubr.f32.mxu0 %v2518_v44  ;;  %v2745_v30 = vand.u32 4294901760, %v2744_v37  ;;  %v16123_v37 = vld [vmem:[#allocation8_spill] sm:$0xff]  ;;  %v16135_v49 = vld [vmem:[#allocation15_spill] sm:$0xff] }
 0x122   : > { %8280 = vmatprep.subr.mxu1 %v2731_v41  ;;  %8291 = vmatprep.subr.mxu0 %v11064_v52  ;;  %v2633_v12 = vand.u32 4294901760, %v2632_v33  ;;  %v2640_v44 = vand.u32 4294901760, %v2639_v55  ;;  %v16119_v41 = vld [vmem:[#allocation14_spill] sm:$0xff] }
 0x123   : > { %2525 = vmatmul.mubr.f32.vlgmr.msra.gmra.mxu0 %v2524_v54  ;;  %8281 = vmatpush3.msra.mxu1 %v2619_v53  ;;  %v16121_v54 = vld [vmem:[#allocation5_spill] sm:$0xff]  ;;  %v16124_v53 = vld [vmem:[#allocation19_spill] sm:$0xff]  ;;  %v16126_v33 = vld [vmem:[#allocation22_spill] sm:$0xff] }
 0x124   : > { %8292 = vmatpush3.msra.mxu0 %v11070_v8  ;;  %8282 = vmatprep.subr.mxu1 %v2738_v10  ;;  %v16127_v10 = vld [vmem:[#allocation12_spill] sm:$0xff]  ;;  %v16130_v55 = vld [vmem:[#allocation18_spill] sm:$0xff] }
 0x125   : > { %8293 = vmatprep.subr.mxu0 %v11084_v22  ;;  %8283 = vmatpush3.msra.mxu1 %v2626_v29  ;;  %v16129_v29 = vld [vmem:[#allocation4_spill] sm:$0xff] }
 0x126   : > { %8294 = vmatpush3.msra.mxu0 %v11090_v36  ;;  %8284 = vmatprep.subr.mxu1 %v2745_v30  ;;  %v16131_v30 = vld [vmem:[#allocation16_spill] sm:$0xff] }
 0x127   : > { %8295 = vmatprep.subr.mxu0 %v11101_v63  ;;  %8285 = vmatpush3.msra.mxu1 %v2633_v12  ;;  %v16132_v12 = vld [vmem:[#allocation10_spill] sm:$0xff] }
 0x128   : > { %8296 = vmatpush3.msra.mxu0 %v11107_v16  ;;  %8286 = vmatprep.subr.mxu1 %v2752_v59  ;;  %v16133_v59 = vld [vmem:[#allocation20_spill] sm:$0xff] }
 0x129   : > { %8297 = vmatprep.subr.mxu0 %v11130_v60  ;;  %8287 = vmatpush3.msra.mxu1 %v2640_v44  ;;  %v16134_v44 = vld [vmem:[#allocation13_spill] sm:$0xff] }
 0x12a   : > { %2755 = vmatprep.mubr.f32.mxu1 %v11421_v27  ;;  %8298 = vmatpush3.msra.mxu0 %v11136_v4  ;;  %v16138_v27 = vld [vmem:[#allocation25_spill] sm:$0xff] }
 0x12b   : > { %2757 = vmatmul.mubr.f32.vlgmr.msra.gmra.mxu1 %v11431_v58  ;;  %8299 = vmatprep.subr.mxu0 %v11155_v61  ;;  %v16137_v58 = vld [vmem:[#allocation11_spill] sm:$0xff] }
 0x12c   : > { %8326 = vmatprep.subr.mxu1 %v11024_v0  ;;  %8300 = vmatpush3.msra.mxu0 %v11163_v19 }
 0x12d   : > { %8327 = vmatpush3.msra.mxu1 %v11035_v38  ;;  %8301 = vmatprep.subr.mxu0 %v11189_v35 }
 0x12e   : > { %8328 = vmatprep.subr.mxu1 %v11043_v34  ;;  %8302 = vmatpush3.msra.mxu0 %v11179_v46 }
 0x12f   : > { %8329 = vmatpush3.msra.mxu1 %v16119_v41  ;;  %8303 = vmatprep.subr.mxu0 %v16120_v43 }
 0x130   : > { %8330 = vmatprep.subr.mxu1 %v16121_v54  ;;  %8304 = vmatpush3.msra.mxu0 %v16122_v15 }
 0x131   : > { %8331 = vmatpush3.msra.mxu1 %v16123_v37  ;;  %8305 = vmatprep.subr.mxu0 %v11288_v6 }
 0x132   : > { %8332 = vmatprep.subr.mxu1 %v16124_v53  ;;  %8306 = vmatpush3.msra.mxu0 %v11278_v2 }
 0x133   : > { %8333 = vmatpush3.msra.mxu1 %v16125_v42  ;;  %8307 = vmatprep.subr.mxu0 %v11334_v3 }
 0x134   : > { %8334 = vmatprep.subr.mxu1 %v16126_v33  ;;  %8308 = vmatpush3.msra.mxu0 %v16127_v10 }
 0x135   : > { %8335 = vmatpush3.msra.mxu1 %v16128_v25  ;;  %8309 = vmatprep.subr.mxu0 %v11385_v32 }
 0x136   : > { %8336 = vmatprep.subr.mxu1 %v16129_v29  ;;  %8310 = vmatpush3.msra.mxu0 %v11350_v5 }
 0x137   : > { %8337 = vmatpush3.msra.mxu1 %v16130_v55  ;;  %8311 = vmatprep.subr.mxu0 %v11418_v28 }
 0x138   : > { %8338 = vmatprep.subr.mxu1 %v16131_v30  ;;  %8312 = vmatpush3.msra.mxu0 %v11362_v62 }
 0x139   : > { %8339 = vmatpush3.msra.mxu1 %v16132_v12  ;;  %8313 = vmatprep.subr.mxu0 %v11448_v17 }
 0x13a   : > { %8340 = vmatprep.subr.mxu1 %v16133_v59  ;;  %8314 = vmatpush3.msra.mxu0 %v11428_v47  ;;  %v16139_v47 = vld [vmem:[#allocation27_spill] sm:$0xff] }
 0x13b   : > { %8341 = vmatpush3.msra.mxu1 %v16134_v44  ;;  %8315 = vmatprep.subr.mxu0 %v11482_v11 }
 0x13c   : > { %8342 = vmatprep.subr.mxu1 %v16135_v49  ;;  %8316 = vmatpush3.msra.mxu0 %v11456_v39 }
 0x13d   : > { %8343 = vmatpush3.msra.mxu1 %v16136_v14  ;;  %8317 = vmatprep.subr.mxu0 %v11515_v23 }
 0x13e   : > { %8344 = vmatprep.subr.mxu1 %v16137_v58  ;;  %8318 = vmatpush3.msra.mxu0 %v11468_v20 }
 0x13f   : > { %8345 = vmatpush3.msra.mxu1 %v16138_v27  ;;  %8319 = vmatprep.subr.mxu0 %v11531_v1 }
 0x140   : > { %8346 = vmatprep.subr.mxu1 %v16139_v47  ;;  %8320 = vmatpush3.msra.mxu0 %v11535_v21  ;;  %v16140_v47 = vand.u32 4294901760, %v11064_v52  ;;  %v16145_v52 = vand.u32 4294901760, %v11101_v63  ;;  %v16150_v63 = vand.u32 4294901760, %v11494_v18 }
 0x141   : > { %8347 = vmatpush3.msra.mxu1 %v11316_v7  ;;  %8321 = vmatprep.subr.mxu0 %v11550_v57  ;;  %v16141_v7 = vand.u32 4294901760, %v11070_v8  ;;  %v16142_v57 = vld [vmem:[#allocation23_spill] sm:$0xff]  ;;  %v16146_v8 = vand.u32 4294901760, %v11107_v16  ;;  %v7833_v16 = vpop.f32.mrf.mxu0 }
 0x142   : > { %8348 = vmatprep.subr.mxu1 %v11369_v13  ;;  %8322 = vmatpush3.msra.mxu0 %v11543_v51  ;;  %v16143_v51 = vand.u32 4294901760, %v11084_v22  ;;  %v16147_v22 = vand.u32 4294901760, %v11130_v60  ;;  %v16152_v60 = vand.u32 4294901760, %v11163_v19 }
 0x143   : > { %2892 = vmatprep.mubr.f32.mxu0 %v11479_v24  ;;  %8349 = vmatpush3.msra.mxu1 %v11371_v48  ;;  %v16144_v48 = vand.u32 4294901760, %v11090_v36  ;;  %v16148_v36 = vand.u32 4294901760, %v11479_v24  ;;  %v7834_v19 = vpop.f32.mrf.mxu0 }
 0x144   : > { %2895 = vmatmul.mubr.f32.vlgmr.msra.gmra.mxu0 %v11494_v18  ;;  %8350 = vmatprep.subr.mxu1 %v11413_v9  ;;  %v16154_v18 = vand.u32 4294901760, %v11179_v46 }
 0x145   : > { %8361 = vmatprep.subr.mxu0 %v16140_v47  ;;  %8351 = vmatpush3.msra.mxu1 %v11404_v50  ;;  %v16153_v47 = vand.u32 4294901760, %v11189_v35  ;;  %v16156_v35 = vand.u32 4294901760, %v16122_v15  ;;  %v16158_v15 = vand.u32 4294901760, %v11278_v2  ;;  %v16160_v2 = vand.u32 4294901760, %v16127_v10 }
 0x146   : > { %8362 = vmatpush3.msra.mxu0 %v16141_v7  ;;  %8352 = vmatprep.subr.mxu1 %v16142_v57  ;;  %v16151_v7 = vand.u32 4294901760, %v11155_v61  ;;  %v549_v61 = vld [vmem:[%s15302_s0 + $0x378] sm:$0xff] }
 0x147   : > { %8363 = vmatprep.subr.mxu0 %v16143_v51  ;;  %8353 = vmatpush3.msra.mxu1 %v11415_v40  ;;  %v11712_v46 = vand.u32 4294901760, %v549_v61  ;;  %v16157_v51 = vand.u32 4294901760, %v11288_v6  ;;  %v563_v6 = vld [vmem:[%s15302_s0 + $0x3e8] sm:$0xff] }
 0x148   : > { %8364 = vmatpush3.msra.mxu0 %v16144_v48  ;;  %8354 = vmatprep.subr.mxu1 %v11490_v56  ;;  %v16149_v48 = vand.u32 4294901760, %v11136_v4  ;;  %v565_v4 = vld [vmem:[%s15302_s0 + $0x3f8] sm:$0xff] }
 0x149   : > { %8365 = vmatprep.subr.mxu0 %v16145_v52  ;;  %8355 = vmatpush3.msra.mxu1 %v11503_v45  ;;  %v11710_v24 = vand.u32 4294901760, %v565_v4  ;;  %v16159_v52 = vand.u32 4294901760, %v11334_v3 }
 0x14a   : > { %8366 = vmatpush3.msra.mxu0 %v16146_v8  ;;  %8356 = vmatprep.subr.mxu1 %v11509_v31 }
 0x14b   : > { %8367 = vmatprep.subr.mxu0 %v16147_v22  ;;  %8357 = vmatpush3.msra.mxu1 %v11511_v26  ;;  %v11746_v22 = vsub.f32 %v565_v4, %v11710_v24  ;;  %v16168_v4 = vand.u32 4294901760, %v11362_v62  ;;  %v545_v62 = vld [vmem:[%s15302_s0 + $0x358] sm:$0xff] }
 0x14c   : > { %2999 = vmatprep.mubr.f32.mxu1 %v16148_v36  ;;  %8368 = vmatpush3.msra.mxu0 %v16149_v48  ;;  %v16162_v36 = vand.u32 4294901760, %v11385_v32  ;;  %v11754_v48 = vand.u32 4294901760, %v563_v6 }
 0x14d   : > { %3003 = vmatmul.mubr.f32.vlgmr.msra.gmra.mxu1 %v16150_v63  ;;  %8369 = vmatprep.subr.mxu0 %v16151_v7  ;;  %v546_v7 = vld [vmem:[%s15302_s0 + $0x360] sm:$0xff] }
 0x14e   : > { %8396 = vmatprep.subr.mxu1 %v11024_v0  ;;  %8370 = vmatpush3.msra.mxu0 %v16152_v60  ;;  %v7868_v0 = vpop.f32.mrf.mxu1  ;;  %16164 = vst [vmem:[#allocation24_spill] sm:$0xff] %v11754_v48 }
 0x14f   : > { %8397 = vmatpush3.msra.mxu1 %v11035_v38  ;;  %8371 = vmatprep.subr.mxu0 %v16153_v47  ;;  %v16155_v38 = vand.u32 4294901760, %v16120_v43 }
 0x150   : > { %8398 = vmatprep.subr.mxu1 %v11043_v34  ;;  %8372 = vmatpush3.msra.mxu0 %v16154_v18  ;;  %v564_v34 = vld [vmem:[%s15302_s0 + $0x3f0] sm:$0xff]  ;;  %v7869_v43 = vpop.f32.mrf.mxu1 }
 0x151   : > { %8399 = vmatpush3.msra.mxu1 %v16119_v41  ;;  %8373 = vmatprep.subr.mxu0 %v16155_v38  ;;  %v548_v41 = vld [vmem:[%s15302_s0 + $0x370] sm:$0xff]  ;;  %v7870_v32 = vadd.f32 %v7869_v43, %v7868_v0  ;;  %v16169_v38 = vand.u32 4294901760, %v11448_v17 }
 0x152   : > { %8400 = vmatprep.subr.mxu1 %v16121_v54  ;;  %8374 = vmatpush3.msra.mxu0 %v16156_v35  ;;  %v7903_v54 = vpop.f32.mrf.mxu0  ;;  %v7938_v8 = vpop.f32.mrf.mxu1  ;;  %v11740_v3 = vand.u32 4294901760, %v548_v41  ;;  %v560_v17 = vld [vmem:[%s15302_s0 + $0x3d0] sm:$0xff] }
 0x153   : > { %8401 = vmatpush3.msra.mxu1 %v16123_v37  ;;  %8375 = vmatprep.subr.mxu0 %v16157_v51  ;;  %v11723_v37 = vand.u32 4294901760, %v564_v34 }
 0x154   : > { %8402 = vmatprep.subr.mxu1 %v16124_v53  ;;  %8376 = vmatpush3.msra.mxu0 %v16158_v15  ;;  %v547_v53 = vld [vmem:[%s15302_s0 + $0x368] sm:$0xff]  ;;  %16161 = vst [vmem:[#allocation14_spill] sm:$0xff] %v11740_v3  ;;  %v7904_v10 = vpop.f32.mrf.mxu0  ;;  %v7939_v47 = vpop.f32.mrf.mxu1 }
 0x155   : > { %8403 = vmatpush3.msra.mxu1 %v16125_v42  ;;  %8377 = vmatprep.subr.mxu0 %v16159_v52  ;;  %v11738_v42 = vsub.f32 %v549_v61, %v11712_v46  ;;  %v11756_v63 = vand.u32 4294901760, %v547_v53  ;;  %v11762_v60 = vsub.f32 %v564_v34, %v11723_v37  ;;  %v11776_v61 = vsub.f32 %v548_v41, %v11740_v3 }
 0x156   : > { %8404 = vmatprep.subr.mxu1 %v16126_v33  ;;  %8378 = vmatpush3.msra.mxu0 %v16160_v2  ;;  %v562_v33 = vld [vmem:[%s15302_s0 + $0x3e0] sm:$0xff]  ;;  %v7905_v18 = vadd.f32 %v7904_v10, %v7903_v54  ;;  %v11783_v34 = vand.u32 4294901760, %v546_v7  ;;  %v11804_v41 = vsub.f32 %v563_v6, %v11754_v48  ;;  %v16174_v54 = vand.u32 4294901760, %v11482_v11 }
 0x157   : > { %8405 = vmatpush3.msra.mxu1 %v16128_v25  ;;  %8379 = vmatprep.subr.mxu0 %v16162_v36  ;;  %v16163_v25 = vand.u32 4294901760, %v11350_v5  ;;  %16165 = vst [vmem:[#allocation5_spill] sm:$0xff] %v11756_v63  ;;  %v11767_v5 = vand.u32 4294901760, %v562_v33  ;;  %v15517_v0 = vand.u32 4294901760, %v11738_v42  ;;  %v11792_v51 = vsub.f32 %v547_v53, %v11756_v63 }
 0x158   : > { %8406 = vmatprep.subr.mxu1 %v16129_v29  ;;  %v16166_v29 = vand.u32 4294901760, %v11418_v28  ;;  %v15519_v28 = vand.u32 4294901760, %v11746_v22  ;;  %16170 = vst [vmem:[#allocation8_spill] sm:$0xff] %v11783_v34  ;;  %v16175_v52 = vand.u32 4294901760, %v11456_v39  ;;  %v559_v39 = vld [vmem:[%s15302_s0 + $0x3c8] sm:$0xff]  ;;  %v16177_v2 = vand.u32 4294901760, %v11515_v23 }
 0x159   : > { %8380 = vmatpush3.msra.mxu0 %v16163_v25  ;;  %8407 = vmatpush3.msra.mxu1 %v16130_v55  ;;  %16167 = vst [vmem:[#allocation29_spill] sm:$0xff] %v11767_v5  ;;  %v561_v55 = vld [vmem:[%s15302_s0 + $0x3d8] sm:$0xff]  ;;  %v11810_v15 = vsub.f32 %v562_v33, %v11767_v5  ;;  %v11825_v11 = vsub.f32 %v11738_v42, %v15517_v0  ;;  %v11837_v10 = vand.u32 4294901760, %v560_v17 }
 0x15a   : > { %8381 = vmatprep.subr.mxu0 %v16166_v29  ;;  %8408 = vmatprep.subr.mxu1 %v16131_v30  ;;  %v7835_v30 = vadd.f32 %v7834_v19, %v7833_v16  ;;  %v11794_v16 = vand.u32 4294901760, %v561_v55  ;;  %v544_v19 = vld [vmem:[%s15302_s0 + $0x350] sm:$0xff]  ;;  %v11818_v6 = vsub.f32 %v11746_v22, %v15519_v28  ;;  %v11835_v33 = vsub.f32 %v546_v7, %v11783_v34  ;;  %v8008_v36 = vpop.f32.mrf.mxu1 }
 0x15b   : > { %8382 = vmatpush3.msra.mxu0 %v16168_v4  ;;  %8409 = vmatpush3.msra.mxu1 %v16132_v12  ;;  %v16171_v12 = vld [vmem:[#allocation28_spill] sm:$0xff]  ;;  %16178 = vst [vmem:[#allocation22_spill] sm:$0xff] %v11837_v10  ;;  %v11839_v25 = vand.u32 4294901760, %v544_v19  ;;  %v15512_v7 = vand.u32 4294901760, %v11792_v51 }
 0x15c   : > { %8383 = vmatprep.subr.mxu0 %v16169_v38  ;;  %8410 = vmatprep.subr.mxu1 %v16133_v59  ;;  %v16172_v35 = vand.u32 4294901760, %v16171_v12  ;;  %16173 = vst [vmem:[#allocation19_spill] sm:$0xff] %v11794_v16  ;;  %v15516_v59 = vand.u32 4294901760, %v11762_v60  ;;  %v1035_v43 = vadd.f32 %v7870_v32, %v7835_v30  ;;  %v16180_v32 = vand.u32 4294901760, %v11468_v20  ;;  %v16182_v20 = vld [vmem:[#allocation27_spill] sm:$0xff]  ;;  %v543_v12 = vld [vmem:[%s15302_s0 + $0x348] sm:$0xff] }
 0x15d   : > { %8411 = vmatpush3.msra.mxu1 %v16134_v44  ;;  %v7940_v44 = vadd.f32 %v7939_v47, %v7938_v8  ;;  %v11820_v8 = vand.u32 4294901760, %v545_v62  ;;  %16179 = vst [vmem:[#allocation12_spill] sm:$0xff] %v11839_v25  ;;  %v11852_v47 = vsub.f32 %v561_v55, %v11794_v16  ;;  %v16181_v30 = vand.u32 4294901760, %v11531_v1  ;;  %v16185_v55 = vld [vmem:[#allocation7_spill] sm:$0xff] }
 0x15e   : > { %8384 = vmatpush3.msra.mxu0 %v16172_v35  ;;  %8412 = vmatprep.subr.mxu1 %v16135_v49  ;;  %v7973_v53 = vpop.f32.mrf.mxu0  ;;  %v15514_v49 = vand.u32 4294901760, %v11776_v61  ;;  %v11847_v23 = vsub.f32 %v11762_v60, %v15516_v59  ;;  %v11857_v38 = vand.u32 4294901760, %v559_v39  ;;  %v15511_v35 = vand.u32 4294901760, %v11810_v15  ;;  %v540_v59 = vld [vmem:[%s15302_s0 + $0x330] sm:$0xff] }
 0x15f   : > { %8385 = vmatprep.subr.mxu0 %v16174_v54  ;;  %8413 = vmatpush3.msra.mxu1 %v16136_v14  ;;  %16176 = vst [vmem:[#allocation9_spill] sm:$0xff] %v11820_v8  ;;  %v1173_v14 = vadd.f32 %v7905_v18, %v1035_v43  ;;  %v8009_v18 = vpop.f32.mrf.mxu1  ;;  %v16184_v43 = vand.u32 4294901760, %v11535_v21  ;;  %v11867_v1 = vsub.f32 %v545_v62, %v11820_v8  ;;  %v558_v62 = vld [vmem:[%s15302_s0 + $0x3c0] sm:$0xff] }
 0x160   : > { %8386 = vmatpush3.msra.mxu0 %v16175_v52  ;;  %8414 = vmatprep.subr.mxu1 %v16137_v58  ;;  %v7974_v29 = vpop.f32.mrf.mxu0  ;;  %v15513_v58 = vand.u32 4294901760, %v11804_v41  ;;  %16183 = vst [vmem:[#allocation6_spill] sm:$0xff] %v11857_v38  ;;  %v11872_v54 = vsub.f32 %v11776_v61, %v15514_v49  ;;  %v16186_v52 = vld [vmem:[#allocation34_spill] sm:$0xff]  ;;  %v11878_v21 = vsub.f32 %v544_v19, %v11839_v25 }
 0x161   : > { %8387 = vmatprep.subr.mxu0 %v16177_v2  ;;  %8415 = vmatpush3.msra.mxu1 %v16138_v27  ;;  %v1281_v4 = vadd.f32 %v7940_v44, %v1173_v14  ;;  %v7975_v27 = vadd.f32 %v7974_v29, %v7973_v53  ;;  %v8010_v44 = vadd.f32 %v8009_v18, %v8008_v36  ;;  %v16187_v53 = vand.u32 4294901760, %v16186_v52  ;;  %v542_v2 = vld [vmem:[%s15302_s0 + $0x340] sm:$0xff]  ;;  %v16193_v18 = vld [vmem:[#allocation31_spill] sm:$0xff] }
 0x162   : > { %8388 = vmatpush3.msra.mxu0 %v16180_v32  ;;  %8416 = vmatprep.subr.mxu1 %v16182_v20  ;;  %v15515_v36 = vand.u32 4294901760, %v11835_v33  ;;  %v11888_v32 = vsub.f32 %v560_v17, %v11837_v10  ;;  %v16188_v29 = vld [vmem:[#allocation32_spill] sm:$0xff]  ;;  %v11896_v19 = vsub.f32 %v11804_v41, %v15513_v58  ;;  %v11903_v20 = vsub.f32 %v11792_v51, %v15512_v7  ;;  %v539_v58 = vld [vmem:[%s15302_s0 + $0x328] sm:$0xff] }
 0x163   : > { %8389 = vmatprep.subr.mxu0 %v16181_v30  ;;  %8417 = vmatpush3.msra.mxu1 %v16185_v55  ;;  %v1449_v14 = vadd.f32 %v7975_v27, %v1281_v4  ;;  %v16189_v30 = vand.u32 4294901760, %v16188_v29  ;;  %v11898_v4 = vand.u32 4294901760, %v543_v12  ;;  %v15518_v17 = vand.u32 4294901760, %v11852_v47  ;;  %v16192_v27 = vld [vmem:[#allocation21_spill] sm:$0xff] }
 0x164   : > { %8390 = vmatpush3.msra.mxu0 %v16184_v43  ;;  %8418 = vmatprep.subr.mxu1 %v11369_v13  ;;  %v16190_v13 = vld [vmem:[#allocation33_spill] sm:$0xff]  ;;  %v11912_v52 = vsub.f32 %v11810_v15, %v15511_v35  ;;  %v541_v35 = vld [vmem:[%s15302_s0 + $0x338] sm:$0xff]  ;;  %v15521_v7 = vand.u32 4294901760, %v11888_v32  ;;  %v11999_v29 = vand.u32 4294901760, %v540_v59  ;;  %v16203_v43 = vld [vmem:[#allocation30_spill] sm:$0xff] }
 0x165   : > { %8391 = vmatprep.subr.mxu0 %v16187_v53  ;;  %3169 = vmatprep.mubr.f32.mxu0 %v16190_v13  ;;  %16191 = vst [vmem:[#allocation4_spill] sm:$0xff] %v11898_v4  ;;  %v1553_v55 = vadd.f32 %v8010_v44, %v1449_v14  ;;  %v11915_v53 = vsub.f32 %v559_v39, %v11857_v38  ;;  %v557_v44 = vld [vmem:[%s15302_s0 + $0x3b8] sm:$0xff]  ;;  %v15520_v14 = vand.u32 4294901760, %v11867_v1  ;;  %v11978_v0 = vand.u32 4294901760, %v541_v35 }
 0x166   : > { %8392 = vmatpush3.msra.mxu0 %v16189_v30  ;;  %8419 = vmatpush3.msra.mxu1 %v16192_v27  ;;  %v11920_v30 = vand.u32 4294901760, %v558_v62  ;;  %v11922_v27 = vand.u32 4294901760, %v542_v2  ;;  %v11938_v39 = vsub.f32 %v11835_v33, %v15515_v36  ;;  %v11950_v49 = vsub.f32 %v543_v12, %v11898_v4  ;;  %16200 = vst [vmem:[#allocation17_spill] sm:$0xff] %v11999_v29 }
 0x167   : > { %3171 = vmatmul.mubr.f32.vlgmr.msra.gmra.mxu0 %v16193_v18  ;;  %16194 = vst [vmem:[#allocation18_spill] sm:$0xff] %v11915_v53  ;;  %8420 = vmatprep.subr.mxu1 %v11413_v9  ;;  %7590 = vst [vmem:[%s11931_s24] sm:$0xff] %v1553_v55  ;;  %v11955_v36 = vsub.f32 %v11852_v47, %v15518_v17  ;;  %v11964_v12 = vand.u32 4294901760, %v557_v44  ;;  %v556_v17 = vld [vmem:[%s15302_s0 + $0x3b0] sm:$0xff]  ;;  %v15525_v28 = vand.u32 4294901760, %v11915_v53  ;;  %v11989_v9 = vld [vmem:[%s10090_s23 + $0x18] sm:$0xff] }
 0x168   : > { %8431 = vmatprep.subr.mxu0 %v11710_v24  ;;  %16195 = vst [vmem:[#allocation16_spill] sm:$0xff] %v11920_v30  ;;  %16196 = vst [vmem:[#allocation10_spill] sm:$0xff] %v11922_v27  ;;  %8421 = vmatpush3.msra.mxu1 %v11404_v50  ;;  %v15522_v50 = vand.u32 4294901760, %v11878_v21  ;;  %v11986_v55 = vsub.f32 %v558_v62, %v11920_v30 }
 0x169   : > { %8432 = vmatpush3.msra.mxu0 %v11712_v46  ;;  %8422 = vmatprep.subr.mxu1 %v16142_v57  ;;  %16197 = vst [vmem:[#allocation20_spill] sm:$0xff] %v11950_v49  ;;  %16198 = vst [vmem:[#allocation13_spill] sm:$0xff] %v11964_v12  ;;  %v11983_v57 = vsub.f32 %v11867_v1, %v15520_v14  ;;  %v12009_v14 = vand.u32 4294901760, %v556_v17 }
 0x16a   : > { %8433 = vmatprep.subr.mxu0 %v11723_v37  ;;  %8423 = vmatpush3.msra.mxu1 %v11415_v40  ;;  %v11976_v40 = vsub.f32 %v542_v2, %v11922_v27  ;;  %16199 = vst [vmem:[#allocation15_spill] sm:$0xff] %v11978_v0  ;;  %v11997_v2 = vsub.f32 %v11888_v32, %v15521_v7  ;;  %v555_v7 = vld [vmem:[%s15302_s0 + $0x3a8] sm:$0xff] }
 0x16b   : > { %8434 = vmatpush3.msra.mxu0 %v11740_v3  ;;  %8424 = vmatprep.subr.mxu1 %v11490_v56  ;;  %v12004_v62 = vsub.f32 %v11878_v21, %v15522_v50  ;;  %16201 = vst [vmem:[#allocation11_spill] sm:$0xff] %v12009_v14  ;;  %v12014_v56 = vand.u32 4294901760, %v539_v58  ;;  %v554_v50 = vld [vmem:[%s15302_s0 + $0x3a0] sm:$0xff]  ;;  %v16212_v3 = vand.u32 4294901760, %v11986_v55 }
 0x16c   : > { %8435 = vmatprep.subr.mxu0 %v11754_v48  ;;  %8425 = vmatpush3.msra.mxu1 %v11503_v45  ;;  %v538_v45 = vld [vmem:[%s15302_s0 + $0x320] sm:$0xff]  ;;  %v553_v48 = vld [vmem:[%s15302_s0 + $0x398] sm:$0xff] }
 0x16d   : > { %8436 = vmatpush3.msra.mxu0 %v11756_v63  ;;  %8426 = vmatprep.subr.mxu1 %v11509_v31  ;;  %16202 = vst [vmem:[#allocation25_spill] sm:$0xff] %v12014_v56  ;;  %v12022_v31 = vsub.f32 %v11915_v53, %v15525_v28  ;;  %v12039_v28 = vsub.f32 %v541_v35, %v11978_v0  ;;  %v12052_v35 = vand.u32 4294901760, %v555_v7  ;;  %v537_v63 = vld [vmem:[%s15302_s0 + $0x318] sm:$0xff]  ;;  %v16207_v53 = vand.u32 4294901760, %v11825_v11  ;;  %v536_v11 = vld [vmem:[%s15302_s0 + $0x310] sm:$0xff] }
 0x16e   : > { %8437 = vmatprep.subr.mxu0 %v11767_v5  ;;  %8427 = vmatpush3.msra.mxu1 %v11511_v26  ;;  %v12031_v5 = vsub.f32 %v557_v44, %v11964_v12  ;;  %v416_v26 = vrot.slane %v11989_v9, 7  ;;  %v16205_v44 = vand.u32 4294901760, %v11818_v6  ;;  %v12061_v6 = vsub.f32 %v539_v58, %v12014_v56 }
 0x16f   : > { %3273 = vmatprep.mubr.f32.mxu1 %v16190_v13  ;;  %v395_v13 = vcombine.high %v16203_v43, %v16203_v43  ;;  %8438 = vmatpush3.msra.mxu0 %v11783_v34  ;;  %16204 = vst [vmem:[#allocation23_spill] sm:$0xff] %v12039_v28  ;;  %v12049_v34 = vsub.f32 %v540_v59, %v11999_v29  ;;  %16206 = vst [vmem:[#allocation28_spill] sm:$0xff] %v12052_v35  ;;  %v12070_v43 = vand.u32 4294901760, %v538_v45 }
 0x170   : > { %3275 = vmatmul.mubr.f32.vlgmr.msra.gmra.mxu1 %v16193_v18  ;;  %8439 = vmatprep.subr.mxu0 %v11794_v16  ;;  %v12068_v18 = vand.u32 4294901760, %v554_v50  ;;  %v16210_v58 = vand.u32 4294901760, %v11847_v23  ;;  %v16213_v23 = vand.u32 4294901760, %v11976_v40 }
 0x171   : > { %8466 = vmatprep.subr.mxu1 %v16205_v44  ;;  %8440 = vmatpush3.msra.mxu0 %v11820_v8  ;;  %v16208_v44 = vand.u32 4294901760, %v11950_v49  ;;  %16209 = vst [vmem:[#allocation27_spill] sm:$0xff] %v12070_v43  ;;  %v12084_v8 = vsub.f32 %v556_v17, %v12009_v14  ;;  %v433_v16 = vsel %vm429_vm0, %v395_v13, %v416_v26  ;;  %v552_v26 = vld [vmem:[%s15302_s0 + $0x390] sm:$0xff]  ;;  %v16216_v17 = vand.u32 4294901760, %v11903_v20 }
 0x172   : > { %8467 = vmatpush3.msra.mxu1 %v16207_v53  ;;  %8441 = vmatprep.subr.mxu0 %v11837_v10  ;;  %v12093_v10 = vsub.f32 %v11986_v55, %v16212_v3  ;;  %v12100_v53 = vand.u32 4294901760, %v537_v63  ;;  %v12109_v3 = vand.u32 4294901760, %v553_v48  ;;  %v12114_v13 = vsub.f32 %v555_v7, %v12052_v35 }
 0x173   : > { %v12066_v59 = vsub.f32 %v11950_v49, %v16208_v44  ;;  %8468 = vmatprep.subr.mxu1 %v16210_v58  ;;  %8442 = vmatpush3.msra.mxu0 %v11839_v25  ;;  %v16211_v49 = vand.u32 4294901760, %v11872_v54  ;;  %v12098_v58 = vsub.f32 %v11976_v40, %v16213_v23  ;;  %v12111_v54 = vand.u32 4294901760, %v536_v11 }
 0x174   : > { %8443 = vmatprep.subr.mxu0 %v11857_v38  ;;  %v12117_v23 = vand.u32 4294901760, %v11989_v9  ;;  %v12127_v38 = vand.u32 4294901760, %v433_v16  ;;  %v16219_v7 = vand.u32 4294901760, %v11912_v52  ;;  %v16220_v25 = vand.u32 4294901760, %v12031_v5 }
 0x175   : > { %8469 = vmatpush3.msra.mxu1 %v16211_v49  ;;  %v16214_v49 = vand.u32 4294901760, %v11896_v19  ;;  %8444 = vmatpush3.msra.mxu0 %v11898_v4  ;;  %v3439_v44 = vand.u32 4294901760, %v12066_v59  ;;  %v12124_v19 = vsub.f32 %v538_v45, %v12070_v43  ;;  %v12137_v20 = vand.u32 4294901760, %v552_v26  ;;  %v551_v45 = vld [vmem:[%s15302_s0 + $0x388] sm:$0xff] }
 0x176   : > { %16215 = vst [vmem:[#allocation7_spill] sm:$0xff] %v12117_v23  ;;  %16218 = vst [vmem:[#allocation32_spill] sm:$0xff] %v12127_v38  ;;  %8445 = vmatprep.subr.mxu0 %v11920_v30  ;;  %v12135_v4 = vsub.f32 %v12031_v5, %v16220_v25  ;;  %v16222_v52 = vand.u32 4294901760, %v11938_v39  ;;  %v3446_v25 = vand.u32 4294901760, %v12098_v58  ;;  %v16223_v59 = vand.u32 4294901760, %v12039_v28  ;;  %3617 = vmatprep.mubr.f32.mxu1 %v12117_v23 }
 0x177   : > { %8470 = vmatprep.subr.mxu1 %v16214_v49  ;;  %16217 = vst [vmem:[#allocation34_spill] sm:$0xff] %v12124_v19  ;;  %16221 = vst [vmem:[#allocation33_spill] sm:$0xff] %v12137_v20  ;;  %8446 = vmatpush3.msra.mxu0 %v11922_v27  ;;  %v12152_v49 = vsub.f32 %v537_v63, %v12100_v53  ;;  %v16224_v39 = vand.u32 4294901760, %v11955_v36  ;;  %v550_v63 = vld [vmem:[%s15302_s0 + $0x380] sm:$0xff]  ;;  %v12178_v36 = vsub.f32 %v553_v48, %v12109_v3 }
 0x178   : > { %8471 = vmatpush3.msra.mxu1 %v16216_v17  ;;  %v12144_v17 = vsub.f32 %v554_v50, %v12068_v18  ;;  %v3452_v30 = vsub.f32 %v12039_v28, %v16223_v59  ;;  %v535_v50 = vld [vmem:[%s15302_s0 + $0x308] sm:$0xff]  ;;  %8447 = vmatprep.subr.mxu0 %v11964_v12  ;;  %v534_v59 = vld [vmem:[%s15302_s0 + $0x300] sm:$0xff]  ;;  %v12186_v12 = vand.u32 4294901760, %v551_v45  ;;  %v12190_v28 = vsub.f32 %v433_v16, %v12127_v38 }
 0x179   : > { %8472 = vmatprep.subr.mxu1 %v16219_v7  ;;  %v3558_v7 = vand.u32 4294901760, %v12093_v10  ;;  %v12164_v10 = vsub.f32 %v536_v11, %v12111_v54  ;;  %8448 = vmatpush3.msra.mxu0 %v11978_v0  ;;  %v16225_v11 = vand.u32 4294901760, %v11983_v57  ;;  %v16227_v48 = vand.u32 4294901760, %v11997_v2 }
 0x17a   : > { %8473 = vmatpush3.msra.mxu1 %v16222_v52  ;;  %v12175_v52 = vsub.f32 %v11989_v9, %v12117_v23  ;;  %8449 = vmatprep.subr.mxu0 %v12009_v14  ;;  %v3565_v9 = vand.u32 4294901760, %v12135_v4  ;;  %v16228_v57 = vand.u32 4294901760, %v12084_v8  ;;  %v12199_v0 = vand.u32 4294901760, %v535_v50  ;;  %v16263_v23 = vld [vmem:[#allocation17_spill] sm:$0xff] }
 0x17b   : > { %8474 = vmatprep.subr.mxu1 %v16224_v39  ;;  %v16226_v39 = vand.u32 4294901760, %v12049_v34  ;;  %8450 = vmatpush3.msra.mxu0 %v11999_v29  ;;  %v16229_v16 = vand.u32 4294901760, %v12004_v62  ;;  %v12205_v27 = vand.u32 4294901760, %v550_v63  ;;  %v12207_v14 = vand.u32 4294901760, %v534_v59 }
 0x17c   : > { %8475 = vmatpush3.msra.mxu1 %v16225_v11  ;;  %v3571_v11 = vsub.f32 %v12084_v8, %v16228_v57  ;;  %v12211_v4 = vsub.f32 %v552_v26, %v12137_v20  ;;  %8451 = vmatprep.subr.mxu0 %v12052_v35  ;;  %v3453_v57 = vand.u32 4294901760, %v3452_v30  ;;  %v16232_v26 = vand.u32 4294901760, %v12061_v6 }
 0x17d   : > { %v3459_v58 = vsub.f32 %v12049_v34, %v16226_v39  ;;  %8476 = vmatprep.subr.mxu1 %v16227_v48  ;;  %v16230_v48 = vand.u32 4294901760, %v12022_v31  ;;  %v16231_v39 = vand.u32 4294901760, %v12114_v13  ;;  %8452 = vmatpush3.msra.mxu0 %v12014_v56  ;;  %v12227_v30 = vsub.f32 %v551_v45, %v12186_v12 }
 0x17e   : > { %8477 = vmatpush3.msra.mxu1 %v16229_v16  ;;  %v15566_v16 = vand.u32 4294901760, %v12175_v52  ;;  %v3466_v35 = vsub.f32 %v12061_v6, %v16232_v26  ;;  %8453 = vmatprep.subr.mxu0 %v12068_v18  ;;  %v16233_v29 = vand.u32 4294901760, %v12144_v17  ;;  %v12239_v26 = vsub.f32 %v534_v59, %v12207_v14 }
 0x17f   : > { %8478 = vmatprep.subr.mxu1 %v16230_v48  ;;  %v3578_v62 = vsub.f32 %v12114_v13, %v16231_v39  ;;  %v3460_v2 = vand.u32 4294901760, %v3459_v58  ;;  %v3572_v39 = vand.u32 4294901760, %v3571_v11  ;;  %v12231_v48 = vsub.f32 %v535_v50, %v12199_v0  ;;  %8454 = vmatpush3.msra.mxu0 %v12070_v43 }
 0x180   : > { %8479 = vmatpush3.msra.mxu1 %v3439_v44  ;;  %v3585_v44 = vsub.f32 %v12144_v17, %v16233_v29  ;;  %16234 = vst [vmem:[#allocation21_spill] sm:$0xff] %v12239_v26  ;;  %v16235_v45 = vand.u32 4294901760, %v12124_v19  ;;  %v12246_v50 = vsub.f32 %v550_v63, %v12205_v27  ;;  %8455 = vmatprep.subr.mxu0 %v12109_v3  ;;  %v16237_v59 = vand.u32 4294901760, %v12178_v36 }
 0x181   : > { %8480 = vmatprep.subr.mxu1 %v3558_v7  ;;  %v3579_v29 = vand.u32 4294901760, %v3578_v62  ;;  %8456 = vmatpush3.msra.mxu0 %v12100_v53  ;;  %v16238_v63 = vand.u32 4294901760, %v12190_v28  ;;  %v15569_v31 = vand.u32 4294901760, %v12239_v26 }
 0x182   : > { %8481 = vmatpush3.msra.mxu1 %v3446_v25  ;;  %v3473_v7 = vsub.f32 %v12124_v19, %v16235_v45  ;;  %16236 = vst [vmem:[#allocation31_spill] sm:$0xff] %v12246_v50  ;;  %v3379_v25 = vsub.f32 %v12175_v52, %v15566_v16  ;;  %v3592_v58 = vsub.f32 %v12178_v36, %v16237_v59  ;;  %v3467_v45 = vand.u32 4294901760, %v3466_v35 }
 0x183   : > { %8482 = vmatprep.subr.mxu1 %v3565_v9  ;;  %v3385_v11 = vsub.f32 %v12190_v28, %v16238_v63  ;;  %8457 = vmatprep.subr.mxu0 %v12137_v20  ;;  %v3586_v62 = vand.u32 4294901760, %v3585_v44  ;;  %v16239_v16 = vand.u32 4294901760, %v12152_v49  ;;  %v15570_v9 = vand.u32 4294901760, %v12246_v50 }
 0x184   : > { %8483 = vmatpush3.msra.mxu1 %v3453_v57  ;;  %8458 = vmatpush3.msra.mxu0 %v12111_v54  ;;  %v3474_v35 = vand.u32 4294901760, %v3473_v7  ;;  %v16240_v57 = vand.u32 4294901760, %v12211_v4  ;;  %v3593_v44 = vand.u32 4294901760, %v3592_v58  ;;  %v16241_v20 = vand.u32 4294901760, %v12164_v10 }
 0x185   : > { %8484 = vmatprep.subr.mxu1 %v3572_v39  ;;  %v3480_v59 = vsub.f32 %v12152_v49, %v16239_v16  ;;  %8459 = vmatprep.subr.mxu0 %v12186_v12  ;;  %v3380_v39 = vand.u32 4294901760, %v3379_v25  ;;  %v16242_v7 = vand.u32 4294901760, %v12227_v30  ;;  %v16243_v58 = vand.u32 4294901760, %v12231_v48 }
 0x186   : > { %8485 = vmatpush3.msra.mxu1 %v3460_v2  ;;  %v3599_v63 = vsub.f32 %v12211_v4, %v16240_v57  ;;  %v3487_v16 = vsub.f32 %v12164_v10, %v16241_v20  ;;  %8460 = vmatpush3.msra.mxu0 %v12199_v0  ;;  %v3386_v2 = vand.u32 4294901760, %v3385_v11  ;;  %v3613_v11 = vsub.f32 %v12246_v50, %v15570_v9  ;;  %v16261_v9 = vld [vmem:[#allocation15_spill] sm:$0xff] }
 0x187   : > { %8486 = vmatprep.subr.mxu1 %v3579_v29  ;;  %v3606_v57 = vsub.f32 %v12227_v30, %v16242_v7  ;;  %8461 = vmatprep.subr.mxu0 %v12205_v27  ;;  %v3481_v29 = vand.u32 4294901760, %v3480_v59  ;;  %v3494_v25 = vsub.f32 %v12231_v48, %v16243_v58  ;;  %v16247_v7 = vld [vmem:[#allocation20_spill] sm:$0xff] }
 0x188   : > { %8487 = vmatpush3.msra.mxu1 %v3467_v45  ;;  %8462 = vmatpush3.msra.mxu0 %v12207_v14  ;;  %v3600_v20 = vand.u32 4294901760, %v3599_v63  ;;  %v3488_v45 = vand.u32 4294901760, %v3487_v16  ;;  %v3614_v63 = vand.u32 4294901760, %v3613_v11  ;;  %v16245_v16 = vld [vmem:[#allocation18_spill] sm:$0xff]  ;;  %v16250_v58 = vld [vmem:[#allocation8_spill] sm:$0xff]  ;;  %v16253_v11 = vld [vmem:[#allocation9_spill] sm:$0xff] }
 0x189   : > { %8488 = vmatprep.subr.mxu1 %v3586_v62  ;;  %3381 = vmatprep.mubr.f32.mxu0 %v3380_v39  ;;  %v3501_v62 = vsub.f32 %v12239_v26, %v15569_v31  ;;  %v3607_v59 = vand.u32 4294901760, %v3606_v57  ;;  %v16248_v57 = vld [vmem:[#allocation5_spill] sm:$0xff] }
 0x18a   : > { %8489 = vmatpush3.msra.mxu1 %v3474_v35  ;;  %8501 = vmatprep.subr.mxu0 %v11746_v22  ;;  %v3495_v35 = vand.u32 4294901760, %v3494_v25  ;;  %v16251_v25 = vld [vmem:[#allocation19_spill] sm:$0xff]  ;;  %v16260_v31 = vld [vmem:[#allocation13_spill] sm:$0xff] }
 0x18b   : > { %8490 = vmatprep.subr.mxu1 %v3593_v44  ;;  %3387 = vmatmul.mubr.f32.vlgmr.msra.gmra.mxu0 %v3386_v2  ;;  %v3502_v39 = vand.u32 4294901760, %v3501_v62  ;;  %v16244_v44 = vld [vmem:[#allocation14_spill] sm:$0xff]  ;;  %v16246_v2 = vld [vmem:[#allocation24_spill] sm:$0xff] }
 0x18c   : > { %8491 = vmatpush3.msra.mxu1 %v3481_v29  ;;  %8502 = vmatpush3.msra.mxu0 %v11738_v42  ;;  %v16249_v29 = vld [vmem:[#allocation29_spill] sm:$0xff]  ;;  %v16255_v62 = vld [vmem:[#allocation12_spill] sm:$0xff] }
 0x18d   : > { %8492 = vmatprep.subr.mxu1 %v3600_v20  ;;  %8503 = vmatprep.subr.mxu0 %v11762_v60  ;;  %v16252_v20 = vld [vmem:[#allocation23_spill] sm:$0xff] }
 0x18e   : > { %8493 = vmatpush3.msra.mxu1 %v3488_v45  ;;  %8504 = vmatpush3.msra.mxu0 %v11776_v61  ;;  %v16254_v45 = vld [vmem:[#allocation22_spill] sm:$0xff] }
 0x18f   : > { %8494 = vmatprep.subr.mxu1 %v3607_v59  ;;  %8505 = vmatprep.subr.mxu0 %v11804_v41  ;;  %v16256_v59 = vld [vmem:[#allocation6_spill] sm:$0xff] }
 0x190   : > { %8495 = vmatpush3.msra.mxu1 %v3495_v35  ;;  %8506 = vmatpush3.msra.mxu0 %v11792_v51  ;;  %v16257_v35 = vld [vmem:[#allocation4_spill] sm:$0xff] }
 0x191   : > { %8496 = vmatprep.subr.mxu1 %v3614_v63  ;;  %8507 = vmatprep.subr.mxu0 %v11810_v15  ;;  %v16258_v63 = vld [vmem:[#allocation16_spill] sm:$0xff] }
 0x192   : > { %8497 = vmatpush3.msra.mxu1 %v3502_v39  ;;  %8508 = vmatpush3.msra.mxu0 %v11835_v33  ;;  %v16259_v39 = vld [vmem:[#allocation10_spill] sm:$0xff] }
 0x193   : > { %3619 = vmatmul.mubr.f32.vlgmr.msra.gmra.mxu1 %v12127_v38  ;;  %8509 = vmatprep.subr.mxu0 %v11852_v47  ;;  %v16262_v38 = vld [vmem:[#allocation11_spill] sm:$0xff] }
 0x194   : > { %8536 = vmatprep.subr.mxu1 %v11710_v24  ;;  %8510 = vmatpush3.msra.mxu0 %v11867_v1 }
 0x195   : > { %8537 = vmatpush3.msra.mxu1 %v11712_v46  ;;  %8511 = vmatprep.subr.mxu0 %v11888_v32 }
 0x196   : > { %8538 = vmatprep.subr.mxu1 %v11723_v37  ;;  %8512 = vmatpush3.msra.mxu0 %v11878_v21 }
 0x197   : > { %8539 = vmatpush3.msra.mxu1 %v16244_v44  ;;  %8513 = vmatprep.subr.mxu0 %v16245_v16 }
 0x198   : > { %8540 = vmatprep.subr.mxu1 %v16246_v2  ;;  %8514 = vmatpush3.msra.mxu0 %v16247_v7 }
 0x199   : > { %8541 = vmatpush3.msra.mxu1 %v16248_v57  ;;  %8515 = vmatprep.subr.mxu0 %v11986_v55 }
 0x19a   : > { %8542 = vmatprep.subr.mxu1 %v16249_v29  ;;  %8516 = vmatpush3.msra.mxu0 %v11976_v40 }
 0x19b   : > { %8543 = vmatpush3.msra.mxu1 %v16250_v58  ;;  %8517 = vmatprep.subr.mxu0 %v12031_v5 }
 0x19c   : > { %8544 = vmatprep.subr.mxu1 %v16251_v25  ;;  %8518 = vmatpush3.msra.mxu0 %v16252_v20 }
 0x19d   : > { %8545 = vmatpush3.msra.mxu1 %v16253_v11  ;;  %8519 = vmatprep.subr.mxu0 %v12084_v8 }
 0x19e   : > { %8546 = vmatprep.subr.mxu1 %v16254_v45  ;;  %8520 = vmatpush3.msra.mxu0 %v12049_v34 }
 0x19f   : > { %8547 = vmatpush3.msra.mxu1 %v16255_v62  ;;  %8521 = vmatprep.subr.mxu0 %v12114_v13 }
 0x1a0   : > { %8548 = vmatprep.subr.mxu1 %v16256_v59  ;;  %8522 = vmatpush3.msra.mxu0 %v12061_v6 }
 0x1a1   : > { %8549 = vmatpush3.msra.mxu1 %v16257_v35  ;;  %8523 = vmatprep.subr.mxu0 %v12144_v17 }
 0x1a2   : > { %8550 = vmatprep.subr.mxu1 %v16258_v63  ;;  %8524 = vmatpush3.msra.mxu0 %v12124_v19  ;;  %v16264_v19 = vld [vmem:[#allocation28_spill] sm:$0xff] }
 0x1a3   : > { %8551 = vmatpush3.msra.mxu1 %v16259_v39  ;;  %8525 = vmatprep.subr.mxu0 %v12178_v36 }
 0x1a4   : > { %8552 = vmatprep.subr.mxu1 %v16260_v31  ;;  %8526 = vmatpush3.msra.mxu0 %v12152_v49 }
 0x1a5   : > { %8553 = vmatpush3.msra.mxu1 %v16261_v9  ;;  %8527 = vmatprep.subr.mxu0 %v12211_v4 }
 0x1a6   : > { %8554 = vmatprep.subr.mxu1 %v16262_v38  ;;  %8528 = vmatpush3.msra.mxu0 %v12164_v10 }
 0x1a7   : > { %8555 = vmatpush3.msra.mxu1 %v16263_v23  ;;  %8529 = vmatprep.subr.mxu0 %v12227_v30 }
 0x1a8   : > { %8556 = vmatprep.subr.mxu1 %v16264_v19  ;;  %8530 = vmatpush3.msra.mxu0 %v12231_v48  ;;  %v16265_v19 = vand.u32 4294901760, %v11746_v22  ;;  %v16270_v22 = vand.u32 4294901760, %v11804_v41  ;;  %v16275_v41 = vand.u32 4294901760, %v12190_v28 }
 0x1a9   : > { %8557 = vmatpush3.msra.mxu1 %v12014_v56  ;;  %8531 = vmatprep.subr.mxu0 %v12246_v50  ;;  %v16266_v56 = vand.u32 4294901760, %v11738_v42  ;;  %v16267_v50 = vld [vmem:[#allocation33_spill] sm:$0xff]  ;;  %v16271_v42 = vand.u32 4294901760, %v11792_v51  ;;  %v597_v51 = vld [vmem:[%s15302_s0 + $0x4f8] sm:$0xff] }
 0x1aa   : > { %8558 = vmatprep.subr.mxu1 %v12068_v18  ;;  %8532 = vmatpush3.msra.mxu0 %v12239_v26  ;;  %v16268_v26 = vand.u32 4294901760, %v11762_v60  ;;  %v16272_v60 = vand.u32 4294901760, %v11810_v15  ;;  %v12385_v15 = vpop.f32.mrf.mxu0 }
 0x1ab   : > { %3754 = vmatprep.mubr.f32.mxu0 %v12175_v52  ;;  %8559 = vmatpush3.msra.mxu1 %v12070_v43  ;;  %v16269_v43 = vand.u32 4294901760, %v11776_v61  ;;  %v16273_v61 = vand.u32 4294901760, %v12175_v52 }
 0x1ac   : > { %3757 = vmatmul.mubr.f32.vlgmr.msra.gmra.mxu0 %v12190_v28  ;;  %8560 = vmatprep.subr.mxu1 %v12109_v3  ;;  %v581_v28 = vld [vmem:[%s15302_s0 + $0x478] sm:$0xff]  ;;  %v8044_v52 = vpop.f32.mrf.mxu0 }
 0x1ad   : > { %8571 = vmatprep.subr.mxu0 %v16265_v19  ;;  %8561 = vmatpush3.msra.mxu1 %v12100_v53  ;;  %v16277_v19 = vand.u32 4294901760, %v11867_v1  ;;  %v16280_v1 = vand.u32 4294901760, %v16245_v16  ;;  %v595_v16 = vld [vmem:[%s15302_s0 + $0x4e8] sm:$0xff] }
 0x1ae   : > { %8572 = vmatpush3.msra.mxu0 %v16266_v56  ;;  %8562 = vmatprep.subr.mxu1 %v16267_v50  ;;  %v16274_v56 = vand.u32 4294901760, %v11835_v33  ;;  %v16278_v33 = vand.u32 4294901760, %v11888_v32  ;;  %v16281_v32 = vand.u32 4294901760, %v16247_v7  ;;  %v16283_v7 = vand.u32 4294901760, %v11976_v40  ;;  %v579_v40 = vld [vmem:[%s15302_s0 + $0x468] sm:$0xff] }
 0x1af   : > { %8573 = vmatprep.subr.mxu0 %v16268_v26  ;;  %8563 = vmatpush3.msra.mxu1 %v12111_v54  ;;  %v8078_v26 = vpop.f32.mrf.mxu1 }
 0x1b0   : > { %8574 = vmatpush3.msra.mxu0 %v16269_v43  ;;  %8564 = vmatprep.subr.mxu1 %v12186_v12  ;;  %v16276_v43 = vand.u32 4294901760, %v11852_v47  ;;  %v12399_v47 = vand.u32 4294901760, %v597_v51 }
 0x1b1   : > { %8575 = vmatprep.subr.mxu0 %v16270_v22  ;;  %8565 = vmatpush3.msra.mxu1 %v12199_v0 }
 0x1b2   : > { %8576 = vmatpush3.msra.mxu0 %v16271_v42  ;;  %8566 = vmatprep.subr.mxu1 %v12205_v27  ;;  %v8079_v42 = vpop.f32.mrf.mxu1 }
 0x1b3   : > { %8577 = vmatprep.subr.mxu0 %v16272_v60  ;;  %8567 = vmatpush3.msra.mxu1 %v12207_v14  ;;  %v16285_v60 = vand.u32 4294901760, %v16252_v20  ;;  %v16289_v20 = vand.u32 4294901760, %v12049_v34  ;;  %v593_v34 = vld [vmem:[%s15302_s0 + $0x4d8] sm:$0xff] }
 0x1b4   : > { %3861 = vmatprep.mubr.f32.mxu1 %v16273_v61  ;;  %8578 = vmatpush3.msra.mxu0 %v16274_v56  ;;  %v16288_v61 = vand.u32 4294901760, %v12084_v8  ;;  %v578_v56 = vld [vmem:[%s15302_s0 + $0x460] sm:$0xff] }
 0x1b5   : > { %3865 = vmatmul.mubr.f32.vlgmr.msra.gmra.mxu1 %v16275_v41  ;;  %8579 = vmatprep.subr.mxu0 %v16276_v43  ;;  %v8148_v43 = vpop.f32.mrf.mxu1 }
 0x1b6   : > { %8606 = vmatprep.subr.mxu1 %v11710_v24  ;;  %8580 = vmatpush3.msra.mxu0 %v16277_v19  ;;  %v16279_v24 = vand.u32 4294901760, %v11878_v21  ;;  %v16282_v21 = vand.u32 4294901760, %v11986_v55  ;;  %v16284_v55 = vand.u32 4294901760, %v12031_v5 }
 0x1b7   : > { %8607 = vmatpush3.msra.mxu1 %v11712_v46  ;;  %8581 = vmatprep.subr.mxu0 %v16278_v33  ;;  %v12404_v46 = vand.u32 4294901760, %v581_v28 }
 0x1b8   : > { %8608 = vmatprep.subr.mxu1 %v11723_v37  ;;  %8582 = vmatpush3.msra.mxu0 %v16279_v24  ;;  %v596_v37 = vld [vmem:[%s15302_s0 + $0x4f0] sm:$0xff]  ;;  %v12478_v24 = vand.u32 4294901760, %v578_v56 }
 0x1b9   : > { %8609 = vmatpush3.msra.mxu1 %v16244_v44  ;;  %8583 = vmatprep.subr.mxu0 %v16280_v1  ;;  %v580_v44 = vld [vmem:[%s15302_s0 + $0x470] sm:$0xff]  ;;  %v12433_v22 = vand.u32 4294901760, %v596_v37  ;;  %v12485_v1 = vld [vmem:[%s10140_s28] sm:%s10127_s25] }
 0x1ba   : > { %8610 = vmatprep.subr.mxu1 %v16246_v2  ;;  %8584 = vmatpush3.msra.mxu0 %v16281_v32  ;;  %v8113_v2 = vpop.f32.mrf.mxu0  ;;  %v12444_v5 = vand.u32 4294901760, %v580_v44  ;;  %16294 = vst [vmem:[#allocation20_spill] sm:$0xff] %v12478_v24  ;;  %v348_v32 = vcombine.high %v12485_v1, %v12485_v1  ;;  %v12697_v1 = vld [vmem:[%s10090_s23 + $0x20] sm:$0xff] }
 0x1bb   : > { %8611 = vmatpush3.msra.mxu1 %v16248_v57  ;;  %8585 = vmatprep.subr.mxu0 %v16282_v21  ;;  %v12425_v57 = vsub.f32 %v597_v51, %v12399_v47  ;;  %v8149_v21 = vpop.f32.mrf.mxu1 }
 0x1bc   : > { %8612 = vmatprep.subr.mxu1 %v16249_v29  ;;  %8586 = vmatpush3.msra.mxu0 %v16283_v7  ;;  %v12431_v29 = vsub.f32 %v581_v28, %v12404_v46  ;;  %16286 = vst [vmem:[#allocation30_spill] sm:$0xff] %v12444_v5  ;;  %v8114_v41 = vpop.f32.mrf.mxu0  ;;  %v12470_v28 = vsub.f32 %v596_v37, %v12433_v22 }
 0x1bd   : > { %8613 = vmatpush3.msra.mxu1 %v16250_v58  ;;  %8587 = vmatprep.subr.mxu0 %v16284_v55  ;;  %v594_v58 = vld [vmem:[%s15302_s0 + $0x4e0] sm:$0xff]  ;;  %v15584_v8 = vand.u32 4294901760, %v12425_v57  ;;  %v8080_v37 = vadd.f32 %v8079_v42, %v8078_v26  ;;  %v12501_v55 = vand.u32 4294901760, %v593_v34  ;;  %v576_v26 = vld [vmem:[%s15302_s0 + $0x450] sm:$0xff]  ;;  %v8115_v42 = vadd.f32 %v8114_v41, %v8113_v2 }
 0x1be   : > { %8614 = vmatprep.subr.mxu1 %v16251_v25  ;;  %8588 = vmatpush3.msra.mxu0 %v16285_v60  ;;  %v12446_v25 = vand.u32 4294901760, %v595_v16  ;;  %v12459_v51 = vand.u32 4294901760, %v594_v58  ;;  %v15583_v19 = vand.u32 4294901760, %v12431_v29  ;;  %v16299_v60 = vand.u32 4294901760, %v12178_v36 }
 0x1bf   : > { %8615 = vmatpush3.msra.mxu1 %v16253_v11  ;;  %8589 = vmatprep.subr.mxu0 %v16288_v61  ;;  %v12457_v11 = vand.u32 4294901760, %v579_v40  ;;  %16298 = vst [vmem:[#allocation5_spill] sm:$0xff] %v12501_v55 }
 0x1c0   : > { %16287 = vst [vmem:[#allocation14_spill] sm:$0xff] %v12446_v25  ;;  %8616 = vmatprep.subr.mxu1 %v16254_v45  ;;  %8590 = vmatpush3.msra.mxu0 %v16289_v20  ;;  %16291 = vst [vmem:[#allocation24_spill] sm:$0xff] %v12459_v51  ;;  %v16292_v45 = vand.u32 4294901760, %v12114_v13  ;;  %v8183_v33 = vpop.f32.mrf.mxu0  ;;  %v12476_v13 = vsub.f32 %v580_v44, %v12444_v5  ;;  %v16296_v44 = vld [vmem:[#allocation34_spill] sm:$0xff]  ;;  %v12524_v61 = vsub.f32 %v12431_v29, %v15583_v19 }
 0x1c1   : > { %8617 = vmatpush3.msra.mxu1 %v16255_v62  ;;  %16290 = vst [vmem:[#allocation18_spill] sm:$0xff] %v12457_v11  ;;  %v16293_v62 = vand.u32 4294901760, %v12061_v6  ;;  %v16295_v6 = vand.u32 4294901760, %v12144_v17  ;;  %v16297_v7 = vand.u32 4294901760, %v16296_v44  ;;  %v12506_v17 = vsub.f32 %v12425_v57, %v15584_v8  ;;  %v16323_v19 = vld [vmem:[#allocation26_spill] sm:$0xff] }
 0x1c2   : > { %8591 = vmatprep.subr.mxu0 %v16292_v45  ;;  %8618 = vmatprep.subr.mxu1 %v16256_v59  ;;  %v12481_v59 = vsub.f32 %v595_v16, %v12446_v25  ;;  %v12499_v16 = vsub.f32 %v579_v40, %v12457_v11  ;;  %v8045_v40 = vadd.f32 %v8044_v52, %v12385_v15  ;;  %v15582_v20 = vand.u32 4294901760, %v12470_v28  ;;  %v591_v52 = vld [vmem:[%s15302_s0 + $0x4c8] sm:$0xff] }
 0x1c3   : > { %8592 = vmatpush3.msra.mxu0 %v16293_v62  ;;  %8619 = vmatpush3.msra.mxu1 %v16257_v35  ;;  %v577_v35 = vld [vmem:[%s15302_s0 + $0x458] sm:$0xff]  ;;  %v16300_v45 = vand.u32 4294901760, %v12152_v49  ;;  %v12531_v15 = vsub.f32 %v578_v56, %v12478_v24  ;;  %v8150_v62 = vadd.f32 %v8149_v21, %v8148_v43  ;;  %v16302_v49 = vand.u32 4294901760, %v12211_v4  ;;  %v16307_v21 = vld [vmem:[#allocation28_spill] sm:$0xff] }
 0x1c4   : > { %8593 = vmatprep.subr.mxu0 %v16295_v6  ;;  %8620 = vmatprep.subr.mxu1 %v16258_v63  ;;  %v592_v63 = vld [vmem:[%s15302_s0 + $0x4d0] sm:$0xff]  ;;  %v12533_v36 = vand.u32 4294901760, %v577_v35  ;;  %v15580_v2 = vand.u32 4294901760, %v12481_v59  ;;  %v1897_v41 = vadd.f32 %v8080_v37, %v8045_v40  ;;  %v12545_v56 = vand.u32 4294901760, %v576_v26 }
 0x1c5   : > { %8594 = vmatpush3.msra.mxu0 %v16297_v7  ;;  %8621 = vmatpush3.msra.mxu1 %v16259_v39  ;;  %v12515_v39 = vsub.f32 %v594_v58, %v12459_v51  ;;  %v8184_v58 = vpop.f32.mrf.mxu0  ;;  %v16305_v6 = vand.u32 4294901760, %v12164_v10  ;;  %v15586_v7 = vand.u32 4294901760, %v12499_v16  ;;  %v12554_v4 = vsub.f32 %v593_v34, %v12501_v55 }
 0x1c6   : > { %8595 = vmatprep.subr.mxu0 %v16299_v60  ;;  %8622 = vmatprep.subr.mxu1 %v16260_v31  ;;  %16301 = vst [vmem:[#allocation29_spill] sm:$0xff] %v12533_v36  ;;  %v15581_v31 = vand.u32 4294901760, %v12476_v13  ;;  %16304 = vst [vmem:[#allocation19_spill] sm:$0xff] %v12545_v56  ;;  %v2035_v37 = vadd.f32 %v8115_v42, %v1897_v41  ;;  %v8185_v40 = vadd.f32 %v8184_v58, %v8183_v33  ;;  %v575_v60 = vld [vmem:[%s15302_s0 + $0x448] sm:$0xff] }
 0x1c7   : > { %8596 = vmatpush3.msra.mxu0 %v16300_v45  ;;  %8623 = vmatpush3.msra.mxu1 %v16261_v9  ;;  %v12543_v9 = vand.u32 4294901760, %v592_v63  ;;  %v15585_v43 = vand.u32 4294901760, %v12515_v39  ;;  %v12564_v10 = vand.u32 4294901760, %v591_v52  ;;  %v16309_v34 = vand.u32 4294901760, %v12231_v48  ;;  %v16310_v42 = vld [vmem:[#allocation25_spill] sm:$0xff] }
 0x1c8   : > { %8597 = vmatprep.subr.mxu0 %v16302_v49  ;;  %8624 = vmatprep.subr.mxu1 %v16262_v38  ;;  %v16306_v38 = vand.u32 4294901760, %v12227_v30  ;;  %v8218_v30 = vpop.f32.mrf.mxu1  ;;  %v12573_v45 = vsub.f32 %v577_v35, %v12533_v36  ;;  %v12579_v58 = vsub.f32 %v12476_v13, %v15581_v31  ;;  %v12584_v41 = vsub.f32 %v12481_v59, %v15580_v2  ;;  %v16311_v49 = vld [vmem:[#allocation31_spill] sm:$0xff] }
 0x1c9   : > { %16303 = vst [vmem:[#allocation8_spill] sm:$0xff] %v12543_v9  ;;  %8598 = vmatpush3.msra.mxu0 %v16305_v6  ;;  %8625 = vmatpush3.msra.mxu1 %v16263_v23  ;;  %v12562_v23 = vsub.f32 %v12470_v28, %v15582_v20  ;;  %16308 = vst [vmem:[#allocation23_spill] sm:$0xff] %v12564_v10  ;;  %v2143_v48 = vadd.f32 %v8150_v62, %v2035_v37  ;;  %v16312_v6 = vand.u32 4294901760, %v16311_v49  ;;  %v16313_v37 = vld [vmem:[#allocation21_spill] sm:$0xff]  ;;  %v16317_v31 = vld [vmem:[#allocation27_spill] sm:$0xff] }
 0x1ca   : > { %8599 = vmatprep.subr.mxu0 %v16306_v38  ;;  %8626 = vmatprep.subr.mxu1 %v16307_v21  ;;  %v12590_v35 = vsub.f32 %v576_v26, %v12545_v56  ;;  %v590_v38 = vld [vmem:[%s15302_s0 + $0x4c0] sm:$0xff]  ;;  %v12600_v62 = vsub.f32 %v592_v63, %v12543_v9  ;;  %v8219_v26 = vpop.f32.mrf.mxu1  ;;  %v12605_v49 = vand.u32 4294901760, %v575_v60  ;;  %v12615_v2 = vsub.f32 %v12515_v39, %v15585_v43  ;;  %v572_v43 = vld [vmem:[%s15302_s0 + $0x430] sm:$0xff] }
 0x1cb   : > { %8600 = vmatpush3.msra.mxu0 %v16309_v34  ;;  %8627 = vmatpush3.msra.mxu1 %v16310_v42  ;;  %v574_v21 = vld [vmem:[%s15302_s0 + $0x440] sm:$0xff]  ;;  %v15587_v34 = vand.u32 4294901760, %v12531_v15  ;;  %v16314_v42 = vand.u32 4294901760, %v16313_v37  ;;  %v15588_v63 = vand.u32 4294901760, %v12554_v4  ;;  %v8220_v20 = vadd.f32 %v8219_v26, %v8218_v30  ;;  %v573_v30 = vld [vmem:[%s15302_s0 + $0x438] sm:$0xff] }
 0x1cc   : > { %8601 = vmatprep.subr.mxu0 %v16312_v6  ;;  %8628 = vmatprep.subr.mxu1 %v12068_v18  ;;  %v16315_v18 = vld [vmem:[#allocation7_spill] sm:$0xff]  ;;  %16316 = vst [vmem:[#allocation9_spill] sm:$0xff] %v12605_v49  ;;  %v12610_v6 = vsub.f32 %v12499_v16, %v15586_v7  ;;  %v16318_v37 = vld [vmem:[#allocation32_spill] sm:$0xff]  ;;  %v12622_v8 = vsub.f32 %v591_v52, %v12564_v10  ;;  %v12627_v7 = vand.u32 4294901760, %v590_v38  ;;  %v12629_v33 = vand.u32 4294901760, %v574_v21 }
 0x1cd   : > { %8602 = vmatpush3.msra.mxu0 %v16314_v42  ;;  %4031 = vmatprep.mubr.f32.mxu0 %v16315_v18  ;;  %v2311_v42 = vadd.f32 %v8185_v40, %v2143_v48  ;;  %v15589_v40 = vand.u32 4294901760, %v12573_v45  ;;  %v12640_v52 = vsub.f32 %v12531_v15, %v15587_v34  ;;  %v15590_v48 = vand.u32 4294901760, %v12600_v62 }
 0x1ce   : > { %8629 = vmatpush3.msra.mxu1 %v16317_v31  ;;  %4033 = vmatmul.mubr.f32.vlgmr.msra.gmra.mxu0 %v16318_v37  ;;  %16319 = vst [vmem:[#allocation22_spill] sm:$0xff] %v12622_v8  ;;  %16320 = vst [vmem:[#allocation12_spill] sm:$0xff] %v12627_v7  ;;  %v589_v31 = vld [vmem:[%s15302_s0 + $0x4b8] sm:$0xff]  ;;  %v15593_v26 = vand.u32 4294901760, %v12590_v35  ;;  %v12657_v34 = vsub.f32 %v12554_v4, %v15588_v63  ;;  %v12694_v63 = vsub.f32 %v590_v38, %v12627_v7 }
 0x1cf   : > { %8630 = vmatprep.subr.mxu1 %v12109_v3  ;;  %8641 = vmatprep.subr.mxu0 %v12399_v47  ;;  %16321 = vst [vmem:[#allocation6_spill] sm:$0xff] %v12629_v33  ;;  %v2415_v3 = vadd.f32 %v8220_v20, %v2311_v42  ;;  %v12651_v20 = vsub.f32 %v575_v60, %v12605_v49  ;;  %v12666_v60 = vand.u32 4294901760, %v589_v31  ;;  %v588_v42 = vld [vmem:[%s15302_s0 + $0x4b0] sm:$0xff] }
 0x1d0   : > { %8631 = vmatpush3.msra.mxu1 %v12100_v53  ;;  %8642 = vmatpush3.msra.mxu0 %v12404_v46  ;;  %v571_v53 = vld [vmem:[%s15302_s0 + $0x428] sm:$0xff]  ;;  %v12691_v44 = vsub.f32 %v12573_v45, %v15589_v40  ;;  %v12712_v38 = vsub.f32 %v12590_v35, %v15593_v26  ;;  %v12717_v40 = vand.u32 4294901760, %v588_v42 }
 0x1d1   : > { %8632 = vmatprep.subr.mxu1 %v16267_v50  ;;  %8643 = vmatprep.subr.mxu0 %v12433_v22  ;;  %7591 = vst [vmem:[%s11931_s24 + $0x8] sm:$0xff] %v2415_v3  ;;  %16322 = vst [vmem:[#allocation4_spill] sm:$0xff] %v12666_v60  ;;  %v12684_v3 = vsub.f32 %v574_v21, %v12629_v33  ;;  %v12686_v50 = vand.u32 4294901760, %v573_v30  ;;  %v12707_v21 = vand.u32 4294901760, %v572_v43 }
 0x1d2   : > { %8633 = vmatpush3.msra.mxu1 %v12111_v54  ;;  %8644 = vmatpush3.msra.mxu0 %v12444_v5  ;;  %v12679_v54 = vrot.slane %v348_v32, %v16323_v19  ;;  %v12705_v32 = vsub.f32 %v12600_v62, %v15590_v48  ;;  %16328 = vst [vmem:[#allocation11_spill] sm:$0xff] %v12717_v40  ;;  %v587_v48 = vld [vmem:[%s15302_s0 + $0x4a8] sm:$0xff]  ;;  %v16333_v5 = vand.u32 4294901760, %v12506_v17 }
 0x1d3   : > { %8634 = vmatprep.subr.mxu1 %v12186_v12  ;;  %8645 = vmatprep.subr.mxu0 %v12446_v25  ;;  %16325 = vst [vmem:[#allocation10_spill] sm:$0xff] %v12684_v3  ;;  %16326 = vst [vmem:[#allocation13_spill] sm:$0xff] %v12686_v50  ;;  %v12722_v12 = vand.u32 4294901760, %v571_v53  ;;  %v12739_v25 = vsub.f32 %v589_v31, %v12666_v60  ;;  %v16335_v31 = vand.u32 4294901760, %v12524_v61  ;;  %v568_v61 = vld [vmem:[%s15302_s0 + $0x410] sm:$0xff] }
 0x1d4   : > { %16324 = vst [vmem:[#allocation16_spill] sm:$0xff] %v12679_v54  ;;  %8635 = vmatpush3.msra.mxu1 %v12199_v0  ;;  %8646 = vmatpush3.msra.mxu0 %v12457_v11  ;;  %16327 = vst [vmem:[#allocation15_spill] sm:$0xff] %v12707_v21  ;;  %v586_v0 = vld [vmem:[%s15302_s0 + $0x4a0] sm:$0xff]  ;;  %v569_v11 = vld [vmem:[%s15302_s0 + $0x418] sm:$0xff] }
 0x1d5   : > { %8636 = vmatprep.subr.mxu1 %v12205_v27  ;;  %8647 = vmatprep.subr.mxu0 %v12459_v51  ;;  %16329 = vst [vmem:[#allocation17_spill] sm:$0xff] %v12722_v12  ;;  %v16330_v27 = vand.u32 4294901760, %v12622_v8  ;;  %v570_v51 = vld [vmem:[%s15302_s0 + $0x420] sm:$0xff] }
 0x1d6   : > { %8637 = vmatpush3.msra.mxu1 %v12207_v14  ;;  %4135 = vmatprep.mubr.f32.mxu1 %v16315_v18  ;;  %v417_v14 = vrot.slane %v12697_v1, 7  ;;  %v12744_v18 = vrot.slane %v12679_v54, %v16323_v19  ;;  %v12759_v54 = vsub.f32 %v572_v43, %v12707_v21  ;;  %v12775_v43 = vand.u32 4294901760, %v586_v0 }
 0x1d7   : > { %v12730_v26 = vsub.f32 %v12622_v8, %v16330_v27  ;;  %8648 = vmatpush3.msra.mxu0 %v12478_v24  ;;  %4137 = vmatmul.mubr.f32.vlgmr.msra.gmra.mxu1 %v16318_v37  ;;  %v12749_v27 = vsub.f32 %v573_v30, %v12686_v50  ;;  %v12762_v30 = vand.u32 4294901760, %v587_v48  ;;  %v12777_v19 = vand.u32 4294901760, %v570_v51  ;;  %v585_v37 = vld [vmem:[%s15302_s0 + $0x498] sm:$0xff] }
 0x1d8   : > { %16331 = vst [vmem:[#allocation33_spill] sm:$0xff] %v12744_v18  ;;  %8649 = vmatprep.subr.mxu0 %v12501_v55  ;;  %8676 = vmatprep.subr.mxu1 %v16333_v5  ;;  %v16336_v5 = vand.u32 4294901760, %v12651_v20  ;;  %v12783_v8 = vsub.f32 %v588_v42, %v12717_v40  ;;  %v434_v42 = vsel %vm429_vm0, %v12744_v18, %v417_v14  ;;  %v16339_v24 = vand.u32 4294901760, %v12579_v58  ;;  %v584_v14 = vld [vmem:[%s15302_s0 + $0x490] sm:$0xff] }
 0x1d9   : > { %16332 = vst [vmem:[#allocation34_spill] sm:$0xff] %v12749_v27  ;;  %16334 = vst [vmem:[#allocation28_spill] sm:$0xff] %v12762_v30  ;;  %8650 = vmatpush3.msra.mxu0 %v12533_v36  ;;  %8677 = vmatpush3.msra.mxu1 %v16335_v31  ;;  %v16338_v31 = vand.u32 4294901760, %v12562_v23  ;;  %v12793_v36 = vsub.f32 %v571_v53, %v12722_v12  ;;  %v12822_v58 = vand.u32 4294901760, %v568_v61  ;;  %v12828_v18 = vand.u32 4294901760, %v12697_v1 }
 0x1da   : > { %v12773_v17 = vsub.f32 %v12651_v20, %v16336_v5  ;;  %16337 = vst [vmem:[#allocation25_spill] sm:$0xff] %v12777_v19  ;;  %8651 = vmatprep.subr.mxu0 %v12543_v9  ;;  %v16340_v9 = vand.u32 4294901760, %v12694_v63  ;;  %v12811_v5 = vand.u32 4294901760, %v569_v11  ;;  %v16344_v55 = vand.u32 4294901760, %v12610_v6 }
 0x1db   : > { %8678 = vmatprep.subr.mxu1 %v16338_v31  ;;  %8652 = vmatpush3.msra.mxu0 %v12545_v56  ;;  %v16341_v31 = vand.u32 4294901760, %v12684_v3  ;;  %16343 = vst [vmem:[#allocation31_spill] sm:$0xff] %v12828_v18  ;;  %v12838_v56 = vand.u32 4294901760, %v434_v42  ;;  %v16351_v6 = vand.u32 4294901760, %v12749_v27 }
 0x1dc   : > { %8679 = vmatpush3.msra.mxu1 %v16339_v24  ;;  %v12804_v23 = vsub.f32 %v12694_v63, %v16340_v9  ;;  %8653 = vmatprep.subr.mxu0 %v12564_v10  ;;  %v16342_v24 = vand.u32 4294901760, %v12584_v41  ;;  %v12820_v9 = vand.u32 4294901760, %v585_v37  ;;  %v4301_v10 = vand.u32 4294901760, %v12773_v17 }
 0x1dd   : > { %v12809_v53 = vsub.f32 %v12684_v3, %v16341_v31  ;;  %v12825_v31 = vsub.f32 %v587_v48, %v12762_v30  ;;  %8654 = vmatpush3.msra.mxu0 %v12605_v49  ;;  %v12835_v41 = vsub.f32 %v570_v51, %v12777_v19  ;;  %16346 = vst [vmem:[#allocation7_spill] sm:$0xff] %v12838_v56  ;;  %v16347_v48 = vand.u32 4294901760, %v12615_v2  ;;  %v583_v51 = vld [vmem:[%s15302_s0 + $0x488] sm:$0xff] }
 0x1de   : > { %8680 = vmatprep.subr.mxu1 %v16342_v24  ;;  %8655 = vmatprep.subr.mxu0 %v12627_v7  ;;  %v16348_v3 = vand.u32 4294901760, %v12739_v25  ;;  %v12855_v17 = vsub.f32 %v586_v0, %v12775_v43  ;;  %v16350_v2 = vand.u32 4294901760, %v12640_v52  ;;  %v12863_v24 = vsub.f32 %v569_v11, %v12811_v5  ;;  %v567_v0 = vld [vmem:[%s15302_s0 + $0x408] sm:$0xff]  ;;  %v582_v11 = vld [vmem:[%s15302_s0 + $0x480] sm:$0xff] }
 0x1df   : > { %8681 = vmatpush3.msra.mxu1 %v16344_v55  ;;  %16345 = vst [vmem:[#allocation21_spill] sm:$0xff] %v12835_v41  ;;  %v12848_v55 = vand.u32 4294901760, %v584_v14  ;;  %8656 = vmatpush3.msra.mxu0 %v12629_v33  ;;  %v4314_v7 = vsub.f32 %v12749_v27, %v16351_v6  ;;  %v16352_v52 = vand.u32 4294901760, %v12657_v34  ;;  %v566_v6 = vld [vmem:[%s15302_s0 + $0x400] sm:$0xff]  ;;  %v12889_v34 = vsub.f32 %v585_v37, %v12820_v9 }
 0x1e0   : > { %8682 = vmatprep.subr.mxu1 %v16347_v48  ;;  %v12846_v49 = vsub.f32 %v12739_v25, %v16348_v3  ;;  %v4420_v48 = vand.u32 4294901760, %v12804_v23  ;;  %v4308_v3 = vand.u32 4294901760, %v12809_v53  ;;  %8657 = vmatprep.subr.mxu0 %v12666_v60  ;;  %v12875_v23 = vsub.f32 %v568_v61, %v12822_v58 }
 0x1e1   : > { %16349 = vst [vmem:[#allocation27_spill] sm:$0xff] %v12848_v55  ;;  %8683 = vmatpush3.msra.mxu1 %v16350_v2  ;;  %v12886_v2 = vsub.f32 %v12697_v1, %v12828_v18  ;;  %8658 = vmatpush3.msra.mxu0 %v12686_v50  ;;  %v16353_v61 = vand.u32 4294901760, %v12691_v44  ;;  %v12897_v60 = vand.u32 4294901760, %v583_v51  ;;  %v12901_v27 = vsub.f32 %v434_v42, %v12838_v56 }
 0x1e2   : > { %8684 = vmatprep.subr.mxu1 %v16352_v52  ;;  %v16354_v52 = vand.u32 4294901760, %v12783_v8  ;;  %8659 = vmatprep.subr.mxu0 %v12717_v40  ;;  %v16355_v1 = vand.u32 4294901760, %v12705_v32  ;;  %v4427_v37 = vand.u32 4294901760, %v12846_v49  ;;  %v16356_v44 = vand.u32 4294901760, %v12759_v54 }
 0x1e3   : > { %8685 = vmatpush3.msra.mxu1 %v16353_v61  ;;  %v12910_v50 = vand.u32 4294901760, %v567_v0  ;;  %8660 = vmatpush3.msra.mxu0 %v12707_v21  ;;  %v16357_v42 = vand.u32 4294901760, %v12712_v38  ;;  %v12916_v33 = vand.u32 4294901760, %v582_v11  ;;  %v12918_v40 = vand.u32 4294901760, %v566_v6 }
 0x1e4   : > { %v4433_v53 = vsub.f32 %v12783_v8, %v16354_v52  ;;  %8686 = vmatprep.subr.mxu1 %v16355_v1  ;;  %v4321_v61 = vsub.f32 %v12759_v54, %v16356_v44  ;;  %v12922_v49 = vsub.f32 %v584_v14, %v12848_v55  ;;  %8661 = vmatprep.subr.mxu0 %v12762_v30  ;;  %v16358_v1 = vand.u32 4294901760, %v12730_v26 }
 0x1e5   : > { %8687 = vmatpush3.msra.mxu1 %v16357_v42  ;;  %v4315_v44 = vand.u32 4294901760, %v4314_v7  ;;  %v16359_v52 = vand.u32 4294901760, %v12825_v31  ;;  %v15637_v42 = vand.u32 4294901760, %v12886_v2  ;;  %8662 = vmatpush3.msra.mxu0 %v12722_v12  ;;  %v16360_v14 = vand.u32 4294901760, %v12793_v36 }
 0x1e6   : > { %8688 = vmatprep.subr.mxu1 %v16358_v1  ;;  %v4434_v32 = vand.u32 4294901760, %v4433_v53  ;;  %v12938_v7 = vsub.f32 %v583_v51, %v12897_v60  ;;  %8663 = vmatprep.subr.mxu0 %v12775_v43  ;;  %v12942_v1 = vsub.f32 %v567_v0, %v12910_v50  ;;  %v16361_v21 = vand.u32 4294901760, %v12855_v17 }
 0x1e7   : > { %v4440_v38 = vsub.f32 %v12825_v31, %v16359_v52  ;;  %8689 = vmatpush3.msra.mxu1 %v4301_v10  ;;  %v4328_v30 = vsub.f32 %v12793_v36, %v16360_v14  ;;  %v4322_v52 = vand.u32 4294901760, %v4321_v61  ;;  %8664 = vmatpush3.msra.mxu0 %v12777_v19  ;;  %v12950_v14 = vsub.f32 %v566_v6, %v12918_v40 }
 0x1e8   : > { %8690 = vmatprep.subr.mxu1 %v4420_v48  ;;  %v4447_v10 = vsub.f32 %v12855_v17, %v16361_v21  ;;  %v16363_v51 = vand.u32 4294901760, %v12835_v41  ;;  %v12957_v0 = vsub.f32 %v582_v11, %v12916_v33  ;;  %8665 = vmatprep.subr.mxu0 %v12820_v9  ;;  %v16365_v6 = vand.u32 4294901760, %v12889_v34 }
 0x1e9   : > { %8691 = vmatpush3.msra.mxu1 %v4308_v3  ;;  %16362 = vst [vmem:[#allocation32_spill] sm:$0xff] %v12950_v14  ;;  %v4441_v21 = vand.u32 4294901760, %v4440_v38  ;;  %v4241_v3 = vsub.f32 %v12886_v2, %v15637_v42  ;;  %8666 = vmatpush3.msra.mxu0 %v12811_v5  ;;  %v16366_v11 = vand.u32 4294901760, %v12901_v27  ;;  %v16367_v42 = vand.u32 4294901760, %v12863_v24 }
 0x1ea   : > { %v4335_v48 = vsub.f32 %v12835_v41, %v16363_v51  ;;  %16364 = vst [vmem:[#allocation35_spill] sm:$0xff] %v12957_v0  ;;  %8692 = vmatprep.subr.mxu1 %v4427_v37  ;;  %v4454_v53 = vsub.f32 %v12889_v34, %v16365_v6  ;;  %v4329_v51 = vand.u32 4294901760, %v4328_v30  ;;  %8667 = vmatprep.subr.mxu0 %v12848_v55  ;;  %v4448_v38 = vand.u32 4294901760, %v4447_v10 }
 0x1eb   : > { %8693 = vmatpush3.msra.mxu1 %v4315_v44  ;;  %v4247_v61 = vsub.f32 %v12901_v27, %v16366_v11  ;;  %v4342_v6 = vsub.f32 %v12863_v24, %v16367_v42  ;;  %8668 = vmatpush3.msra.mxu0 %v12822_v58  ;;  %v16368_v44 = vand.u32 4294901760, %v12922_v49  ;;  %v15641_v37 = vand.u32 4294901760, %v12957_v0 }
 0x1ec   : > { %8694 = vmatprep.subr.mxu1 %v4434_v32  ;;  %v4336_v30 = vand.u32 4294901760, %v4335_v48  ;;  %8669 = vmatprep.subr.mxu0 %v12897_v60  ;;  %v4242_v32 = vand.u32 4294901760, %v4241_v3  ;;  %v4455_v10 = vand.u32 4294901760, %v4454_v53  ;;  %v16369_v55 = vand.u32 4294901760, %v12875_v23 }
 0x1ed   : > { %8695 = vmatpush3.msra.mxu1 %v4322_v52  ;;  %v4461_v11 = vsub.f32 %v12922_v49, %v16368_v44  ;;  %v15640_v26 = vand.u32 4294901760, %v12950_v14  ;;  %8670 = vmatpush3.msra.mxu0 %v12910_v50  ;;  %v4248_v52 = vand.u32 4294901760, %v4247_v61  ;;  %v16370_v48 = vand.u32 4294901760, %v12938_v7 }
 0x1ee   : > { %8696 = vmatprep.subr.mxu1 %v4441_v21  ;;  %v4349_v42 = vsub.f32 %v12875_v23, %v16369_v55  ;;  %8671 = vmatprep.subr.mxu0 %v12916_v33  ;;  %v4343_v21 = vand.u32 4294901760, %v4342_v6  ;;  %v16371_v53 = vand.u32 4294901760, %v12942_v1  ;;  %v4475_v61 = vsub.f32 %v12957_v0, %v15641_v37  ;;  %v16389_v37 = vld [vmem:[#allocation13_spill] sm:$0xff] }
 0x1ef   : > { %8697 = vmatpush3.msra.mxu1 %v4329_v51  ;;  %v4468_v44 = vsub.f32 %v12938_v7, %v16370_v48  ;;  %8672 = vmatpush3.msra.mxu0 %v12918_v40  ;;  %v4462_v55 = vand.u32 4294901760, %v4461_v11  ;;  %v16375_v48 = vld [vmem:[#allocation18_spill] sm:$0xff] }
 0x1f0   : > { %8698 = vmatprep.subr.mxu1 %v4448_v38  ;;  %v4356_v3 = vsub.f32 %v12942_v1, %v16371_v53  ;;  %4243 = vmatprep.mubr.f32.mxu0 %v4242_v32  ;;  %v4350_v51 = vand.u32 4294901760, %v4349_v42  ;;  %v4363_v38 = vsub.f32 %v12950_v14, %v15640_v26  ;;  %v4476_v11 = vand.u32 4294901760, %v4475_v61  ;;  %v16373_v42 = vld [vmem:[#allocation22_spill] sm:$0xff]  ;;  %v16378_v53 = vld [vmem:[#allocation20_spill] sm:$0xff]  ;;  %v16381_v61 = vld [vmem:[#allocation29_spill] sm:$0xff] }
 0x1f1   : > { %8699 = vmatpush3.msra.mxu1 %v4336_v30  ;;  %8711 = vmatprep.subr.mxu0 %v12425_v57  ;;  %v4469_v6 = vand.u32 4294901760, %v4468_v44  ;;  %v16376_v44 = vld [vmem:[#allocation24_spill] sm:$0xff] }
 0x1f2   : > { %8700 = vmatprep.subr.mxu1 %v4455_v10  ;;  %4249 = vmatmul.mubr.f32.vlgmr.msra.gmra.mxu0 %v4248_v52  ;;  %v4357_v30 = vand.u32 4294901760, %v4356_v3  ;;  %v4364_v32 = vand.u32 4294901760, %v4363_v38  ;;  %v16372_v10 = vld [vmem:[#allocation30_spill] sm:$0xff]  ;;  %v16379_v3 = vld [vmem:[#allocation5_spill] sm:$0xff]  ;;  %v16383_v38 = vld [vmem:[#allocation19_spill] sm:$0xff] }
 0x1f3   : > { %8701 = vmatpush3.msra.mxu1 %v4343_v21  ;;  %8712 = vmatpush3.msra.mxu0 %v12431_v29  ;;  %v16374_v52 = vld [vmem:[#allocation14_spill] sm:$0xff]  ;;  %v16388_v26 = vld [vmem:[#allocation4_spill] sm:$0xff] }
 0x1f4   : > { %8702 = vmatprep.subr.mxu1 %v4462_v55  ;;  %8713 = vmatprep.subr.mxu0 %v12470_v28  ;;  %v16377_v21 = vld [vmem:[#allocation10_spill] sm:$0xff] }
 0x1f5   : > { %8703 = vmatpush3.msra.mxu1 %v4350_v51  ;;  %8714 = vmatpush3.msra.mxu0 %v12476_v13  ;;  %v16380_v55 = vld [vmem:[#allocation34_spill] sm:$0xff]  ;;  %v16382_v51 = vld [vmem:[#allocation8_spill] sm:$0xff] }
 0x1f6   : > { %8704 = vmatprep.subr.mxu1 %v4469_v6  ;;  %8715 = vmatprep.subr.mxu0 %v12481_v59  ;;  %v16384_v6 = vld [vmem:[#allocation23_spill] sm:$0xff] }
 0x1f7   : > { %8705 = vmatpush3.msra.mxu1 %v4357_v30  ;;  %8716 = vmatpush3.msra.mxu0 %v12499_v16  ;;  %v16385_v30 = vld [vmem:[#allocation9_spill] sm:$0xff] }
 0x1f8   : > { %8706 = vmatprep.subr.mxu1 %v4476_v11  ;;  %8717 = vmatprep.subr.mxu0 %v12515_v39  ;;  %v16386_v11 = vld [vmem:[#allocation12_spill] sm:$0xff] }
 0x1f9   : > { %8707 = vmatpush3.msra.mxu1 %v4364_v32  ;;  %4479 = vmatprep.mubr.f32.mxu1 %v12828_v18  ;;  %v16387_v32 = vld [vmem:[#allocation6_spill] sm:$0xff]  ;;  %v16391_v18 = vld [vmem:[#allocation15_spill] sm:$0xff] }
 0x1fa   : > { %8718 = vmatpush3.msra.mxu0 %v12531_v15  ;;  %4481 = vmatmul.mubr.f32.vlgmr.msra.gmra.mxu1 %v12838_v56  ;;  %v16390_v56 = vld [vmem:[#allocation11_spill] sm:$0xff] }
 0x1fb   : > { %8719 = vmatprep.subr.mxu0 %v12554_v4  ;;  %8746 = vmatprep.subr.mxu1 %v12399_v47 }
 0x1fc   : > { %8720 = vmatpush3.msra.mxu0 %v12573_v45  ;;  %8747 = vmatpush3.msra.mxu1 %v12404_v46 }
 0x1fd   : > { %8721 = vmatprep.subr.mxu0 %v12600_v62  ;;  %8748 = vmatprep.subr.mxu1 %v12433_v22 }
 0x1fe   : > { %8722 = vmatpush3.msra.mxu0 %v12590_v35  ;;  %8749 = vmatpush3.msra.mxu1 %v16372_v10 }
 0x1ff   : > { %8723 = vmatprep.subr.mxu0 %v16373_v42  ;;  %8750 = vmatprep.subr.mxu1 %v16374_v52 }
 0x200   : > { %8724 = vmatpush3.msra.mxu0 %v12651_v20  ;;  %8751 = vmatpush3.msra.mxu1 %v16375_v48 }
 0x201   : > { %8725 = vmatprep.subr.mxu0 %v12694_v63  ;;  %8752 = vmatprep.subr.mxu1 %v16376_v44 }
 0x202   : > { %8726 = vmatpush3.msra.mxu0 %v16377_v21  ;;  %8753 = vmatpush3.msra.mxu1 %v16378_v53 }
 0x203   : > { %8727 = vmatprep.subr.mxu0 %v12739_v25  ;;  %8754 = vmatprep.subr.mxu1 %v16379_v3 }
 0x204   : > { %8728 = vmatpush3.msra.mxu0 %v16380_v55  ;;  %8755 = vmatpush3.msra.mxu1 %v16381_v61 }
 0x205   : > { %8729 = vmatprep.subr.mxu0 %v12783_v8  ;;  %8756 = vmatprep.subr.mxu1 %v16382_v51 }
 0x206   : > { %8730 = vmatpush3.msra.mxu0 %v12759_v54  ;;  %8757 = vmatpush3.msra.mxu1 %v16383_v38 }
 0x207   : > { %8731 = vmatprep.subr.mxu0 %v12825_v31  ;;  %8758 = vmatprep.subr.mxu1 %v16384_v6 }
 0x208   : > { %8732 = vmatpush3.msra.mxu0 %v12793_v36  ;;  %8759 = vmatpush3.msra.mxu1 %v16385_v30 }
 0x209   : > { %8733 = vmatprep.subr.mxu0 %v12855_v17  ;;  %8760 = vmatprep.subr.mxu1 %v16386_v11 }
 0x20a   : > { %8734 = vmatpush3.msra.mxu0 %v12835_v41  ;;  %8761 = vmatpush3.msra.mxu1 %v16387_v32  ;;  %v16392_v41 = vld [vmem:[#allocation28_spill] sm:$0xff] }
 0x20b   : > { %8735 = vmatprep.subr.mxu0 %v12889_v34  ;;  %8762 = vmatprep.subr.mxu1 %v16388_v26 }
 0x20c   : > { %8736 = vmatpush3.msra.mxu0 %v12863_v24  ;;  %8763 = vmatpush3.msra.mxu1 %v16389_v37 }
 0x20d   : > { %8737 = vmatprep.subr.mxu0 %v12922_v49  ;;  %8764 = vmatprep.subr.mxu1 %v16390_v56 }
 0x20e   : > { %8738 = vmatpush3.msra.mxu0 %v12875_v23  ;;  %8765 = vmatpush3.msra.mxu1 %v16391_v18 }
 0x20f   : > { %8739 = vmatprep.subr.mxu0 %v12938_v7  ;;  %8766 = vmatprep.subr.mxu1 %v16392_v41  ;;  %v16393_v41 = vand.u32 4294901760, %v12425_v57  ;;  %v16398_v57 = vand.u32 4294901760, %v12481_v59  ;;  %v16403_v59 = vand.u32 4294901760, %v12901_v27 }
 0x210   : > { %8740 = vmatpush3.msra.mxu0 %v12942_v1  ;;  %8767 = vmatpush3.msra.mxu1 %v12722_v12  ;;  %v16394_v12 = vand.u32 4294901760, %v12431_v29  ;;  %v16399_v29 = vand.u32 4294901760, %v12499_v16  ;;  %v629_v16 = vld [vmem:[%s15302_s0 + $0x5f8] sm:$0xff] }
 0x211   : > { %8741 = vmatprep.subr.mxu0 %v12957_v0  ;;  %8768 = vmatprep.subr.mxu1 %v12775_v43  ;;  %v16395_v0 = vld [vmem:[#allocation27_spill] sm:$0xff] }
 0x212   : > { %8742 = vmatpush3.msra.mxu0 %v12950_v14  ;;  %4616 = vmatprep.mubr.f32.mxu0 %v12886_v2  ;;  %v16396_v14 = vand.u32 4294901760, %v12470_v28  ;;  %v16400_v28 = vand.u32 4294901760, %v12515_v39  ;;  %v13096_v39 = vpop.f32.mrf.mxu0 }
 0x213   : > { %8769 = vmatpush3.msra.mxu1 %v12777_v19  ;;  %4619 = vmatmul.mubr.f32.vlgmr.msra.gmra.mxu0 %v12901_v27  ;;  %v16397_v19 = vand.u32 4294901760, %v12476_v13  ;;  %v16401_v13 = vand.u32 4294901760, %v12886_v2  ;;  %v16407_v27 = vand.u32 4294901760, %v12590_v35  ;;  %v16409_v35 = vand.u32 4294901760, %v12651_v20 }
 0x214   : > { %8770 = vmatprep.subr.mxu1 %v12820_v9  ;;  %8781 = vmatprep.subr.mxu0 %v16393_v41  ;;  %v16405_v41 = vand.u32 4294901760, %v12573_v45  ;;  %v13113_v45 = vand.u32 4294901760, %v629_v16  ;;  %v8254_v2 = vpop.f32.mrf.mxu0 }
 0x215   : > { %8771 = vmatpush3.msra.mxu1 %v12811_v5  ;;  %8782 = vmatpush3.msra.mxu0 %v16394_v12  ;;  %v16404_v12 = vand.u32 4294901760, %v12554_v4  ;;  %v16406_v4 = vand.u32 4294901760, %v12600_v62  ;;  %v16408_v62 = vand.u32 4294901760, %v16373_v42 }
 0x216   : > { %8772 = vmatprep.subr.mxu1 %v16395_v0  ;;  %8783 = vmatprep.subr.mxu0 %v16396_v14  ;;  %v8288_v14 = vpop.f32.mrf.mxu1  ;;  %v13137_v20 = vsub.f32 %v629_v16, %v13113_v45 }
 0x217   : > { %8773 = vmatpush3.msra.mxu1 %v12822_v58  ;;  %8784 = vmatpush3.msra.mxu0 %v16397_v19  ;;  %v16402_v19 = vand.u32 4294901760, %v12531_v15  ;;  %v613_v15 = vld [vmem:[%s15302_s0 + $0x578] sm:$0xff] }
 0x218   : > { %8774 = vmatprep.subr.mxu1 %v12897_v60  ;;  %8785 = vmatprep.subr.mxu0 %v16398_v57  ;;  %v16410_v57 = vand.u32 4294901760, %v12694_v63  ;;  %v15655_v16 = vand.u32 4294901760, %v13137_v20 }
 0x219   : > { %8775 = vmatpush3.msra.mxu1 %v12910_v50  ;;  %8786 = vmatpush3.msra.mxu0 %v16399_v29  ;;  %v8323_v29 = vpop.f32.mrf.mxu0 }
 0x21a   : > { %8776 = vmatprep.subr.mxu1 %v12916_v33  ;;  %8787 = vmatprep.subr.mxu0 %v16400_v28  ;;  %v16414_v28 = vand.u32 4294901760, %v16380_v55  ;;  %v610_v55 = vld [vmem:[%s15302_s0 + $0x560] sm:$0xff] }
 0x21b   : > { %8777 = vmatpush3.msra.mxu1 %v12918_v40  ;;  %4723 = vmatprep.mubr.f32.mxu1 %v16401_v13 }
 0x21c   : > { %8788 = vmatpush3.msra.mxu0 %v16402_v19  ;;  %4727 = vmatmul.mubr.f32.vlgmr.msra.gmra.mxu1 %v16403_v59  ;;  %v626_v19 = vld [vmem:[%s15302_s0 + $0x5e0] sm:$0xff] }
 0x21d   : > { %8789 = vmatprep.subr.mxu0 %v16404_v12  ;;  %8816 = vmatprep.subr.mxu1 %v12399_v47  ;;  %v628_v47 = vld [vmem:[%s15302_s0 + $0x5f0] sm:$0xff]  ;;  %v16416_v12 = vand.u32 4294901760, %v12759_v54 }
 0x21e   : > { %8790 = vmatpush3.msra.mxu0 %v16405_v41  ;;  %8817 = vmatpush3.msra.mxu1 %v12404_v46  ;;  %v612_v46 = vld [vmem:[%s15302_s0 + $0x570] sm:$0xff]  ;;  %v16419_v41 = vand.u32 4294901760, %v12825_v31  ;;  %v609_v31 = vld [vmem:[%s15302_s0 + $0x558] sm:$0xff] }
 0x21f   : > { %8791 = vmatprep.subr.mxu0 %v16406_v4  ;;  %8818 = vmatprep.subr.mxu1 %v12433_v22  ;;  %v13121_v22 = vand.u32 4294901760, %v613_v15  ;;  %v13131_v42 = vand.u32 4294901760, %v612_v46  ;;  %v16420_v4 = vand.u32 4294901760, %v12793_v36 }
 0x220   : > { %8792 = vmatpush3.msra.mxu0 %v16407_v27  ;;  %8819 = vmatpush3.msra.mxu1 %v16372_v10  ;;  %v13126_v10 = vand.u32 4294901760, %v628_v47  ;;  %v13189_v27 = vand.u32 4294901760, %v610_v55 }
 0x221   : > { %8793 = vmatprep.subr.mxu0 %v16408_v62  ;;  %8820 = vmatprep.subr.mxu1 %v16374_v52  ;;  %16411 = vst [vmem:[#allocation30_spill] sm:$0xff] %v13131_v42  ;;  %v16412_v52 = vand.u32 4294901760, %v16377_v21  ;;  %v13143_v63 = vsub.f32 %v613_v15, %v13121_v22  ;;  %v611_v21 = vld [vmem:[%s15302_s0 + $0x568] sm:$0xff]  ;;  %v13161_v13 = vsub.f32 %v612_v46, %v13131_v42  ;;  %v625_v15 = vld [vmem:[%s15302_s0 + $0x5d8] sm:$0xff]  ;;  %v16423_v62 = vand.u32 4294901760, %v12855_v17 }
 0x222   : > { %8794 = vmatpush3.msra.mxu0 %v16409_v35  ;;  %8821 = vmatpush3.msra.mxu1 %v16375_v48  ;;  %v16413_v48 = vand.u32 4294901760, %v12739_v25  ;;  %v13155_v25 = vsub.f32 %v628_v47, %v13126_v10  ;;  %v13187_v47 = vand.u32 4294901760, %v626_v19  ;;  %16422 = vst [vmem:[#allocation24_spill] sm:$0xff] %v13189_v27  ;;  %v16424_v35 = vld [vmem:[#allocation21_spill] sm:$0xff]  ;;  %v13210_v17 = vsub.f32 %v13137_v20, %v15655_v16 }
 0x223   : > { %8795 = vmatprep.subr.mxu0 %v16410_v57  ;;  %8822 = vmatprep.subr.mxu1 %v16376_v44  ;;  %v627_v44 = vld [vmem:[%s15302_s0 + $0x5e8] sm:$0xff]  ;;  %v15653_v54 = vand.u32 4294901760, %v13143_v63  ;;  %v15651_v36 = vand.u32 4294901760, %v13161_v13  ;;  %v16425_v57 = vand.u32 4294901760, %v16424_v35 }
 0x224   : > { %8796 = vmatpush3.msra.mxu0 %v16412_v52  ;;  %8823 = vmatpush3.msra.mxu1 %v16378_v53  ;;  %v8289_v53 = vpop.f32.mrf.mxu1  ;;  %16421 = vst [vmem:[#allocation18_spill] sm:$0xff] %v13187_v47  ;;  %v623_v35 = vld [vmem:[%s15302_s0 + $0x5c8] sm:$0xff] }
 0x225   : > { %8797 = vmatprep.subr.mxu0 %v16413_v48  ;;  %8824 = vmatprep.subr.mxu1 %v16379_v3  ;;  %v16415_v3 = vand.u32 4294901760, %v12783_v8  ;;  %v13172_v8 = vand.u32 4294901760, %v627_v44  ;;  %v8290_v46 = vadd.f32 %v8289_v53, %v8288_v14  ;;  %v13205_v48 = vand.u32 4294901760, %v625_v15 }
 0x226   : > { %8798 = vmatpush3.msra.mxu0 %v16414_v28  ;;  %8825 = vmatpush3.msra.mxu1 %v16381_v61  ;;  %v8324_v61 = vpop.f32.mrf.mxu0  ;;  %v8358_v59 = vpop.f32.mrf.mxu1  ;;  %v8255_v53 = vadd.f32 %v8254_v2, %v13096_v39  ;;  %v13222_v28 = vand.u32 4294901760, %v609_v31  ;;  %v13236_v39 = vsub.f32 %v610_v55, %v13189_v27  ;;  %v13244_v2 = vsub.f32 %v626_v19, %v13187_v47 }
 0x227   : > { %8799 = vmatprep.subr.mxu0 %v16415_v3  ;;  %8826 = vmatprep.subr.mxu1 %v16382_v51  ;;  %16417 = vst [vmem:[#allocation22_spill] sm:$0xff] %v13172_v8  ;;  %v13174_v51 = vand.u32 4294901760, %v611_v21  ;;  %16426 = vst [vmem:[#allocation10_spill] sm:$0xff] %v13205_v48  ;;  %v13216_v14 = vsub.f32 %v627_v44, %v13172_v8  ;;  %v13227_v3 = vsub.f32 %v13143_v63, %v15653_v54  ;;  %v608_v44 = vld [vmem:[%s15302_s0 + $0x550] sm:$0xff] }
 0x228   : > { %8800 = vmatpush3.msra.mxu0 %v16416_v12  ;;  %8827 = vmatpush3.msra.mxu1 %v16383_v38  ;;  %v8393_v38 = vpop.f32.mrf.mxu0  ;;  %16428 = vst [vmem:[#allocation20_spill] sm:$0xff] %v13222_v28  ;;  %v16429_v12 = vand.u32 4294901760, %v12863_v24  ;;  %v16432_v55 = vand.u32 4294901760, %v12875_v23  ;;  %v16435_v23 = vld [vmem:[#allocation28_spill] sm:$0xff] }
 0x229   : > { %16418 = vst [vmem:[#allocation14_spill] sm:$0xff] %v13174_v51  ;;  %8801 = vmatprep.subr.mxu0 %v16419_v41  ;;  %8828 = vmatprep.subr.mxu1 %v16384_v6  ;;  %v15652_v6 = vand.u32 4294901760, %v13155_v25  ;;  %v13203_v52 = vsub.f32 %v611_v21, %v13174_v51  ;;  %v16427_v21 = vand.u32 4294901760, %v12889_v34  ;;  %v16430_v41 = vand.u32 4294901760, %v12922_v49 }
 0x22a   : > { %8802 = vmatpush3.msra.mxu0 %v16420_v4  ;;  %8829 = vmatpush3.msra.mxu1 %v16385_v30  ;;  %v8359_v30 = vpop.f32.mrf.mxu1  ;;  %v8394_v34 = vpop.f32.mrf.mxu0  ;;  %v15654_v49 = vand.u32 4294901760, %v13216_v14  ;;  %v13267_v4 = vsub.f32 %v625_v15, %v13205_v48  ;;  %v16437_v15 = vld [vmem:[#allocation17_spill] sm:$0xff] }
 0x22b   : > { %8803 = vmatprep.subr.mxu0 %v16423_v62  ;;  %8830 = vmatprep.subr.mxu1 %v16386_v11  ;;  %v624_v11 = vld [vmem:[%s15302_s0 + $0x5d0] sm:$0xff]  ;;  %v16434_v62 = vand.u32 4294901760, %v12938_v7  ;;  %v13395_v7 = vld [vmem:[%s10090_s23 + $0x28] sm:$0xff] }
 0x22c   : > { %8804 = vmatpush3.msra.mxu0 %v16425_v57  ;;  %8831 = vmatpush3.msra.mxu1 %v16387_v32  ;;  %v8325_v32 = vadd.f32 %v8324_v61, %v8323_v29  ;;  %v2759_v29 = vadd.f32 %v8290_v46, %v8255_v53  ;;  %v8360_v61 = vadd.f32 %v8359_v30, %v8358_v59  ;;  %v13249_v24 = vand.u32 4294901760, %v624_v11 }
 0x22d   : > { %8805 = vmatprep.subr.mxu0 %v16427_v21  ;;  %8832 = vmatprep.subr.mxu1 %v16388_v26  ;;  %v13241_v26 = vsub.f32 %v13155_v25, %v15652_v6  ;;  %v13260_v59 = vand.u32 4294901760, %v608_v44  ;;  %v13273_v30 = vsub.f32 %v609_v31, %v13222_v28  ;;  %v15657_v57 = vand.u32 4294901760, %v13203_v52 }
 0x22e   : > { %8806 = vmatpush3.msra.mxu0 %v16429_v12  ;;  %8833 = vmatpush3.msra.mxu1 %v16389_v37  ;;  %16431 = vst [vmem:[#allocation5_spill] sm:$0xff] %v13249_v24  ;;  %v13254_v37 = vsub.f32 %v13161_v13, %v15651_v36  ;;  %v2897_v46 = vadd.f32 %v8325_v32, %v2759_v29  ;;  %v16436_v53 = vand.u32 4294901760, %v12942_v1  ;;  %v15658_v31 = vand.u32 4294901760, %v13236_v39  ;;  %v16446_v36 = vld [vmem:[#allocation7_spill] sm:$0xff]  ;;  %v620_v1 = vld [vmem:[%s15302_s0 + $0x5b0] sm:$0xff] }
 0x22f   : > { %8807 = vmatprep.subr.mxu0 %v16430_v41  ;;  %8834 = vmatprep.subr.mxu1 %v16390_v56  ;;  %16433 = vst [vmem:[#allocation34_spill] sm:$0xff] %v13260_v59  ;;  %v607_v56 = vld [vmem:[%s15302_s0 + $0x548] sm:$0xff]  ;;  %v13323_v54 = vsub.f32 %v13203_v52, %v15657_v57 }
 0x230   : > { %8808 = vmatpush3.msra.mxu0 %v16432_v55  ;;  %8835 = vmatpush3.msra.mxu1 %v16391_v18  ;;  %v8395_v18 = vadd.f32 %v8394_v34, %v8393_v38  ;;  %v8428_v32 = vpop.f32.mrf.mxu1  ;;  %v15656_v38 = vand.u32 4294901760, %v13244_v2  ;;  %v3005_v12 = vadd.f32 %v8360_v61, %v2897_v46  ;;  %v16438_v34 = vld [vmem:[#allocation35_spill] sm:$0xff]  ;;  %v13290_v41 = vand.u32 4294901760, %v607_v56  ;;  %v622_v55 = vld [vmem:[%s15302_s0 + $0x5c0] sm:$0xff] }
 0x231   : > { %8809 = vmatprep.subr.mxu0 %v16434_v62  ;;  %8836 = vmatprep.subr.mxu1 %v16435_v23  ;;  %v16439_v29 = vand.u32 4294901760, %v16438_v34  ;;  %v606_v62 = vld [vmem:[%s15302_s0 + $0x540] sm:$0xff]  ;;  %v13299_v23 = vsub.f32 %v624_v11, %v13249_v24  ;;  %v13307_v34 = vand.u32 4294901760, %v623_v35  ;;  %v621_v11 = vld [vmem:[%s15302_s0 + $0x5b8] sm:$0xff]  ;;  %v13328_v16 = vand.u32 4294901760, %v622_v55 }
 0x232   : > { %8810 = vmatpush3.msra.mxu0 %v16436_v53  ;;  %8837 = vmatpush3.msra.mxu1 %v16437_v15  ;;  %16440 = vst [vmem:[#allocation29_spill] sm:$0xff] %v13290_v41  ;;  %v16441_v61 = vld [vmem:[#allocation32_spill] sm:$0xff]  ;;  %v16443_v53 = vld [vmem:[#allocation31_spill] sm:$0xff]  ;;  %v13305_v15 = vsub.f32 %v608_v44, %v13260_v59  ;;  %v3173_v6 = vadd.f32 %v8395_v18, %v3005_v12  ;;  %v13335_v18 = vand.u32 4294901760, %v606_v62 }
 0x233   : > { %8811 = vmatprep.subr.mxu0 %v16439_v29  ;;  %8838 = vmatprep.subr.mxu1 %v12775_v43  ;;  %v16442_v46 = vand.u32 4294901760, %v16441_v61  ;;  %v8429_v43 = vpop.f32.mrf.mxu1  ;;  %16444 = vst [vmem:[#allocation8_spill] sm:$0xff] %v13307_v34  ;;  %v13312_v29 = vsub.f32 %v13216_v14, %v15654_v49  ;;  %v15659_v61 = vand.u32 4294901760, %v13267_v4  ;;  %v15660_v49 = vand.u32 4294901760, %v13273_v30  ;;  %16447 = vst [vmem:[#allocation19_spill] sm:$0xff] %v13328_v16 }
 0x234   : > { %4893 = vmatprep.mubr.f32.mxu0 %v16443_v53  ;;  %v8430_v44 = vadd.f32 %v8429_v43, %v8428_v32  ;;  %16448 = vst [vmem:[#allocation23_spill] sm:$0xff] %v13335_v18  ;;  %v13340_v32 = vsub.f32 %v13236_v39, %v15658_v31  ;;  %v13348_v43 = vsub.f32 %v607_v56, %v13290_v41  ;;  %v15661_v57 = vand.u32 4294901760, %v13299_v23 }
 0x235   : > { %8812 = vmatpush3.msra.mxu0 %v16442_v46  ;;  %v16445_v46 = vld [vmem:[#allocation25_spill] sm:$0xff]  ;;  %v15664_v56 = vand.u32 4294901760, %v13305_v15  ;;  %4997 = vmatprep.mubr.f32.mxu1 %v16443_v53 }
 0x236   : > { %8839 = vmatpush3.msra.mxu1 %v16445_v46  ;;  %4895 = vmatmul.mubr.f32.vlgmr.msra.gmra.mxu0 %v16446_v36  ;;  %v13333_v46 = vsub.f32 %v13244_v2, %v15656_v38  ;;  %v3277_v12 = vadd.f32 %v8430_v44, %v3173_v6  ;;  %16449 = vst [vmem:[#allocation9_spill] sm:$0xff] %v13348_v43  ;;  %v13350_v38 = vand.u32 4294901760, %v621_v11  ;;  %v604_v6 = vld [vmem:[%s15302_s0 + $0x530] sm:$0xff] }
 0x237   : > { %8840 = vmatprep.subr.mxu1 %v12820_v9  ;;  %8851 = vmatprep.subr.mxu0 %v13113_v45  ;;  %v605_v9 = vld [vmem:[%s15302_s0 + $0x538] sm:$0xff]  ;;  %v13366_v44 = vsub.f32 %v623_v35, %v13307_v34  ;;  %v16452_v35 = vld [vmem:[#allocation16_spill] sm:$0xff]  ;;  %v13424_v19 = vsub.f32 %v13305_v15, %v15664_v56 }
 0x238   : > { %8841 = vmatpush3.msra.mxu1 %v12811_v5  ;;  %8852 = vmatpush3.msra.mxu0 %v13121_v22  ;;  %16450 = vst [vmem:[#allocation12_spill] sm:$0xff] %v13350_v38  ;;  %v13359_v5 = vsub.f32 %v13267_v4, %v15659_v61  ;;  %7592 = vst [vmem:[%s11931_s24 + $0x10] sm:$0xff] %v3277_v12  ;;  %v13372_v31 = vand.u32 4294901760, %v605_v9  ;;  %v13377_v61 = vsub.f32 %v13273_v30, %v15660_v49  ;;  %v601_v56 = vld [vmem:[%s15302_s0 + $0x518] sm:$0xff] }
 0x239   : > { %8842 = vmatprep.subr.mxu1 %v16395_v0  ;;  %8853 = vmatprep.subr.mxu0 %v13126_v10  ;;  %v364_v21 = vcombine.high %v16452_v35, %v16452_v35  ;;  %v13388_v12 = vsub.f32 %v606_v62, %v13335_v18  ;;  %v13392_v49 = vsub.f32 %v622_v55, %v13328_v16  ;;  %v13404_v35 = vand.u32 4294901760, %v604_v6  ;;  %v619_v62 = vld [vmem:[%s15302_s0 + $0x5a8] sm:$0xff] }
 0x23a   : > { %8843 = vmatpush3.msra.mxu1 %v12822_v58  ;;  %8854 = vmatpush3.msra.mxu0 %v13131_v42  ;;  %16451 = vst [vmem:[#allocation6_spill] sm:$0xff] %v13372_v31  ;;  %v603_v55 = vld [vmem:[%s15302_s0 + $0x528] sm:$0xff]  ;;  %v13419_v58 = vand.u32 4294901760, %v620_v1  ;;  %v418_v0 = vrot.slane %v13395_v7, 7 }
 0x23b   : > { %8844 = vmatprep.subr.mxu1 %v12897_v60  ;;  %8855 = vmatprep.subr.mxu0 %v13172_v8  ;;  %v13402_v60 = vsub.f32 %v13299_v23, %v15661_v57  ;;  %v602_v57 = vld [vmem:[%s15302_s0 + $0x520] sm:$0xff]  ;;  %v13447_v53 = vand.u32 4294901760, %v603_v55  ;;  %v16465_v8 = vand.u32 4294901760, %v13241_v26 }
 0x23c   : > { %8845 = vmatpush3.msra.mxu1 %v12910_v50  ;;  %8856 = vmatpush3.msra.mxu0 %v13174_v51  ;;  %v13414_v50 = vsub.f32 %v621_v11, %v13350_v38  ;;  %16454 = vst [vmem:[#allocation13_spill] sm:$0xff] %v13419_v58  ;;  %v13430_v11 = vsub.f32 %v605_v9, %v13372_v31  ;;  %v16456_v51 = vld [vmem:[#allocation26_spill] sm:$0xff]  ;;  %v618_v9 = vld [vmem:[%s15302_s0 + $0x5a0] sm:$0xff] }
 0x23d   : > { %8846 = vmatprep.subr.mxu1 %v12916_v33  ;;  %8857 = vmatprep.subr.mxu0 %v13187_v47  ;;  %v13441_v47 = vrot.slane %v364_v21, %v16456_v51  ;;  %16459 = vst [vmem:[#allocation21_spill] sm:$0xff] %v13447_v53  ;;  %v16460_v51 = vand.u32 4294901760, %v13210_v17  ;;  %v617_v33 = vld [vmem:[%s15302_s0 + $0x598] sm:$0xff]  ;;  %v16462_v17 = vand.u32 4294901760, %v13227_v3  ;;  %v16468_v3 = vand.u32 4294901760, %v13388_v12 }
 0x23e   : > { %16453 = vst [vmem:[#allocation4_spill] sm:$0xff] %v13414_v50  ;;  %8847 = vmatpush3.msra.mxu1 %v12918_v40  ;;  %16455 = vst [vmem:[#allocation11_spill] sm:$0xff] %v13430_v11  ;;  %8858 = vmatpush3.msra.mxu0 %v13189_v27  ;;  %v13445_v40 = vand.u32 4294901760, %v619_v62  ;;  %v16461_v27 = vand.u32 4294901760, %v13348_v43 }
 0x23f   : > { %16457 = vst [vmem:[#allocation15_spill] sm:$0xff] %v13441_v47  ;;  %4999 = vmatmul.mubr.f32.vlgmr.msra.gmra.mxu1 %v16446_v36  ;;  %8859 = vmatprep.subr.mxu0 %v13205_v48  ;;  %v13459_v36 = vsub.f32 %v604_v6, %v13404_v35  ;;  %v16463_v6 = vand.u32 4294901760, %v13366_v44  ;;  %v13481_v48 = vand.u32 4294901760, %v601_v56 }
 0x240   : > { %16458 = vst [vmem:[#allocation27_spill] sm:$0xff] %v13445_v40  ;;  %8886 = vmatprep.subr.mxu1 %v16460_v51  ;;  %v13464_v42 = vsub.f32 %v13348_v43, %v16461_v27  ;;  %8860 = vmatpush3.msra.mxu0 %v13222_v28  ;;  %v13479_v27 = vand.u32 4294901760, %v602_v57  ;;  %v13486_v28 = vand.u32 4294901760, %v618_v9  ;;  %v16466_v51 = vand.u32 4294901760, %v13254_v37 }
 0x241   : > { %8887 = vmatpush3.msra.mxu1 %v16462_v17  ;;  %v13477_v21 = vsub.f32 %v13366_v44, %v16463_v6  ;;  %8861 = vmatprep.subr.mxu0 %v13249_v24  ;;  %v13490_v17 = vsub.f32 %v620_v1, %v13419_v58  ;;  %v435_v6 = vsel %vm429_vm0, %v13441_v47, %v418_v0  ;;  %v13510_v43 = vand.u32 4294901760, %v617_v33 }
 0x242   : > { %16464 = vst [vmem:[#allocation28_spill] sm:$0xff] %v13479_v27  ;;  %8888 = vmatprep.subr.mxu1 %v16465_v8  ;;  %8862 = vmatpush3.msra.mxu0 %v13260_v59  ;;  %v13498_v24 = vsub.f32 %v603_v55, %v13447_v53  ;;  %v16467_v8 = vand.u32 4294901760, %v13392_v49  ;;  %v13508_v1 = vsub.f32 %v13388_v12, %v16468_v3  ;;  %v16469_v37 = vand.u32 4294901760, %v13312_v29  ;;  %v600_v3 = vld [vmem:[%s15302_s0 + $0x510] sm:$0xff] }
 0x243   : > { %8889 = vmatpush3.msra.mxu1 %v16466_v51  ;;  %8863 = vmatprep.subr.mxu0 %v13307_v34  ;;  %v5163_v0 = vand.u32 4294901760, %v13464_v42  ;;  %v16470_v55 = vand.u32 4294901760, %v13414_v50  ;;  %v13528_v47 = vsub.f32 %v619_v62, %v13445_v40  ;;  %v13531_v29 = vand.u32 4294901760, %v13395_v7 }
 0x244   : > { %v13503_v26 = vsub.f32 %v13392_v49, %v16467_v8  ;;  %8890 = vmatprep.subr.mxu1 %v16469_v37  ;;  %v616_v8 = vld [vmem:[%s15302_s0 + $0x590] sm:$0xff]  ;;  %8864 = vmatpush3.msra.mxu0 %v13290_v41  ;;  %v16472_v42 = vand.u32 4294901760, %v13323_v54  ;;  %v5275_v37 = vand.u32 4294901760, %v13477_v21  ;;  %v13541_v34 = vsub.f32 %v601_v56, %v13481_v48  ;;  %v615_v56 = vld [vmem:[%s15302_s0 + $0x588] sm:$0xff] }
 0x245   : > { %v13519_v51 = vsub.f32 %v13414_v50, %v16470_v55  ;;  %16471 = vst [vmem:[#allocation17_spill] sm:$0xff] %v13531_v29  ;;  %v13538_v55 = vsub.f32 %v602_v57, %v13479_v27  ;;  %v13543_v59 = vand.u32 4294901760, %v435_v6  ;;  %8865 = vmatprep.subr.mxu0 %v13328_v16  ;;  %v16474_v62 = vand.u32 4294901760, %v13333_v46  ;;  %5341 = vmatprep.mubr.f32.mxu1 %v13531_v29 }
 0x246   : > { %8891 = vmatpush3.msra.mxu1 %v16472_v42  ;;  %v16475_v41 = vand.u32 4294901760, %v13430_v11  ;;  %v599_v42 = vld [vmem:[%s15302_s0 + $0x508] sm:$0xff]  ;;  %v13562_v46 = vsub.f32 %v618_v9, %v13486_v28  ;;  %8866 = vmatpush3.msra.mxu0 %v13335_v18  ;;  %v5170_v57 = vand.u32 4294901760, %v13508_v1  ;;  %v13569_v21 = vand.u32 4294901760, %v616_v8 }
 0x247   : > { %16473 = vst [vmem:[#allocation35_spill] sm:$0xff] %v13543_v59  ;;  %8892 = vmatprep.subr.mxu1 %v16474_v62  ;;  %v5282_v62 = vand.u32 4294901760, %v13503_v26  ;;  %v13571_v16 = vand.u32 4294901760, %v600_v3  ;;  %8867 = vmatprep.subr.mxu0 %v13350_v38  ;;  %v5289_v9 = vand.u32 4294901760, %v13519_v51  ;;  %v598_v26 = vld [vmem:[%s15302_s0 + $0x500] sm:$0xff]  ;;  %v13586_v1 = vsub.f32 %v13395_v7, %v13531_v29  ;;  %v16517_v29 = vld [vmem:[#allocation27_spill] sm:$0xff] }
 0x248   : > { %v13551_v54 = vsub.f32 %v13430_v11, %v16475_v41  ;;  %v16476_v41 = vand.u32 4294901760, %v13340_v32  ;;  %16477 = vst [vmem:[#allocation32_spill] sm:$0xff] %v13569_v21  ;;  %v16478_v11 = vand.u32 4294901760, %v13359_v5  ;;  %v614_v32 = vld [vmem:[%s15302_s0 + $0x580] sm:$0xff]  ;;  %8868 = vmatpush3.msra.mxu0 %v13372_v31  ;;  %v16479_v5 = vand.u32 4294901760, %v13377_v61 }
 0x249   : > { %v13596_v51 = vand.u32 4294901760, %v599_v42  ;;  %v13600_v38 = vsub.f32 %v435_v6, %v13543_v59  ;;  %8869 = vmatprep.subr.mxu0 %v13419_v58  ;;  %v16480_v7 = vand.u32 4294901760, %v13402_v60  ;;  %v16481_v31 = vand.u32 4294901760, %v13490_v17 }
 0x24a   : > { %8893 = vmatpush3.msra.mxu1 %v16476_v41  ;;  %v13589_v41 = vsub.f32 %v617_v33, %v13510_v43  ;;  %v5177_v33 = vand.u32 4294901760, %v13551_v54  ;;  %8870 = vmatpush3.msra.mxu0 %v13404_v35  ;;  %v16483_v6 = vand.u32 4294901760, %v13424_v19  ;;  %v13616_v58 = vand.u32 4294901760, %v614_v32 }
 0x24b   : > { %8894 = vmatprep.subr.mxu1 %v16478_v11  ;;  %v13594_v11 = vand.u32 4294901760, %v615_v56  ;;  %v5295_v61 = vsub.f32 %v13490_v17, %v16481_v31  ;;  %v13618_v60 = vand.u32 4294901760, %v598_v26  ;;  %8871 = vmatprep.subr.mxu0 %v13445_v40  ;;  %v13626_v31 = vsub.f32 %v600_v3, %v13571_v16 }
 0x24c   : > { %8895 = vmatpush3.msra.mxu1 %v16479_v5  ;;  %v16482_v5 = vand.u32 4294901760, %v13459_v36  ;;  %8872 = vmatpush3.msra.mxu0 %v13447_v53  ;;  %v16485_v54 = vand.u32 4294901760, %v13498_v24 }
 0x24d   : > { %8896 = vmatprep.subr.mxu1 %v16480_v7  ;;  %v13622_v7 = vsub.f32 %v616_v8, %v13569_v21  ;;  %v13635_v8 = vsub.f32 %v599_v42, %v13596_v51  ;;  %v13642_v40 = vsub.f32 %v615_v56, %v13594_v11  ;;  %8873 = vmatprep.subr.mxu0 %v13486_v28  ;;  %v16488_v56 = vand.u32 4294901760, %v13538_v55 }
 0x24e   : > { %v5183_v50 = vsub.f32 %v13459_v36, %v16482_v5  ;;  %8897 = vmatpush3.msra.mxu1 %v16483_v6  ;;  %v16484_v5 = vand.u32 4294901760, %v13528_v47  ;;  %v16486_v6 = vand.u32 4294901760, %v13562_v46  ;;  %8874 = vmatpush3.msra.mxu0 %v13479_v27 }
 0x24f   : > { %8898 = vmatprep.subr.mxu1 %v5275_v37  ;;  %v5190_v37 = vsub.f32 %v13498_v24, %v16485_v54  ;;  %v13651_v54 = vsub.f32 %v598_v26, %v13618_v60  ;;  %v5197_v3 = vsub.f32 %v13538_v55, %v16488_v56  ;;  %8875 = vmatprep.subr.mxu0 %v13510_v43  ;;  %v16491_v26 = vand.u32 4294901760, %v13589_v41 }
 0x250   : > { %v5302_v19 = vsub.f32 %v13528_v47, %v16484_v5  ;;  %8899 = vmatpush3.msra.mxu1 %v5163_v0  ;;  %v5296_v5 = vand.u32 4294901760, %v5295_v61  ;;  %v5184_v18 = vand.u32 4294901760, %v5183_v50  ;;  %v5309_v0 = vsub.f32 %v13562_v46, %v16486_v6  ;;  %8876 = vmatpush3.msra.mxu0 %v13481_v48 }
 0x251   : > { %8900 = vmatprep.subr.mxu1 %v5282_v62  ;;  %16487 = vst [vmem:[#allocation31_spill] sm:$0xff] %v13651_v54  ;;  %v13658_v50 = vsub.f32 %v614_v32, %v13616_v58  ;;  %v16490_v6 = vand.u32 4294901760, %v13586_v1  ;;  %v5316_v42 = vsub.f32 %v13589_v41, %v16491_v26  ;;  %v5191_v56 = vand.u32 4294901760, %v5190_v37  ;;  %8877 = vmatprep.subr.mxu0 %v13569_v21 }
 0x252   : > { %8901 = vmatpush3.msra.mxu1 %v5170_v57  ;;  %v5303_v61 = vand.u32 4294901760, %v5302_v19  ;;  %v16492_v32 = vand.u32 4294901760, %v13600_v38  ;;  %v5310_v19 = vand.u32 4294901760, %v5309_v0  ;;  %8878 = vmatpush3.msra.mxu0 %v13571_v16  ;;  %v16494_v37 = vand.u32 4294901760, %v13622_v7 }
 0x253   : > { %16489 = vst [vmem:[#allocation25_spill] sm:$0xff] %v13658_v50  ;;  %8902 = vmatprep.subr.mxu1 %v5289_v9  ;;  %v5103_v57 = vsub.f32 %v13586_v1, %v16490_v6  ;;  %v16493_v6 = vand.u32 4294901760, %v13541_v34  ;;  %v15709_v9 = vand.u32 4294901760, %v13658_v50  ;;  %8879 = vmatprep.subr.mxu0 %v13594_v11  ;;  %v5317_v0 = vand.u32 4294901760, %v5316_v42 }
 0x254   : > { %8903 = vmatpush3.msra.mxu1 %v5177_v33  ;;  %v5109_v62 = vsub.f32 %v13600_v38, %v16492_v32  ;;  %v5198_v33 = vand.u32 4294901760, %v5197_v3  ;;  %v5323_v32 = vsub.f32 %v13622_v7, %v16494_v37  ;;  %v16495_v21 = vand.u32 4294901760, %v13626_v31  ;;  %8880 = vmatpush3.msra.mxu0 %v13596_v51 }
 0x255   : > { %8904 = vmatprep.subr.mxu1 %v5296_v5  ;;  %v5204_v26 = vsub.f32 %v13541_v34, %v16493_v6  ;;  %v5104_v5 = vand.u32 4294901760, %v5103_v57  ;;  %v15708_v27 = vand.u32 4294901760, %v13651_v54  ;;  %v16496_v3 = vand.u32 4294901760, %v13642_v40  ;;  %8881 = vmatprep.subr.mxu0 %v13616_v58 }
 0x256   : > { %8905 = vmatpush3.msra.mxu1 %v5184_v18  ;;  %v5211_v6 = vsub.f32 %v13626_v31, %v16495_v21  ;;  %v5110_v18 = vand.u32 4294901760, %v5109_v62  ;;  %v16497_v42 = vand.u32 4294901760, %v13635_v8  ;;  %8882 = vmatpush3.msra.mxu0 %v13618_v60  ;;  %v5324_v21 = vand.u32 4294901760, %v5323_v32 }
 0x257   : > { %8906 = vmatprep.subr.mxu1 %v5303_v61  ;;  %v5330_v37 = vsub.f32 %v13642_v40, %v16496_v3  ;;  %v5205_v61 = vand.u32 4294901760, %v5204_v26  ;;  %v5337_v62 = vsub.f32 %v13658_v50, %v15709_v9  ;;  %5105 = vmatprep.mubr.f32.mxu0 %v5104_v5  ;;  %v16501_v3 = vld [vmem:[#allocation14_spill] sm:$0xff] }
 0x258   : > { %8907 = vmatpush3.msra.mxu1 %v5191_v56  ;;  %v5218_v57 = vsub.f32 %v13635_v8, %v16497_v42  ;;  %v5212_v56 = vand.u32 4294901760, %v5211_v6  ;;  %8921 = vmatprep.subr.mxu0 %v13137_v20  ;;  %v16499_v6 = vld [vmem:[#allocation22_spill] sm:$0xff]  ;;  %v16504_v42 = vld [vmem:[#allocation4_spill] sm:$0xff] }
 0x259   : > { %8908 = vmatprep.subr.mxu1 %v5310_v19  ;;  %v5225_v19 = vsub.f32 %v13651_v54, %v15708_v27  ;;  %5111 = vmatmul.mubr.f32.vlgmr.msra.gmra.mxu0 %v5110_v18  ;;  %v5331_v26 = vand.u32 4294901760, %v5330_v37  ;;  %v5338_v32 = vand.u32 4294901760, %v5337_v62  ;;  %v16500_v18 = vld [vmem:[#allocation9_spill] sm:$0xff]  ;;  %v16502_v37 = vld [vmem:[#allocation18_spill] sm:$0xff]  ;;  %v16507_v62 = vld [vmem:[#allocation20_spill] sm:$0xff] }
 0x25a   : > { %8909 = vmatpush3.msra.mxu1 %v5198_v33  ;;  %8922 = vmatpush3.msra.mxu0 %v13143_v63  ;;  %v5219_v33 = vand.u32 4294901760, %v5218_v57  ;;  %v16505_v57 = vld [vmem:[#allocation10_spill] sm:$0xff]  ;;  %v16514_v27 = vld [vmem:[#allocation12_spill] sm:$0xff] }
 0x25b   : > { %8910 = vmatprep.subr.mxu1 %v5317_v0  ;;  %8923 = vmatprep.subr.mxu0 %v13155_v25  ;;  %v5226_v5 = vand.u32 4294901760, %v5225_v19  ;;  %v16498_v0 = vld [vmem:[#allocation30_spill] sm:$0xff] }
 0x25c   : > { %8911 = vmatpush3.msra.mxu1 %v5205_v61  ;;  %8924 = vmatpush3.msra.mxu0 %v13161_v13  ;;  %v16503_v61 = vld [vmem:[#allocation24_spill] sm:$0xff]  ;;  %v16509_v19 = vld [vmem:[#allocation34_spill] sm:$0xff] }
 0x25d   : > { %8912 = vmatprep.subr.mxu1 %v5324_v21  ;;  %8925 = vmatprep.subr.mxu0 %v13216_v14  ;;  %v16506_v21 = vld [vmem:[#allocation11_spill] sm:$0xff]  ;;  %v16515_v9 = vld [vmem:[#allocation6_spill] sm:$0xff] }
 0x25e   : > { %8913 = vmatpush3.msra.mxu1 %v5212_v56  ;;  %8926 = vmatpush3.msra.mxu0 %v13203_v52  ;;  %v16508_v56 = vld [vmem:[#allocation5_spill] sm:$0xff] }
 0x25f   : > { %8914 = vmatprep.subr.mxu1 %v5331_v26  ;;  %8927 = vmatprep.subr.mxu0 %v13244_v2  ;;  %v16510_v26 = vld [vmem:[#allocation8_spill] sm:$0xff] }
 0x260   : > { %8915 = vmatpush3.msra.mxu1 %v5219_v33  ;;  %8928 = vmatpush3.msra.mxu0 %v13236_v39  ;;  %v16511_v33 = vld [vmem:[#allocation29_spill] sm:$0xff] }
 0x261   : > { %8916 = vmatprep.subr.mxu1 %v5338_v32  ;;  %8929 = vmatprep.subr.mxu0 %v13267_v4  ;;  %v16512_v32 = vld [vmem:[#allocation19_spill] sm:$0xff] }
 0x262   : > { %8917 = vmatpush3.msra.mxu1 %v5226_v5  ;;  %8930 = vmatpush3.msra.mxu0 %v13273_v30  ;;  %v16513_v5 = vld [vmem:[#allocation23_spill] sm:$0xff] }
 0x263   : > { %5343 = vmatmul.mubr.f32.vlgmr.msra.gmra.mxu1 %v13543_v59  ;;  %8956 = vmatprep.subr.mxu1 %v13113_v45  ;;  %v16516_v59 = vld [vmem:[#allocation13_spill] sm:$0xff] }
 0x264   : > { %8957 = vmatpush3.msra.mxu1 %v13121_v22  ;;  %8931 = vmatprep.subr.mxu0 %v13299_v23 }
 0x265   : > { %8958 = vmatprep.subr.mxu1 %v13126_v10  ;;  %8932 = vmatpush3.msra.mxu0 %v13305_v15 }
 0x266   : > { %8959 = vmatpush3.msra.mxu1 %v16498_v0  ;;  %8933 = vmatprep.subr.mxu0 %v13366_v44 }
 0x267   : > { %8960 = vmatprep.subr.mxu1 %v16499_v6  ;;  %8934 = vmatpush3.msra.mxu0 %v16500_v18 }
 0x268   : > { %8961 = vmatpush3.msra.mxu1 %v16501_v3  ;;  %8935 = vmatprep.subr.mxu0 %v13392_v49 }
 0x269   : > { %8962 = vmatprep.subr.mxu1 %v16502_v37  ;;  %8936 = vmatpush3.msra.mxu0 %v13388_v12 }
 0x26a   : > { %8963 = vmatpush3.msra.mxu1 %v16503_v61  ;;  %8937 = vmatprep.subr.mxu0 %v16504_v42 }
 0x26b   : > { %8964 = vmatprep.subr.mxu1 %v16505_v57  ;;  %8938 = vmatpush3.msra.mxu0 %v16506_v21 }
 0x26c   : > { %8965 = vmatpush3.msra.mxu1 %v16507_v62  ;;  %8939 = vmatprep.subr.mxu0 %v13490_v17 }
 0x26d   : > { %8966 = vmatprep.subr.mxu1 %v16508_v56  ;;  %8940 = vmatpush3.msra.mxu0 %v13459_v36 }
 0x26e   : > { %8967 = vmatpush3.msra.mxu1 %v16509_v19  ;;  %8941 = vmatprep.subr.mxu0 %v13528_v47 }
 0x26f   : > { %8968 = vmatprep.subr.mxu1 %v16510_v26  ;;  %8942 = vmatpush3.msra.mxu0 %v13498_v24 }
 0x270   : > { %8969 = vmatpush3.msra.mxu1 %v16511_v33  ;;  %8943 = vmatprep.subr.mxu0 %v13562_v46 }
 0x271   : > { %8970 = vmatprep.subr.mxu1 %v16512_v32  ;;  %8944 = vmatpush3.msra.mxu0 %v13538_v55 }
 0x272   : > { %8971 = vmatpush3.msra.mxu1 %v16513_v5  ;;  %8945 = vmatprep.subr.mxu0 %v13589_v41 }
 0x273   : > { %8972 = vmatprep.subr.mxu1 %v16514_v27  ;;  %8946 = vmatpush3.msra.mxu0 %v13541_v34 }
 0x274   : > { %8973 = vmatpush3.msra.mxu1 %v16515_v9  ;;  %8947 = vmatprep.subr.mxu0 %v13622_v7 }
 0x275   : > { %8974 = vmatprep.subr.mxu1 %v16516_v59  ;;  %8948 = vmatpush3.msra.mxu0 %v13626_v31  ;;  %v16518_v59 = vld [vmem:[#allocation28_spill] sm:$0xff] }
 0x276   : > { %8975 = vmatpush3.msra.mxu1 %v13404_v35  ;;  %8949 = vmatprep.subr.mxu0 %v13642_v40 }
 0x277   : > { %8976 = vmatprep.subr.mxu1 %v16517_v29  ;;  %8950 = vmatpush3.msra.mxu0 %v13635_v8  ;;  %v16519_v29 = vand.u32 4294901760, %v13137_v20  ;;  %v16524_v20 = vand.u32 4294901760, %v13216_v14  ;;  %v16529_v14 = vand.u32 4294901760, %v13600_v38 }
 0x278   : > { %8977 = vmatpush3.msra.mxu1 %v13447_v53  ;;  %8951 = vmatprep.subr.mxu0 %v13658_v50  ;;  %v16520_v53 = vand.u32 4294901760, %v13143_v63  ;;  %v16521_v50 = vld [vmem:[#allocation32_spill] sm:$0xff]  ;;  %v16525_v63 = vand.u32 4294901760, %v13203_v52  ;;  %v661_v52 = vld [vmem:[%s15302_s0 + $0x6f8] sm:$0xff] }
 0x279   : > { %8978 = vmatprep.subr.mxu1 %v13486_v28  ;;  %8952 = vmatpush3.msra.mxu0 %v13651_v54  ;;  %v16522_v54 = vand.u32 4294901760, %v13155_v25  ;;  %v16526_v25 = vand.u32 4294901760, %v13244_v2  ;;  %v13797_v2 = vpop.f32.mrf.mxu0 }
 0x27a   : > { %5478 = vmatprep.mubr.f32.mxu0 %v13586_v1  ;;  %8979 = vmatpush3.msra.mxu1 %v16518_v59  ;;  %v16523_v59 = vand.u32 4294901760, %v13161_v13  ;;  %v16527_v13 = vand.u32 4294901760, %v13586_v1  ;;  %v16535_v1 = vand.u32 4294901760, %v16500_v18 }
 0x27b   : > { %5481 = vmatmul.mubr.f32.vlgmr.msra.gmra.mxu0 %v13600_v38  ;;  %8980 = vmatprep.subr.mxu1 %v13510_v43  ;;  %v13811_v38 = vand.u32 4294901760, %v661_v52 }
 0x27c   : > { %8991 = vmatprep.subr.mxu0 %v16519_v29  ;;  %8981 = vmatpush3.msra.mxu1 %v13481_v48  ;;  %v16531_v29 = vand.u32 4294901760, %v13273_v30  ;;  %v16534_v30 = vand.u32 4294901760, %v13366_v44  ;;  %v644_v44 = vld [vmem:[%s15302_s0 + $0x670] sm:$0xff] }
 0x27d   : > { %8992 = vmatpush3.msra.mxu0 %v16520_v53  ;;  %8982 = vmatprep.subr.mxu1 %v16521_v50  ;;  %v16530_v53 = vand.u32 4294901760, %v13267_v4  ;;  %v16533_v4 = vand.u32 4294901760, %v13305_v15  ;;  %v13836_v18 = vsub.f32 %v661_v52, %v13811_v38 }
 0x27e   : > { %8993 = vmatprep.subr.mxu0 %v16522_v54  ;;  %8983 = vmatpush3.msra.mxu1 %v13571_v16  ;;  %v16536_v54 = vand.u32 4294901760, %v13392_v49  ;;  %v16538_v49 = vand.u32 4294901760, %v16504_v42  ;;  %v643_v42 = vld [vmem:[%s15302_s0 + $0x668] sm:$0xff] }
 0x27f   : > { %8994 = vmatpush3.msra.mxu0 %v16523_v59  ;;  %8984 = vmatprep.subr.mxu1 %v13594_v11  ;;  %v16528_v59 = vand.u32 4294901760, %v13236_v39  ;;  %v16532_v39 = vand.u32 4294901760, %v13299_v23  ;;  %v8498_v23 = vpop.f32.mrf.mxu1  ;;  %v13876_v52 = vand.u32 4294901760, %v643_v42 }
 0x280   : > { %8995 = vmatprep.subr.mxu0 %v16524_v20  ;;  %8985 = vmatpush3.msra.mxu1 %v13596_v51  ;;  %v16537_v20 = vand.u32 4294901760, %v13388_v12 }
 0x281   : > { %8996 = vmatpush3.msra.mxu0 %v16525_v63  ;;  %8986 = vmatprep.subr.mxu1 %v13616_v58  ;;  %v16539_v63 = vand.u32 4294901760, %v16506_v21  ;;  %v658_v21 = vld [vmem:[%s15302_s0 + $0x6e0] sm:$0xff]  ;;  %16545 = vst [vmem:[#allocation26_spill] sm:$0xff] %v13876_v52 }
 0x282   : > { %8997 = vmatprep.subr.mxu0 %v16526_v25  ;;  %8987 = vmatpush3.msra.mxu1 %v13618_v60 }
 0x283   : > { %5585 = vmatprep.mubr.f32.mxu1 %v16527_v13  ;;  %8998 = vmatpush3.msra.mxu0 %v16528_v59 }
 0x284   : > { %5589 = vmatmul.mubr.f32.vlgmr.msra.gmra.mxu1 %v16529_v14  ;;  %8999 = vmatprep.subr.mxu0 %v16530_v53  ;;  %v16542_v14 = vand.u32 4294901760, %v13459_v36  ;;  %v16544_v53 = vand.u32 4294901760, %v13528_v47  ;;  %v16546_v36 = vand.u32 4294901760, %v13498_v24  ;;  %v16549_v24 = vand.u32 4294901760, %v13562_v46  ;;  %v656_v46 = vld [vmem:[%s15302_s0 + $0x6d0] sm:$0xff] }
 0x285   : > { %9026 = vmatprep.subr.mxu1 %v13113_v45  ;;  %9000 = vmatpush3.msra.mxu0 %v16531_v29  ;;  %v645_v45 = vld [vmem:[%s15302_s0 + $0x678] sm:$0xff] }
 0x286   : > { %9027 = vmatpush3.msra.mxu1 %v13121_v22  ;;  %9001 = vmatprep.subr.mxu0 %v16532_v39  ;;  %v660_v22 = vld [vmem:[%s15302_s0 + $0x6f0] sm:$0xff]  ;;  %v13822_v15 = vand.u32 4294901760, %v645_v45  ;;  %v657_v29 = vld [vmem:[%s15302_s0 + $0x6d8] sm:$0xff] }
 0x287   : > { %9028 = vmatprep.subr.mxu1 %v13126_v10  ;;  %9002 = vmatpush3.msra.mxu0 %v16533_v4  ;;  %v8464_v10 = vpop.f32.mrf.mxu0 }
 0x288   : > { %9029 = vmatpush3.msra.mxu1 %v16498_v0  ;;  %9003 = vmatprep.subr.mxu0 %v16534_v30  ;;  %v13827_v0 = vand.u32 4294901760, %v660_v22  ;;  %v13848_v12 = vsub.f32 %v645_v45, %v13822_v15  ;;  %v13887_v45 = vand.u32 4294901760, %v658_v21 }
 0x289   : > { %9030 = vmatprep.subr.mxu1 %v16499_v6  ;;  %9004 = vmatpush3.msra.mxu0 %v16535_v1  ;;  %v8533_v6 = vpop.f32.mrf.mxu0  ;;  %v16550_v1 = vand.u32 4294901760, %v13538_v55 }
 0x28a   : > { %9031 = vmatpush3.msra.mxu1 %v16501_v3  ;;  %9005 = vmatprep.subr.mxu0 %v16536_v54  ;;  %v659_v3 = vld [vmem:[%s15302_s0 + $0x6e8] sm:$0xff]  ;;  %v13865_v25 = vsub.f32 %v660_v22, %v13827_v0  ;;  %16547 = vst [vmem:[#allocation30_spill] sm:$0xff] %v13887_v45  ;;  %v15720_v4 = vand.u32 4294901760, %v13848_v12  ;;  %v13902_v54 = vand.u32 4294901760, %v657_v29 }
 0x28b   : > { %9032 = vmatprep.subr.mxu1 %v16502_v37  ;;  %9006 = vmatpush3.msra.mxu0 %v16537_v20  ;;  %v8499_v37 = vpop.f32.mrf.mxu1  ;;  %v8534_v13 = vpop.f32.mrf.mxu0  ;;  %v16552_v20 = vand.u32 4294901760, %v13589_v41 }
 0x28c   : > { %9033 = vmatpush3.msra.mxu1 %v16503_v61  ;;  %9007 = vmatprep.subr.mxu0 %v16538_v49  ;;  %v13850_v61 = vand.u32 4294901760, %v644_v44  ;;  %v8500_v22 = vadd.f32 %v8499_v37, %v8498_v23  ;;  %16551 = vst [vmem:[#allocation9_spill] sm:$0xff] %v13902_v54  ;;  %v8465_v23 = vadd.f32 %v8464_v10, %v13797_v2  ;;  %v640_v37 = vld [vmem:[%s15302_s0 + $0x650] sm:$0xff] }
 0x28d   : > { %9034 = vmatprep.subr.mxu1 %v16505_v57  ;;  %9008 = vmatpush3.msra.mxu0 %v16539_v63  ;;  %v16541_v57 = vand.u32 4294901760, %v13490_v17  ;;  %v8568_v59 = vpop.f32.mrf.mxu1  ;;  %v13870_v17 = vand.u32 4294901760, %v659_v3  ;;  %v8535_v55 = vadd.f32 %v8534_v13, %v8533_v6  ;;  %v13940_v6 = vsub.f32 %v658_v21, %v13887_v45  ;;  %v16581_v21 = vld [vmem:[#allocation33_spill] sm:$0xff] }
 0x28e   : > { %9035 = vmatpush3.msra.mxu1 %v16507_v62  ;;  %16540 = vst [vmem:[#allocation7_spill] sm:$0xff] %v13850_v61  ;;  %v642_v62 = vld [vmem:[%s15302_s0 + $0x660] sm:$0xff]  ;;  %v13885_v39 = vsub.f32 %v644_v44, %v13850_v61  ;;  %v3621_v63 = vadd.f32 %v8500_v22, %v8465_v23  ;;  %v16558_v13 = vand.u32 4294901760, %v13626_v31  ;;  %v16560_v22 = vand.u32 4294901760, %v13642_v40  ;;  %v16561_v31 = vld [vmem:[#allocation27_spill] sm:$0xff] }
 0x28f   : > { %9009 = vmatprep.subr.mxu0 %v16541_v57  ;;  %9036 = vmatprep.subr.mxu1 %v16508_v56  ;;  %16543 = vst [vmem:[#allocation16_spill] sm:$0xff] %v13870_v17  ;;  %v15725_v56 = vand.u32 4294901760, %v13836_v18  ;;  %v13889_v47 = vand.u32 4294901760, %v642_v62  ;;  %v8569_v30 = vpop.f32.mrf.mxu1  ;;  %v13945_v57 = vand.u32 4294901760, %v656_v46  ;;  %v16562_v23 = vand.u32 4294901760, %v13635_v8 }
 0x290   : > { %9010 = vmatpush3.msra.mxu0 %v16542_v14  ;;  %9037 = vmatpush3.msra.mxu1 %v16509_v19  ;;  %v8603_v19 = vpop.f32.mrf.mxu0  ;;  %v15717_v10 = vand.u32 4294901760, %v13885_v39  ;;  %v639_v14 = vld [vmem:[%s15302_s0 + $0x648] sm:$0xff] }
 0x291   : > { %9011 = vmatprep.subr.mxu0 %v16544_v53  ;;  %9038 = vmatprep.subr.mxu1 %v16510_v26  ;;  %16548 = vst [vmem:[#allocation22_spill] sm:$0xff] %v13889_v47  ;;  %v641_v26 = vld [vmem:[%s15302_s0 + $0x658] sm:$0xff]  ;;  %v13907_v44 = vsub.f32 %v13836_v18, %v15725_v56  ;;  %v13931_v41 = vsub.f32 %v642_v62, %v13889_v47  ;;  %16557 = vst [vmem:[#allocation18_spill] sm:$0xff] %v13945_v57 }
 0x292   : > { %9012 = vmatpush3.msra.mxu0 %v16546_v36  ;;  %9039 = vmatpush3.msra.mxu1 %v16511_v33  ;;  %v15718_v33 = vand.u32 4294901760, %v13865_v25  ;;  %v13922_v49 = vand.u32 4294901760, %v641_v26  ;;  %v8604_v2 = vpop.f32.mrf.mxu0  ;;  %v13963_v53 = vsub.f32 %v657_v29, %v13902_v54  ;;  %v3759_v36 = vadd.f32 %v8535_v55, %v3621_v63  ;;  %v16563_v29 = vld [vmem:[#allocation21_spill] sm:$0xff] }
 0x293   : > { %9013 = vmatprep.subr.mxu0 %v16549_v24  ;;  %9040 = vmatprep.subr.mxu1 %v16512_v32  ;;  %v13913_v32 = vsub.f32 %v659_v3, %v13870_v17  ;;  %v16554_v3 = vand.u32 4294901760, %v13541_v34  ;;  %v16555_v34 = vand.u32 4294901760, %v13622_v7 }
 0x294   : > { %9014 = vmatpush3.msra.mxu0 %v16550_v1  ;;  %9041 = vmatpush3.msra.mxu1 %v16513_v5  ;;  %v13920_v5 = vsub.f32 %v643_v42, %v13876_v52  ;;  %16553 = vst [vmem:[#allocation14_spill] sm:$0xff] %v13922_v49  ;;  %v8570_v42 = vadd.f32 %v8569_v30, %v8568_v59  ;;  %v13956_v59 = vand.u32 4294901760, %v640_v37  ;;  %v655_v30 = vld [vmem:[%s15302_s0 + $0x6c8] sm:$0xff] }
 0x295   : > { %9015 = vmatprep.subr.mxu0 %v16552_v20  ;;  %9042 = vmatprep.subr.mxu1 %v16514_v27  ;;  %v13936_v27 = vsub.f32 %v13848_v12, %v15720_v4  ;;  %v13950_v62 = vsub.f32 %v13865_v25, %v15718_v33  ;;  %v15719_v7 = vand.u32 4294901760, %v13913_v32  ;;  %v13969_v24 = vsub.f32 %v641_v26, %v13922_v49 }
 0x296   : > { %9016 = vmatpush3.msra.mxu0 %v16554_v3  ;;  %9043 = vmatpush3.msra.mxu1 %v16515_v9  ;;  %v16556_v9 = vld [vmem:[#allocation13_spill] sm:$0xff]  ;;  %16559 = vst [vmem:[#allocation24_spill] sm:$0xff] %v13956_v59  ;;  %v15722_v1 = vand.u32 4294901760, %v13920_v5  ;;  %v15721_v26 = vand.u32 4294901760, %v13940_v6  ;;  %v15723_v20 = vand.u32 4294901760, %v13931_v41  ;;  %v3867_v3 = vadd.f32 %v8570_v42, %v3759_v36  ;;  %v16567_v42 = vld [vmem:[#allocation31_spill] sm:$0xff] }
 0x297   : > { %9017 = vmatprep.subr.mxu0 %v16555_v34  ;;  %9044 = vmatprep.subr.mxu1 %v16556_v9  ;;  %v8638_v55 = vpop.f32.mrf.mxu1  ;;  %v13990_v34 = vand.u32 4294901760, %v639_v14  ;;  %v654_v9 = vld [vmem:[%s15302_s0 + $0x6c0] sm:$0xff]  ;;  %v16568_v36 = vand.u32 4294901760, %v16567_v42 }
 0x298   : > { %9018 = vmatpush3.msra.mxu0 %v16558_v13  ;;  %9045 = vmatpush3.msra.mxu1 %v13404_v35  ;;  %v8605_v35 = vadd.f32 %v8604_v2, %v8603_v19  ;;  %v13982_v19 = vsub.f32 %v13885_v39, %v15717_v10  ;;  %v16564_v2 = vld [vmem:[#allocation25_spill] sm:$0xff]  ;;  %v638_v13 = vld [vmem:[%s15302_s0 + $0x640] sm:$0xff]  ;;  %v14023_v33 = vsub.f32 %v13920_v5, %v15722_v1  ;;  %v14028_v4 = vand.u32 4294901760, %v654_v9 }
 0x299   : > { %9019 = vmatprep.subr.mxu0 %v16560_v22  ;;  %9046 = vmatprep.subr.mxu1 %v16561_v31  ;;  %v16565_v63 = vand.u32 4294901760, %v16564_v2  ;;  %16566 = vst [vmem:[#allocation4_spill] sm:$0xff] %v13990_v34  ;;  %v13999_v22 = vsub.f32 %v656_v46, %v13945_v57  ;;  %v16569_v31 = vld [vmem:[#allocation17_spill] sm:$0xff]  ;;  %v14012_v2 = vsub.f32 %v13913_v32, %v15719_v7  ;;  %v653_v46 = vld [vmem:[%s15302_s0 + $0x6b8] sm:$0xff]  ;;  %v16571_v42 = vld [vmem:[#allocation28_spill] sm:$0xff]  ;;  %v15726_v7 = vand.u32 4294901760, %v13969_v24 }
 0x29a   : > { %9020 = vmatpush3.msra.mxu0 %v16562_v23  ;;  %9047 = vmatpush3.msra.mxu1 %v16563_v29  ;;  %v14005_v23 = vsub.f32 %v640_v37, %v13956_v59  ;;  %v14007_v29 = vand.u32 4294901760, %v655_v30  ;;  %v4035_v10 = vadd.f32 %v8605_v35, %v3867_v3  ;;  %16573 = vst [vmem:[#allocation11_spill] sm:$0xff] %v14028_v4  ;;  %v14035_v35 = vand.u32 4294901760, %v638_v13 }
 0x29b   : > { %9021 = vmatprep.subr.mxu0 %v16565_v63  ;;  %9048 = vmatprep.subr.mxu1 %v13486_v28  ;;  %v8639_v28 = vpop.f32.mrf.mxu1  ;;  %v15724_v63 = vand.u32 4294901760, %v13963_v53  ;;  %v15727_v1 = vand.u32 4294901760, %v13999_v22 }
 0x29c   : > { %9022 = vmatpush3.msra.mxu0 %v16568_v36  ;;  %5755 = vmatprep.mubr.f32.mxu0 %v16569_v31  ;;  %16570 = vst [vmem:[#allocation10_spill] sm:$0xff] %v14007_v29  ;;  %v16572_v36 = vld [vmem:[#allocation35_spill] sm:$0xff]  ;;  %v8640_v37 = vadd.f32 %v8639_v28, %v8638_v55  ;;  %16574 = vst [vmem:[#allocation20_spill] sm:$0xff] %v14035_v35  ;;  %v14040_v55 = vsub.f32 %v13931_v41, %v15723_v20 }
 0x29d   : > { %9049 = vmatpush3.msra.mxu1 %v16571_v42  ;;  %5757 = vmatmul.mubr.f32.vlgmr.msra.gmra.mxu0 %v16572_v36  ;;  %v14033_v42 = vsub.f32 %v13940_v6, %v15721_v26  ;;  %v14048_v28 = vsub.f32 %v639_v14, %v13990_v34  ;;  %v14050_v26 = vand.u32 4294901760, %v653_v46  ;;  %v15728_v14 = vand.u32 4294901760, %v14005_v23 }
 0x29e   : > { %9050 = vmatprep.subr.mxu1 %v13510_v43  ;;  %9061 = vmatprep.subr.mxu0 %v13811_v38  ;;  %v637_v43 = vld [vmem:[%s15302_s0 + $0x638] sm:$0xff]  ;;  %v4139_v3 = vadd.f32 %v8640_v37, %v4035_v10  ;;  %v636_v10 = vld [vmem:[%s15302_s0 + $0x630] sm:$0xff]  ;;  %v14066_v37 = vsub.f32 %v655_v30, %v14007_v29  ;;  %v14078_v20 = vsub.f32 %v13969_v24, %v15726_v7 }
 0x29f   : > { %9051 = vmatpush3.msra.mxu1 %v13481_v48  ;;  %9062 = vmatpush3.msra.mxu0 %v13822_v15  ;;  %16575 = vst [vmem:[#allocation5_spill] sm:$0xff] %v14048_v28  ;;  %16576 = vst [vmem:[#allocation34_spill] sm:$0xff] %v14050_v26  ;;  %v14059_v48 = vsub.f32 %v13963_v53, %v15724_v63  ;;  %v14073_v56 = vand.u32 4294901760, %v637_v43  ;;  %v652_v30 = vld [vmem:[%s15302_s0 + $0x6b0] sm:$0xff]  ;;  %v14123_v40 = vsub.f32 %v14005_v23, %v15728_v14  ;;  %v633_v14 = vld [vmem:[%s15302_s0 + $0x618] sm:$0xff] }
 0x2a0   : > { %9052 = vmatprep.subr.mxu1 %v16521_v50  ;;  %9063 = vmatprep.subr.mxu0 %v13827_v0  ;;  %7593 = vst [vmem:[%s11931_s24 + $0x18] sm:$0xff] %v4139_v3  ;;  %v14087_v3 = vsub.f32 %v638_v13, %v14035_v35  ;;  %v14091_v50 = vsub.f32 %v654_v9, %v14028_v4  ;;  %v14094_v7 = vld [vmem:[%s10090_s23 + $0x30] sm:$0xff]  ;;  %v651_v13 = vld [vmem:[%s15302_s0 + $0x6a8] sm:$0xff]  ;;  %v14118_v8 = vand.u32 4294901760, %v652_v30 }
 0x2a1   : > { %9053 = vmatpush3.msra.mxu1 %v13571_v16  ;;  %9064 = vmatpush3.msra.mxu0 %v13850_v61  ;;  %16577 = vst [vmem:[#allocation8_spill] sm:$0xff] %v14073_v56  ;;  %v14103_v16 = vand.u32 4294901760, %v636_v10  ;;  %v635_v9 = vld [vmem:[%s15302_s0 + $0x628] sm:$0xff]  ;;  %v419_v63 = vrot.slane %v14094_v7, 7 }
 0x2a2   : > { %9054 = vmatprep.subr.mxu1 %v13594_v11  ;;  %9065 = vmatprep.subr.mxu0 %v13870_v17  ;;  %v14101_v11 = vsub.f32 %v13999_v22, %v15727_v1  ;;  %16579 = vst [vmem:[#allocation19_spill] sm:$0xff] %v14118_v8  ;;  %v634_v1 = vld [vmem:[%s15302_s0 + $0x620] sm:$0xff]  ;;  %v16585_v17 = vand.u32 4294901760, %v14048_v28 }
 0x2a3   : > { %9055 = vmatpush3.msra.mxu1 %v13596_v51  ;;  %9066 = vmatpush3.msra.mxu0 %v13876_v52  ;;  %v14113_v51 = vsub.f32 %v653_v46, %v14050_v26  ;;  %v14129_v46 = vsub.f32 %v637_v43, %v14073_v56  ;;  %v14145_v43 = vand.u32 4294901760, %v635_v9  ;;  %v16589_v52 = vand.u32 4294901760, %v13950_v62 }
 0x2a4   : > { %9056 = vmatprep.subr.mxu1 %v13616_v58  ;;  %9067 = vmatprep.subr.mxu0 %v13887_v45  ;;  %v650_v58 = vld [vmem:[%s15302_s0 + $0x6a0] sm:$0xff]  ;;  %v14162_v61 = vsub.f32 %v14048_v28, %v16585_v17  ;;  %v649_v45 = vld [vmem:[%s15302_s0 + $0x698] sm:$0xff]  ;;  %v14177_v17 = vand.u32 4294901760, %v634_v1  ;;  %v16591_v62 = vand.u32 4294901760, %v14091_v50 }
 0x2a5   : > { %16578 = vst [vmem:[#allocation29_spill] sm:$0xff] %v14113_v51  ;;  %9057 = vmatpush3.msra.mxu1 %v13618_v60  ;;  %5859 = vmatprep.mubr.f32.mxu1 %v16569_v31  ;;  %16580 = vst [vmem:[#allocation23_spill] sm:$0xff] %v14129_v46  ;;  %v394_v60 = vcombine.high %v16581_v21, %v16581_v21  ;;  %v14143_v31 = vand.u32 4294901760, %v651_v13  ;;  %v16584_v21 = vand.u32 4294901760, %v13907_v44  ;;  %v16586_v44 = vand.u32 4294901760, %v13936_v27 }
 0x2a6   : > { %9068 = vmatpush3.msra.mxu0 %v13889_v47  ;;  %5861 = vmatmul.mubr.f32.vlgmr.msra.gmra.mxu1 %v16572_v36  ;;  %16583 = vst [vmem:[#allocation6_spill] sm:$0xff] %v14145_v43  ;;  %v14157_v36 = vsub.f32 %v636_v10, %v14103_v16  ;;  %v16587_v10 = vand.u32 4294901760, %v14066_v37  ;;  %16588 = vst [vmem:[#allocation32_spill] sm:$0xff] %v14177_v17  ;;  %v14195_v28 = vsub.f32 %v635_v9, %v14145_v43 }
 0x2a7   : > { %16582 = vst [vmem:[#allocation12_spill] sm:$0xff] %v14143_v31  ;;  %9069 = vmatprep.subr.mxu0 %v13902_v54  ;;  %9096 = vmatprep.subr.mxu1 %v16584_v21  ;;  %v14179_v54 = vand.u32 4294901760, %v633_v14  ;;  %v436_v21 = vsel %vm429_vm0, %v394_v60, %v419_v63  ;;  %v16592_v27 = vand.u32 4294901760, %v14087_v3  ;;  %v6025_v63 = vand.u32 4294901760, %v14162_v61 }
 0x2a8   : > { %9070 = vmatpush3.msra.mxu0 %v13922_v49  ;;  %9097 = vmatpush3.msra.mxu1 %v16586_v44  ;;  %v14175_v47 = vsub.f32 %v14066_v37, %v16587_v10  ;;  %v14184_v49 = vand.u32 4294901760, %v650_v58  ;;  %v14188_v44 = vsub.f32 %v652_v30, %v14118_v8  ;;  %v16590_v10 = vand.u32 4294901760, %v13982_v19 }
 0x2a9   : > { %9071 = vmatprep.subr.mxu0 %v13945_v57  ;;  %9098 = vmatprep.subr.mxu1 %v16589_v52  ;;  %v14200_v52 = vsub.f32 %v14091_v50, %v16591_v62  ;;  %v14205_v30 = vsub.f32 %v14087_v3, %v16592_v27  ;;  %v14207_v57 = vand.u32 4294901760, %v649_v45  ;;  %v16593_v19 = vand.u32 4294901760, %v14012_v2  ;;  %v632_v27 = vld [vmem:[%s15302_s0 + $0x610] sm:$0xff] }
 0x2aa   : > { %9072 = vmatpush3.msra.mxu0 %v13956_v59  ;;  %9099 = vmatpush3.msra.mxu1 %v16590_v10  ;;  %v16594_v9 = vand.u32 4294901760, %v14113_v51  ;;  %v648_v10 = vld [vmem:[%s15302_s0 + $0x690] sm:$0xff]  ;;  %v14225_v62 = vsub.f32 %v651_v13, %v14143_v31  ;;  %v14228_v2 = vand.u32 4294901760, %v14094_v7  ;;  %v16596_v61 = vand.u32 4294901760, %v14023_v33 }
 0x2ab   : > { %9073 = vmatprep.subr.mxu0 %v14007_v29  ;;  %9100 = vmatprep.subr.mxu1 %v16593_v19  ;;  %v6137_v19 = vand.u32 4294901760, %v14175_v47  ;;  %v14238_v29 = vsub.f32 %v633_v14, %v14179_v54  ;;  %v14240_v59 = vand.u32 4294901760, %v436_v21  ;;  %v16598_v13 = vand.u32 4294901760, %v14033_v42  ;;  %v647_v14 = vld [vmem:[%s15302_s0 + $0x688] sm:$0xff] }
 0x2ac   : > { %v14216_v60 = vsub.f32 %v14113_v51, %v16594_v9  ;;  %16595 = vst [vmem:[#allocation13_spill] sm:$0xff] %v14228_v2  ;;  %9074 = vmatpush3.msra.mxu0 %v13990_v34  ;;  %9101 = vmatpush3.msra.mxu1 %v16596_v61  ;;  %v14235_v9 = vsub.f32 %v634_v1, %v14177_v17  ;;  %v16599_v34 = vand.u32 4294901760, %v14129_v46  ;;  %v631_v61 = vld [vmem:[%s15302_s0 + $0x608] sm:$0xff]  ;;  %v6032_v1 = vand.u32 4294901760, %v14205_v30 }
 0x2ad   : > { %16597 = vst [vmem:[#allocation27_spill] sm:$0xff] %v14240_v59  ;;  %9075 = vmatprep.subr.mxu0 %v14028_v4  ;;  %9102 = vmatprep.subr.mxu1 %v16598_v13  ;;  %v14259_v42 = vsub.f32 %v650_v58, %v14184_v49  ;;  %v6144_v13 = vand.u32 4294901760, %v14200_v52  ;;  %v14266_v47 = vand.u32 4294901760, %v648_v10  ;;  %v14268_v4 = vand.u32 4294901760, %v632_v27  ;;  %v630_v52 = vld [vmem:[%s15302_s0 + $0x600] sm:$0xff] }
 0x2ae   : > { %v14248_v33 = vsub.f32 %v14129_v46, %v16599_v34  ;;  %9076 = vmatpush3.msra.mxu0 %v14035_v35  ;;  %v16600_v34 = vand.u32 4294901760, %v14040_v55  ;;  %v16602_v46 = vand.u32 4294901760, %v14059_v48  ;;  %v6151_v58 = vand.u32 4294901760, %v14216_v60  ;;  %v646_v55 = vld [vmem:[%s15302_s0 + $0x680] sm:$0xff]  ;;  %6203 = vmatprep.mubr.f32.mxu1 %v14228_v2 }
 0x2af   : > { %16601 = vst [vmem:[#allocation21_spill] sm:$0xff] %v14266_v47  ;;  %9077 = vmatprep.subr.mxu0 %v14050_v26  ;;  %v14283_v30 = vsub.f32 %v14094_v7, %v14228_v2  ;;  %v16603_v48 = vand.u32 4294901760, %v14078_v20  ;;  %v14293_v60 = vand.u32 4294901760, %v631_v61  ;;  %v14297_v26 = vsub.f32 %v436_v21, %v14240_v59  ;;  %v16641_v2 = vld [vmem:[#allocation12_spill] sm:$0xff] }
 0x2b0   : > { %9103 = vmatpush3.msra.mxu1 %v16600_v34  ;;  %v14286_v34 = vsub.f32 %v649_v45, %v14207_v57  ;;  %9078 = vmatpush3.msra.mxu0 %v14073_v56  ;;  %v16604_v7 = vand.u32 4294901760, %v14101_v11  ;;  %v6039_v45 = vand.u32 4294901760, %v14248_v33  ;;  %v16605_v56 = vand.u32 4294901760, %v14188_v44 }
 0x2b1   : > { %9104 = vmatprep.subr.mxu1 %v16602_v46  ;;  %v14291_v46 = vand.u32 4294901760, %v647_v14  ;;  %9079 = vmatprep.subr.mxu0 %v14118_v8  ;;  %v16607_v21 = vand.u32 4294901760, %v14123_v40  ;;  %v14313_v8 = vand.u32 4294901760, %v646_v55  ;;  %v14315_v11 = vand.u32 4294901760, %v630_v52 }
 0x2b2   : > { %9105 = vmatpush3.msra.mxu1 %v16603_v48  ;;  %v6157_v20 = vsub.f32 %v14188_v44, %v16605_v56  ;;  %v16606_v48 = vand.u32 4294901760, %v14157_v36  ;;  %9080 = vmatpush3.msra.mxu0 %v14103_v16  ;;  %v14323_v56 = vsub.f32 %v632_v27, %v14268_v4  ;;  %v16609_v33 = vand.u32 4294901760, %v14195_v28 }
 0x2b3   : > { %9106 = vmatprep.subr.mxu1 %v16604_v7  ;;  %v14319_v7 = vsub.f32 %v648_v10, %v14266_v47  ;;  %9081 = vmatprep.subr.mxu0 %v14143_v31  ;;  %v14332_v10 = vsub.f32 %v631_v61, %v14293_v60  ;;  %v14339_v31 = vsub.f32 %v647_v14, %v14291_v46  ;;  %v16612_v14 = vand.u32 4294901760, %v14235_v9 }
 0x2b4   : > { %v6045_v51 = vsub.f32 %v14157_v36, %v16606_v48  ;;  %9107 = vmatpush3.msra.mxu1 %v16607_v21  ;;  %v16608_v48 = vand.u32 4294901760, %v14225_v62  ;;  %9082 = vmatpush3.msra.mxu0 %v14145_v43  ;;  %v16610_v21 = vand.u32 4294901760, %v14259_v42 }
 0x2b5   : > { %9108 = vmatprep.subr.mxu1 %v6137_v19  ;;  %v6052_v19 = vsub.f32 %v14195_v28, %v16609_v33  ;;  %9083 = vmatprep.subr.mxu0 %v14184_v49  ;;  %v14348_v33 = vsub.f32 %v630_v52, %v14315_v11  ;;  %v6059_v27 = vsub.f32 %v14235_v9, %v16612_v14  ;;  %v16615_v52 = vand.u32 4294901760, %v14286_v34 }
 0x2b6   : > { %v6164_v40 = vsub.f32 %v14225_v62, %v16608_v48  ;;  %9109 = vmatpush3.msra.mxu1 %v6025_v63  ;;  %v6158_v48 = vand.u32 4294901760, %v6157_v20  ;;  %v6046_v35 = vand.u32 4294901760, %v6045_v51  ;;  %v6171_v63 = vsub.f32 %v14259_v42, %v16610_v21  ;;  %9084 = vmatpush3.msra.mxu0 %v14177_v17 }
 0x2b7   : > { %9110 = vmatprep.subr.mxu1 %v6144_v13  ;;  %16611 = vst [vmem:[#allocation25_spill] sm:$0xff] %v14348_v33  ;;  %v14355_v51 = vsub.f32 %v646_v55, %v14313_v8  ;;  %9085 = vmatprep.subr.mxu0 %v14207_v57  ;;  %v16614_v21 = vand.u32 4294901760, %v14283_v30  ;;  %v6178_v61 = vsub.f32 %v14286_v34, %v16615_v52  ;;  %v6053_v14 = vand.u32 4294901760, %v6052_v19 }
 0x2b8   : > { %9111 = vmatpush3.msra.mxu1 %v6032_v1  ;;  %v6165_v20 = vand.u32 4294901760, %v6164_v40  ;;  %9086 = vmatpush3.msra.mxu0 %v14179_v54  ;;  %v16616_v55 = vand.u32 4294901760, %v14297_v26  ;;  %v6172_v40 = vand.u32 4294901760, %v6171_v63  ;;  %v16618_v19 = vand.u32 4294901760, %v14319_v7 }
 0x2b9   : > { %16613 = vst [vmem:[#allocation31_spill] sm:$0xff] %v14355_v51  ;;  %9112 = vmatprep.subr.mxu1 %v6151_v58  ;;  %v5965_v1 = vsub.f32 %v14283_v30, %v16614_v21  ;;  %9087 = vmatprep.subr.mxu0 %v14266_v47  ;;  %v16617_v21 = vand.u32 4294901760, %v14238_v29  ;;  %v15774_v58 = vand.u32 4294901760, %v14355_v51  ;;  %v6179_v63 = vand.u32 4294901760, %v6178_v61 }
 0x2ba   : > { %9113 = vmatpush3.msra.mxu1 %v6039_v45  ;;  %v5971_v13 = vsub.f32 %v14297_v26, %v16616_v55  ;;  %9088 = vmatpush3.msra.mxu0 %v14268_v4  ;;  %v6060_v45 = vand.u32 4294901760, %v6059_v27  ;;  %v6185_v55 = vsub.f32 %v14319_v7, %v16618_v19  ;;  %v16619_v47 = vand.u32 4294901760, %v14323_v56 }
 0x2bb   : > { %9114 = vmatprep.subr.mxu1 %v6158_v48  ;;  %v6066_v52 = vsub.f32 %v14238_v29, %v16617_v21  ;;  %9089 = vmatprep.subr.mxu0 %v14291_v46  ;;  %v5966_v48 = vand.u32 4294901760, %v5965_v1  ;;  %v15773_v17 = vand.u32 4294901760, %v14348_v33  ;;  %v16620_v27 = vand.u32 4294901760, %v14339_v31 }
 0x2bc   : > { %9115 = vmatpush3.msra.mxu1 %v6046_v35  ;;  %v6073_v21 = vsub.f32 %v14323_v56, %v16619_v47  ;;  %9090 = vmatpush3.msra.mxu0 %v14293_v60  ;;  %v5972_v35 = vand.u32 4294901760, %v5971_v13  ;;  %v16621_v61 = vand.u32 4294901760, %v14332_v10  ;;  %v6186_v47 = vand.u32 4294901760, %v6185_v55 }
 0x2bd   : > { %9116 = vmatprep.subr.mxu1 %v6165_v20  ;;  %v6192_v19 = vsub.f32 %v14339_v31, %v16620_v27  ;;  %9091 = vmatprep.subr.mxu0 %v14313_v8  ;;  %v6067_v20 = vand.u32 4294901760, %v6066_v52  ;;  %v6199_v13 = vsub.f32 %v14355_v51, %v15774_v58  ;;  %v16625_v27 = vld [vmem:[#allocation26_spill] sm:$0xff]  ;;  %v16639_v58 = vld [vmem:[#allocation8_spill] sm:$0xff] }
 0x2be   : > { %9117 = vmatpush3.msra.mxu1 %v6053_v14  ;;  %v6080_v1 = vsub.f32 %v14332_v10, %v16621_v61  ;;  %9092 = vmatpush3.msra.mxu0 %v14315_v11  ;;  %v6074_v14 = vand.u32 4294901760, %v6073_v21  ;;  %v16623_v21 = vld [vmem:[#allocation16_spill] sm:$0xff]  ;;  %v16628_v61 = vld [vmem:[#allocation29_spill] sm:$0xff] }
 0x2bf   : > { %9118 = vmatprep.subr.mxu1 %v6172_v40  ;;  %5967 = vmatprep.mubr.f32.mxu0 %v5966_v48  ;;  %v6087_v40 = vsub.f32 %v14348_v33, %v15773_v17  ;;  %v6193_v52 = vand.u32 4294901760, %v6192_v19  ;;  %v6200_v55 = vand.u32 4294901760, %v6199_v13  ;;  %v16626_v19 = vld [vmem:[#allocation30_spill] sm:$0xff] }
 0x2c0   : > { %9119 = vmatpush3.msra.mxu1 %v6060_v45  ;;  %9131 = vmatprep.subr.mxu0 %v13836_v18  ;;  %v6081_v45 = vand.u32 4294901760, %v6080_v1  ;;  %v16629_v1 = vld [vmem:[#allocation9_spill] sm:$0xff]  ;;  %v16631_v13 = vld [vmem:[#allocation14_spill] sm:$0xff] }
 0x2c1   : > { %9120 = vmatprep.subr.mxu1 %v6179_v63  ;;  %5973 = vmatmul.mubr.f32.vlgmr.msra.gmra.mxu0 %v5972_v35  ;;  %v6088_v48 = vand.u32 4294901760, %v6087_v40  ;;  %v16622_v63 = vld [vmem:[#allocation7_spill] sm:$0xff]  ;;  %v16624_v35 = vld [vmem:[#allocation5_spill] sm:$0xff]  ;;  %v16633_v40 = vld [vmem:[#allocation24_spill] sm:$0xff] }
 0x2c2   : > { %9121 = vmatpush3.msra.mxu1 %v6067_v20  ;;  %9132 = vmatpush3.msra.mxu0 %v13848_v12  ;;  %v16627_v20 = vld [vmem:[#allocation22_spill] sm:$0xff] }
 0x2c3   : > { %9122 = vmatprep.subr.mxu1 %v6186_v47  ;;  %9133 = vmatprep.subr.mxu0 %v13865_v25  ;;  %v16630_v47 = vld [vmem:[#allocation23_spill] sm:$0xff]  ;;  %v16638_v17 = vld [vmem:[#allocation34_spill] sm:$0xff] }
 0x2c4   : > { %9123 = vmatpush3.msra.mxu1 %v6074_v14  ;;  %9134 = vmatpush3.msra.mxu0 %v13885_v39  ;;  %v16632_v14 = vld [vmem:[#allocation18_spill] sm:$0xff] }
 0x2c5   : > { %9124 = vmatprep.subr.mxu1 %v6193_v52  ;;  %9135 = vmatprep.subr.mxu0 %v13913_v32  ;;  %v16634_v52 = vld [vmem:[#allocation10_spill] sm:$0xff] }
 0x2c6   : > { %9125 = vmatpush3.msra.mxu1 %v6081_v45  ;;  %9136 = vmatpush3.msra.mxu0 %v13920_v5  ;;  %v16635_v45 = vld [vmem:[#allocation4_spill] sm:$0xff] }
 0x2c7   : > { %9126 = vmatprep.subr.mxu1 %v6200_v55  ;;  %9137 = vmatprep.subr.mxu0 %v13940_v6  ;;  %v16636_v55 = vld [vmem:[#allocation11_spill] sm:$0xff] }
 0x2c8   : > { %9127 = vmatpush3.msra.mxu1 %v6088_v48  ;;  %9138 = vmatpush3.msra.mxu0 %v13931_v41  ;;  %v16637_v48 = vld [vmem:[#allocation20_spill] sm:$0xff] }
 0x2c9   : > { %6205 = vmatmul.mubr.f32.vlgmr.msra.gmra.mxu1 %v14240_v59  ;;  %9139 = vmatprep.subr.mxu0 %v13963_v53  ;;  %v16640_v59 = vld [vmem:[#allocation19_spill] sm:$0xff] }
 0x2ca   : > { %9166 = vmatprep.subr.mxu1 %v13811_v38  ;;  %9140 = vmatpush3.msra.mxu0 %v13969_v24 }
 0x2cb   : > { %9167 = vmatpush3.msra.mxu1 %v13822_v15  ;;  %9141 = vmatprep.subr.mxu0 %v13999_v22 }
 0x2cc   : > { %9168 = vmatprep.subr.mxu1 %v13827_v0  ;;  %9142 = vmatpush3.msra.mxu0 %v14005_v23 }
 0x2cd   : > { %9169 = vmatpush3.msra.mxu1 %v16622_v63  ;;  %9143 = vmatprep.subr.mxu0 %v14066_v37 }
 0x2ce   : > { %9170 = vmatprep.subr.mxu1 %v16623_v21  ;;  %9144 = vmatpush3.msra.mxu0 %v16624_v35 }
 0x2cf   : > { %9171 = vmatpush3.msra.mxu1 %v16625_v27  ;;  %9145 = vmatprep.subr.mxu0 %v14091_v50 }
 0x2d0   : > { %9172 = vmatprep.subr.mxu1 %v16626_v19  ;;  %9146 = vmatpush3.msra.mxu0 %v14087_v3 }
 0x2d1   : > { %9173 = vmatpush3.msra.mxu1 %v16627_v20  ;;  %9147 = vmatprep.subr.mxu0 %v16628_v61 }
 0x2d2   : > { %9174 = vmatprep.subr.mxu1 %v16629_v1  ;;  %9148 = vmatpush3.msra.mxu0 %v16630_v47 }
 0x2d3   : > { %9175 = vmatpush3.msra.mxu1 %v16631_v13  ;;  %9149 = vmatprep.subr.mxu0 %v14188_v44 }
 0x2d4   : > { %9176 = vmatprep.subr.mxu1 %v16632_v14  ;;  %9150 = vmatpush3.msra.mxu0 %v14157_v36 }
 0x2d5   : > { %9177 = vmatpush3.msra.mxu1 %v16633_v40  ;;  %9151 = vmatprep.subr.mxu0 %v14225_v62 }
 0x2d6   : > { %9178 = vmatprep.subr.mxu1 %v16634_v52  ;;  %9152 = vmatpush3.msra.mxu0 %v14195_v28 }
 0x2d7   : > { %9179 = vmatpush3.msra.mxu1 %v16635_v45  ;;  %9153 = vmatprep.subr.mxu0 %v14259_v42 }
 0x2d8   : > { %9180 = vmatprep.subr.mxu1 %v16636_v55  ;;  %9154 = vmatpush3.msra.mxu0 %v14235_v9 }
 0x2d9   : > { %9181 = vmatpush3.msra.mxu1 %v16637_v48  ;;  %9155 = vmatprep.subr.mxu0 %v14286_v34 }
 0x2da   : > { %9182 = vmatprep.subr.mxu1 %v16638_v17  ;;  %9156 = vmatpush3.msra.mxu0 %v14238_v29 }
 0x2db   : > { %9183 = vmatpush3.msra.mxu1 %v16639_v58  ;;  %9157 = vmatprep.subr.mxu0 %v14319_v7 }
 0x2dc   : > { %9184 = vmatprep.subr.mxu1 %v16640_v59  ;;  %9158 = vmatpush3.msra.mxu0 %v14323_v56  ;;  %v16642_v59 = vld [vmem:[#allocation32_spill] sm:$0xff] }
 0x2dd   : > { %9185 = vmatpush3.msra.mxu1 %v14103_v16  ;;  %9159 = vmatprep.subr.mxu0 %v14339_v31 }
 0x2de   : > { %9186 = vmatprep.subr.mxu1 %v16641_v2  ;;  %9160 = vmatpush3.msra.mxu0 %v14332_v10  ;;  %v16643_v2 = vand.u32 4294901760, %v13836_v18  ;;  %v16648_v18 = vand.u32 4294901760, %v13913_v32  ;;  %v16653_v32 = vand.u32 4294901760, %v14297_v26 }
 0x2df   : > { %9187 = vmatpush3.msra.mxu1 %v14145_v43  ;;  %9161 = vmatprep.subr.mxu0 %v14355_v51  ;;  %v16644_v43 = vand.u32 4294901760, %v13848_v12  ;;  %v16645_v51 = vld [vmem:[#allocation21_spill] sm:$0xff]  ;;  %v16649_v12 = vand.u32 4294901760, %v13920_v5  ;;  %v693_v5 = vld [vmem:[%s15302_s0 + $0x7f8] sm:$0xff] }
 0x2e0   : > { %9188 = vmatprep.subr.mxu1 %v14184_v49  ;;  %9162 = vmatpush3.msra.mxu0 %v14348_v33  ;;  %v16646_v33 = vand.u32 4294901760, %v13865_v25  ;;  %v16650_v25 = vand.u32 4294901760, %v13940_v6  ;;  %v14494_v6 = vpop.f32.mrf.mxu0 }
 0x2e1   : > { %6340 = vmatprep.mubr.f32.mxu0 %v14283_v30  ;;  %9189 = vmatpush3.msra.mxu1 %v16642_v59  ;;  %v16647_v59 = vand.u32 4294901760, %v13885_v39  ;;  %v16651_v39 = vand.u32 4294901760, %v14283_v30  ;;  %v16659_v30 = vand.u32 4294901760, %v16624_v35 }
 0x2e2   : > { %6343 = vmatmul.mubr.f32.vlgmr.msra.gmra.mxu0 %v14297_v26  ;;  %9190 = vmatprep.subr.mxu1 %v14207_v57  ;;  %v14508_v26 = vand.u32 4294901760, %v693_v5 }
 0x2e3   : > { %9201 = vmatprep.subr.mxu0 %v16643_v2  ;;  %9191 = vmatpush3.msra.mxu1 %v14179_v54  ;;  %v16655_v2 = vand.u32 4294901760, %v13969_v24  ;;  %v16658_v24 = vand.u32 4294901760, %v14066_v37  ;;  %v676_v37 = vld [vmem:[%s15302_s0 + $0x770] sm:$0xff] }
 0x2e4   : > { %9202 = vmatpush3.msra.mxu0 %v16644_v43  ;;  %9192 = vmatprep.subr.mxu1 %v16645_v51  ;;  %v16654_v43 = vand.u32 4294901760, %v13963_v53  ;;  %v16657_v53 = vand.u32 4294901760, %v14005_v23  ;;  %v14533_v35 = vsub.f32 %v693_v5, %v14508_v26 }
 0x2e5   : > { %9203 = vmatprep.subr.mxu0 %v16646_v33  ;;  %9193 = vmatpush3.msra.mxu1 %v14268_v4  ;;  %v16660_v33 = vand.u32 4294901760, %v14091_v50  ;;  %v16662_v50 = vand.u32 4294901760, %v16628_v61  ;;  %v675_v61 = vld [vmem:[%s15302_s0 + $0x768] sm:$0xff] }
 0x2e6   : > { %9204 = vmatpush3.msra.mxu0 %v16647_v59  ;;  %9194 = vmatprep.subr.mxu1 %v14291_v46  ;;  %v16652_v59 = vand.u32 4294901760, %v13931_v41  ;;  %v16656_v41 = vand.u32 4294901760, %v13999_v22  ;;  %v8708_v22 = vpop.f32.mrf.mxu1  ;;  %v14573_v5 = vand.u32 4294901760, %v675_v61 }
 0x2e7   : > { %9205 = vmatprep.subr.mxu0 %v16648_v18  ;;  %9195 = vmatpush3.msra.mxu1 %v14293_v60  ;;  %v16661_v18 = vand.u32 4294901760, %v14087_v3 }
 0x2e8   : > { %9206 = vmatpush3.msra.mxu0 %v16649_v12  ;;  %9196 = vmatprep.subr.mxu1 %v14313_v8  ;;  %v16663_v12 = vand.u32 4294901760, %v16630_v47  ;;  %v690_v47 = vld [vmem:[%s15302_s0 + $0x7e0] sm:$0xff]  ;;  %16669 = vst [vmem:[#allocation35_spill] sm:$0xff] %v14573_v5 }
 0x2e9   : > { %9207 = vmatprep.subr.mxu0 %v16650_v25  ;;  %9197 = vmatpush3.msra.mxu1 %v14315_v11 }
 0x2ea   : > { %6447 = vmatprep.mubr.f32.mxu1 %v16651_v39  ;;  %9208 = vmatpush3.msra.mxu0 %v16652_v59 }
 0x2eb   : > { %6451 = vmatmul.mubr.f32.vlgmr.msra.gmra.mxu1 %v16653_v32  ;;  %9209 = vmatprep.subr.mxu0 %v16654_v43  ;;  %v16666_v32 = vand.u32 4294901760, %v14157_v36  ;;  %v16668_v43 = vand.u32 4294901760, %v14225_v62  ;;  %v16670_v36 = vand.u32 4294901760, %v14195_v28  ;;  %v16673_v28 = vand.u32 4294901760, %v14259_v42  ;;  %v688_v42 = vld [vmem:[%s15302_s0 + $0x7d0] sm:$0xff] }
 0x2ec   : > { %9236 = vmatprep.subr.mxu1 %v13811_v38  ;;  %9210 = vmatpush3.msra.mxu0 %v16655_v2  ;;  %v677_v38 = vld [vmem:[%s15302_s0 + $0x778] sm:$0xff] }
 0x2ed   : > { %9237 = vmatpush3.msra.mxu1 %v13822_v15  ;;  %9211 = vmatprep.subr.mxu0 %v16656_v41  ;;  %v692_v15 = vld [vmem:[%s15302_s0 + $0x7f0] sm:$0xff]  ;;  %v14519_v23 = vand.u32 4294901760, %v677_v38  ;;  %v689_v2 = vld [vmem:[%s15302_s0 + $0x7d8] sm:$0xff] }
 0x2ee   : > { %9238 = vmatprep.subr.mxu1 %v13827_v0  ;;  %9212 = vmatpush3.msra.mxu0 %v16657_v53  ;;  %v8674_v0 = vpop.f32.mrf.mxu0 }
 0x2ef   : > { %9239 = vmatpush3.msra.mxu1 %v16622_v63  ;;  %9213 = vmatprep.subr.mxu0 %v16658_v24  ;;  %v14524_v63 = vand.u32 4294901760, %v692_v15  ;;  %v14545_v3 = vsub.f32 %v677_v38, %v14519_v23  ;;  %v14584_v38 = vand.u32 4294901760, %v690_v47 }
 0x2f0   : > { %9240 = vmatprep.subr.mxu1 %v16623_v21  ;;  %9214 = vmatpush3.msra.mxu0 %v16659_v30  ;;  %v8743_v21 = vpop.f32.mrf.mxu0  ;;  %v16674_v30 = vand.u32 4294901760, %v14235_v9 }
 0x2f1   : > { %9241 = vmatpush3.msra.mxu1 %v16625_v27  ;;  %9215 = vmatprep.subr.mxu0 %v16660_v33  ;;  %v691_v27 = vld [vmem:[%s15302_s0 + $0x7e8] sm:$0xff]  ;;  %v14562_v25 = vsub.f32 %v692_v15, %v14524_v63  ;;  %16671 = vst [vmem:[#allocation33_spill] sm:$0xff] %v14584_v38  ;;  %v15785_v53 = vand.u32 4294901760, %v14545_v3  ;;  %v14599_v33 = vand.u32 4294901760, %v689_v2 }
 0x2f2   : > { %9242 = vmatprep.subr.mxu1 %v16626_v19  ;;  %9216 = vmatpush3.msra.mxu0 %v16661_v18  ;;  %v8709_v19 = vpop.f32.mrf.mxu1  ;;  %v8744_v39 = vpop.f32.mrf.mxu0  ;;  %v16676_v18 = vand.u32 4294901760, %v14286_v34 }
 0x2f3   : > { %9243 = vmatpush3.msra.mxu1 %v16627_v20  ;;  %9217 = vmatprep.subr.mxu0 %v16662_v50  ;;  %v14547_v20 = vand.u32 4294901760, %v676_v37  ;;  %v8710_v15 = vadd.f32 %v8709_v19, %v8708_v22  ;;  %16675 = vst [vmem:[#allocation16_spill] sm:$0xff] %v14599_v33  ;;  %v8675_v22 = vadd.f32 %v8674_v0, %v14494_v6  ;;  %v672_v19 = vld [vmem:[%s15302_s0 + $0x750] sm:$0xff] }
 0x2f4   : > { %9244 = vmatprep.subr.mxu1 %v16629_v1  ;;  %9218 = vmatpush3.msra.mxu0 %v16663_v12  ;;  %v16665_v1 = vand.u32 4294901760, %v14188_v44  ;;  %v8778_v59 = vpop.f32.mrf.mxu1  ;;  %v14567_v44 = vand.u32 4294901760, %v691_v27  ;;  %v8745_v9 = vadd.f32 %v8744_v39, %v8743_v21  ;;  %v14637_v21 = vsub.f32 %v690_v47, %v14584_v38  ;;  %v16705_v47 = vld [vmem:[#allocation15_spill] sm:$0xff] }
 0x2f5   : > { %9245 = vmatpush3.msra.mxu1 %v16631_v13  ;;  %16664 = vst [vmem:[#allocation17_spill] sm:$0xff] %v14547_v20  ;;  %v674_v13 = vld [vmem:[%s15302_s0 + $0x760] sm:$0xff]  ;;  %v14582_v41 = vsub.f32 %v676_v37, %v14547_v20  ;;  %v4483_v12 = vadd.f32 %v8710_v15, %v8675_v22  ;;  %v16682_v39 = vand.u32 4294901760, %v14323_v56  ;;  %v16684_v15 = vand.u32 4294901760, %v14339_v31 }
 0x2f6   : > { %9219 = vmatprep.subr.mxu0 %v16665_v1  ;;  %9246 = vmatprep.subr.mxu1 %v16632_v14  ;;  %16667 = vst [vmem:[#allocation28_spill] sm:$0xff] %v14567_v44  ;;  %v15790_v14 = vand.u32 4294901760, %v14533_v35  ;;  %v14586_v62 = vand.u32 4294901760, %v674_v13  ;;  %v8779_v24 = vpop.f32.mrf.mxu1  ;;  %v14642_v1 = vand.u32 4294901760, %v688_v42  ;;  %v16685_v56 = vld [vmem:[#allocation12_spill] sm:$0xff]  ;;  %v16686_v22 = vand.u32 4294901760, %v14332_v10 }
 0x2f7   : > { %9220 = vmatpush3.msra.mxu0 %v16666_v32  ;;  %9247 = vmatpush3.msra.mxu1 %v16633_v40  ;;  %v8813_v40 = vpop.f32.mrf.mxu0  ;;  %v15782_v0 = vand.u32 4294901760, %v14582_v41  ;;  %v671_v32 = vld [vmem:[%s15302_s0 + $0x748] sm:$0xff] }
 0x2f8   : > { %9221 = vmatprep.subr.mxu0 %v16668_v43  ;;  %9248 = vmatprep.subr.mxu1 %v16634_v52  ;;  %16672 = vst [vmem:[#allocation7_spill] sm:$0xff] %v14586_v62  ;;  %v673_v52 = vld [vmem:[%s15302_s0 + $0x758] sm:$0xff]  ;;  %v14604_v37 = vsub.f32 %v14533_v35, %v15790_v14  ;;  %v14628_v34 = vsub.f32 %v674_v13, %v14586_v62  ;;  %16681 = vst [vmem:[#allocation26_spill] sm:$0xff] %v14642_v1 }
 0x2f9   : > { %9222 = vmatpush3.msra.mxu0 %v16670_v36  ;;  %9249 = vmatpush3.msra.mxu1 %v16635_v45  ;;  %v15783_v45 = vand.u32 4294901760, %v14562_v25  ;;  %v14619_v50 = vand.u32 4294901760, %v673_v52  ;;  %v8814_v6 = vpop.f32.mrf.mxu0  ;;  %v14660_v43 = vsub.f32 %v689_v2, %v14599_v33  ;;  %v4621_v36 = vadd.f32 %v8745_v9, %v4483_v12  ;;  %v16687_v2 = vld [vmem:[#allocation6_spill] sm:$0xff] }
 0x2fa   : > { %9223 = vmatprep.subr.mxu0 %v16673_v28  ;;  %9250 = vmatprep.subr.mxu1 %v16636_v55  ;;  %v14610_v55 = vsub.f32 %v691_v27, %v14567_v44  ;;  %v16678_v27 = vand.u32 4294901760, %v14238_v29  ;;  %v16679_v29 = vand.u32 4294901760, %v14319_v7 }
 0x2fb   : > { %9224 = vmatpush3.msra.mxu0 %v16674_v30  ;;  %9251 = vmatpush3.msra.mxu1 %v16637_v48  ;;  %v14617_v48 = vsub.f32 %v675_v61, %v14573_v5  ;;  %16677 = vst [vmem:[#allocation5_spill] sm:$0xff] %v14619_v50  ;;  %v8780_v61 = vadd.f32 %v8779_v24, %v8778_v59  ;;  %v14653_v59 = vand.u32 4294901760, %v672_v19  ;;  %v687_v24 = vld [vmem:[%s15302_s0 + $0x7c8] sm:$0xff] }
 0x2fc   : > { %9225 = vmatprep.subr.mxu0 %v16676_v18  ;;  %9252 = vmatprep.subr.mxu1 %v16638_v17  ;;  %v14633_v17 = vsub.f32 %v14545_v3, %v15785_v53  ;;  %v14647_v13 = vsub.f32 %v14562_v25, %v15783_v45  ;;  %v15784_v7 = vand.u32 4294901760, %v14610_v55  ;;  %v14666_v28 = vsub.f32 %v673_v52, %v14619_v50 }
 0x2fd   : > { %9226 = vmatpush3.msra.mxu0 %v16678_v27  ;;  %9253 = vmatpush3.msra.mxu1 %v16639_v58  ;;  %v16680_v58 = vld [vmem:[#allocation19_spill] sm:$0xff]  ;;  %16683 = vst [vmem:[#allocation30_spill] sm:$0xff] %v14653_v59  ;;  %v15787_v30 = vand.u32 4294901760, %v14617_v48  ;;  %v15786_v52 = vand.u32 4294901760, %v14637_v21  ;;  %v15788_v18 = vand.u32 4294901760, %v14628_v34  ;;  %v4729_v27 = vadd.f32 %v8780_v61, %v4621_v36  ;;  %v16691_v61 = vld [vmem:[#allocation25_spill] sm:$0xff] }
 0x2fe   : > { %9227 = vmatprep.subr.mxu0 %v16679_v29  ;;  %9254 = vmatprep.subr.mxu1 %v16680_v58  ;;  %v14687_v29 = vand.u32 4294901760, %v671_v32  ;;  %v686_v58 = vld [vmem:[%s15302_s0 + $0x7c0] sm:$0xff]  ;;  %v16692_v36 = vand.u32 4294901760, %v16691_v61 }
 0x2ff   : > { %9228 = vmatpush3.msra.mxu0 %v16682_v39  ;;  %9255 = vmatpush3.msra.mxu1 %v14103_v16  ;;  %v8815_v16 = vadd.f32 %v8814_v6, %v8813_v40  ;;  %v8848_v9 = vpop.f32.mrf.mxu1  ;;  %v14679_v40 = vsub.f32 %v14582_v41, %v15782_v0  ;;  %v16688_v6 = vld [vmem:[#allocation31_spill] sm:$0xff]  ;;  %v670_v39 = vld [vmem:[%s15302_s0 + $0x740] sm:$0xff]  ;;  %v14720_v45 = vsub.f32 %v14617_v48, %v15787_v30  ;;  %v14725_v53 = vand.u32 4294901760, %v686_v58 }
 0x300   : > { %9229 = vmatprep.subr.mxu0 %v16684_v15  ;;  %9256 = vmatprep.subr.mxu1 %v16685_v56  ;;  %v16689_v12 = vand.u32 4294901760, %v16688_v6  ;;  %16690 = vst [vmem:[#allocation22_spill] sm:$0xff] %v14687_v29  ;;  %v14696_v15 = vsub.f32 %v688_v42, %v14642_v1  ;;  %v16693_v56 = vld [vmem:[#allocation13_spill] sm:$0xff]  ;;  %v14709_v6 = vsub.f32 %v14610_v55, %v15784_v7  ;;  %v685_v42 = vld [vmem:[%s15302_s0 + $0x7b8] sm:$0xff]  ;;  %v16695_v61 = vld [vmem:[#allocation32_spill] sm:$0xff]  ;;  %v15791_v7 = vand.u32 4294901760, %v14666_v28 }
 0x301   : > { %9230 = vmatpush3.msra.mxu0 %v16686_v22  ;;  %9257 = vmatpush3.msra.mxu1 %v16687_v2  ;;  %v14702_v22 = vsub.f32 %v672_v19, %v14653_v59  ;;  %v14704_v2 = vand.u32 4294901760, %v687_v24  ;;  %v4897_v0 = vadd.f32 %v8815_v16, %v4729_v27  ;;  %16697 = vst [vmem:[#allocation9_spill] sm:$0xff] %v14725_v53  ;;  %v14732_v16 = vand.u32 4294901760, %v670_v39 }
 0x302   : > { %9231 = vmatprep.subr.mxu0 %v16689_v12  ;;  %9258 = vmatprep.subr.mxu1 %v14184_v49  ;;  %v8849_v49 = vpop.f32.mrf.mxu1  ;;  %v15789_v12 = vand.u32 4294901760, %v14660_v43  ;;  %v15792_v30 = vand.u32 4294901760, %v14696_v15 }
 0x303   : > { %9232 = vmatpush3.msra.mxu0 %v16692_v36  ;;  %6617 = vmatprep.mubr.f32.mxu0 %v16693_v56  ;;  %16694 = vst [vmem:[#allocation29_spill] sm:$0xff] %v14704_v2  ;;  %v16696_v36 = vld [vmem:[#allocation27_spill] sm:$0xff]  ;;  %v8850_v19 = vadd.f32 %v8849_v49, %v8848_v9  ;;  %16698 = vst [vmem:[#allocation23_spill] sm:$0xff] %v14732_v16  ;;  %v14737_v9 = vsub.f32 %v14628_v34, %v15788_v18 }
 0x304   : > { %9259 = vmatpush3.msra.mxu1 %v16695_v61  ;;  %6619 = vmatmul.mubr.f32.vlgmr.msra.gmra.mxu0 %v16696_v36  ;;  %v14730_v61 = vsub.f32 %v14637_v21, %v15786_v52  ;;  %v14745_v49 = vsub.f32 %v671_v32, %v14687_v29  ;;  %v14747_v52 = vand.u32 4294901760, %v685_v42  ;;  %v15793_v32 = vand.u32 4294901760, %v14702_v22 }
 0x305   : > { %9260 = vmatprep.subr.mxu1 %v14207_v57  ;;  %9271 = vmatprep.subr.mxu0 %v14508_v26  ;;  %v669_v57 = vld [vmem:[%s15302_s0 + $0x738] sm:$0xff]  ;;  %v5001_v27 = vadd.f32 %v8850_v19, %v4897_v0  ;;  %v668_v0 = vld [vmem:[%s15302_s0 + $0x730] sm:$0xff]  ;;  %v14763_v19 = vsub.f32 %v687_v24, %v14704_v2  ;;  %v14775_v18 = vsub.f32 %v14666_v28, %v15791_v7 }
 0x306   : > { %9261 = vmatpush3.msra.mxu1 %v14179_v54  ;;  %9272 = vmatpush3.msra.mxu0 %v14519_v23  ;;  %16699 = vst [vmem:[#allocation14_spill] sm:$0xff] %v14745_v49  ;;  %16700 = vst [vmem:[#allocation18_spill] sm:$0xff] %v14747_v52  ;;  %v14756_v54 = vsub.f32 %v14660_v43, %v15789_v12  ;;  %v14770_v14 = vand.u32 4294901760, %v669_v57  ;;  %v684_v24 = vld [vmem:[%s15302_s0 + $0x7b0] sm:$0xff]  ;;  %v14791_v7 = vld [vmem:[%s10090_s23 + $0x38] sm:$0xff]  ;;  %v14820_v31 = vsub.f32 %v14702_v22, %v15793_v32 }
 0x307   : > { %9262 = vmatprep.subr.mxu1 %v16645_v51  ;;  %9273 = vmatprep.subr.mxu0 %v14524_v63  ;;  %7594 = vst [vmem:[%s11931_s24 + $0x20] sm:$0xff] %v5001_v27  ;;  %v14784_v27 = vsub.f32 %v670_v39, %v14732_v16  ;;  %v14788_v51 = vsub.f32 %v686_v58, %v14725_v53  ;;  %v683_v39 = vld [vmem:[%s15302_s0 + $0x7a8] sm:$0xff]  ;;  %v14815_v10 = vand.u32 4294901760, %v684_v24  ;;  %v665_v32 = vld [vmem:[%s15302_s0 + $0x718] sm:$0xff]  ;;  %v420_v12 = vrot.slane %v14791_v7, 7 }
 0x308   : > { %9263 = vmatpush3.msra.mxu1 %v14268_v4  ;;  %9274 = vmatpush3.msra.mxu0 %v14547_v20  ;;  %16701 = vst [vmem:[#allocation24_spill] sm:$0xff] %v14770_v14  ;;  %v14800_v4 = vand.u32 4294901760, %v668_v0  ;;  %v667_v58 = vld [vmem:[%s15302_s0 + $0x728] sm:$0xff] }
 0x309   : > { %9264 = vmatprep.subr.mxu1 %v14291_v46  ;;  %9275 = vmatprep.subr.mxu0 %v14567_v44  ;;  %v14798_v46 = vsub.f32 %v14696_v15, %v15792_v30  ;;  %16703 = vst [vmem:[#allocation4_spill] sm:$0xff] %v14815_v10  ;;  %v666_v30 = vld [vmem:[%s15302_s0 + $0x720] sm:$0xff]  ;;  %v16709_v44 = vand.u32 4294901760, %v14745_v49 }
 0x30a   : > { %9265 = vmatpush3.msra.mxu1 %v14293_v60  ;;  %9276 = vmatpush3.msra.mxu0 %v14573_v5  ;;  %v14810_v60 = vsub.f32 %v685_v42, %v14747_v52  ;;  %v14826_v42 = vsub.f32 %v669_v57, %v14770_v14  ;;  %v14842_v57 = vand.u32 4294901760, %v667_v58  ;;  %v16713_v5 = vand.u32 4294901760, %v14647_v13 }
 0x30b   : > { %9266 = vmatprep.subr.mxu1 %v14313_v8  ;;  %9277 = vmatprep.subr.mxu0 %v14584_v38  ;;  %v682_v8 = vld [vmem:[%s15302_s0 + $0x7a0] sm:$0xff]  ;;  %v14859_v20 = vsub.f32 %v14745_v49, %v16709_v44  ;;  %v681_v38 = vld [vmem:[%s15302_s0 + $0x798] sm:$0xff]  ;;  %v14874_v44 = vand.u32 4294901760, %v666_v30  ;;  %v16715_v13 = vand.u32 4294901760, %v14788_v51 }
 0x30c   : > { %16702 = vst [vmem:[#allocation10_spill] sm:$0xff] %v14810_v60  ;;  %9267 = vmatpush3.msra.mxu1 %v14315_v11  ;;  %6721 = vmatprep.mubr.f32.mxu1 %v16693_v56  ;;  %16704 = vst [vmem:[#allocation11_spill] sm:$0xff] %v14826_v42  ;;  %v396_v11 = vcombine.high %v16705_v47, %v16705_v47  ;;  %v14840_v56 = vand.u32 4294901760, %v683_v39  ;;  %v16708_v47 = vand.u32 4294901760, %v14604_v37  ;;  %v16710_v37 = vand.u32 4294901760, %v14633_v17 }
 0x30d   : > { %9278 = vmatpush3.msra.mxu0 %v14586_v62  ;;  %6723 = vmatmul.mubr.f32.vlgmr.msra.gmra.mxu1 %v16696_v36  ;;  %16707 = vst [vmem:[#allocation34_spill] sm:$0xff] %v14842_v57  ;;  %v14854_v36 = vsub.f32 %v668_v0, %v14800_v4  ;;  %v16711_v0 = vand.u32 4294901760, %v14763_v19  ;;  %16712 = vst [vmem:[#allocation8_spill] sm:$0xff] %v14874_v44  ;;  %v14892_v49 = vsub.f32 %v667_v58, %v14842_v57 }
 0x30e   : > { %16706 = vst [vmem:[#allocation20_spill] sm:$0xff] %v14840_v56  ;;  %9279 = vmatprep.subr.mxu0 %v14599_v33  ;;  %9306 = vmatprep.subr.mxu1 %v16708_v47  ;;  %v14876_v33 = vand.u32 4294901760, %v665_v32  ;;  %v437_v47 = vsel %vm429_vm0, %v396_v11, %v420_v12  ;;  %v16716_v17 = vand.u32 4294901760, %v14784_v27  ;;  %v6887_v12 = vand.u32 4294901760, %v14859_v20 }
 0x30f   : > { %9280 = vmatpush3.msra.mxu0 %v14619_v50  ;;  %9307 = vmatpush3.msra.mxu1 %v16710_v37  ;;  %v14872_v62 = vsub.f32 %v14763_v19, %v16711_v0  ;;  %v14881_v50 = vand.u32 4294901760, %v682_v8  ;;  %v14885_v37 = vsub.f32 %v684_v24, %v14815_v10  ;;  %v16714_v0 = vand.u32 4294901760, %v14679_v40 }
 0x310   : > { %9281 = vmatprep.subr.mxu0 %v14642_v1  ;;  %9308 = vmatprep.subr.mxu1 %v16713_v5  ;;  %v14897_v5 = vsub.f32 %v14788_v51, %v16715_v13  ;;  %v14902_v24 = vsub.f32 %v14784_v27, %v16716_v17  ;;  %v14904_v1 = vand.u32 4294901760, %v681_v38  ;;  %v16717_v40 = vand.u32 4294901760, %v14709_v6  ;;  %v664_v17 = vld [vmem:[%s15302_s0 + $0x710] sm:$0xff] }
 0x311   : > { %9282 = vmatpush3.msra.mxu0 %v14653_v59  ;;  %9309 = vmatpush3.msra.mxu1 %v16714_v0  ;;  %v16718_v58 = vand.u32 4294901760, %v14810_v60  ;;  %v680_v0 = vld [vmem:[%s15302_s0 + $0x790] sm:$0xff]  ;;  %v14922_v13 = vsub.f32 %v683_v39, %v14840_v56  ;;  %v14925_v6 = vand.u32 4294901760, %v14791_v7  ;;  %v16720_v20 = vand.u32 4294901760, %v14720_v45 }
 0x312   : > { %9283 = vmatprep.subr.mxu0 %v14704_v2  ;;  %9310 = vmatprep.subr.mxu1 %v16717_v40  ;;  %v6999_v40 = vand.u32 4294901760, %v14872_v62  ;;  %v14935_v2 = vsub.f32 %v665_v32, %v14876_v33  ;;  %v14937_v59 = vand.u32 4294901760, %v437_v47  ;;  %v16722_v39 = vand.u32 4294901760, %v14730_v61  ;;  %v679_v32 = vld [vmem:[%s15302_s0 + $0x788] sm:$0xff] }
 0x313   : > { %v14913_v11 = vsub.f32 %v14810_v60, %v16718_v58  ;;  %16719 = vst [vmem:[#allocation21_spill] sm:$0xff] %v14925_v6  ;;  %9284 = vmatpush3.msra.mxu0 %v14687_v29  ;;  %9311 = vmatpush3.msra.mxu1 %v16720_v20  ;;  %v14932_v58 = vsub.f32 %v666_v30, %v14874_v44  ;;  %v16723_v29 = vand.u32 4294901760, %v14826_v42  ;;  %v663_v20 = vld [vmem:[%s15302_s0 + $0x708] sm:$0xff]  ;;  %v6894_v30 = vand.u32 4294901760, %v14902_v24 }
 0x314   : > { %16721 = vst [vmem:[#allocation19_spill] sm:$0xff] %v14937_v59  ;;  %9285 = vmatprep.subr.mxu0 %v14725_v53  ;;  %9312 = vmatprep.subr.mxu1 %v16722_v39  ;;  %v14956_v61 = vsub.f32 %v682_v8, %v14881_v50  ;;  %v7006_v39 = vand.u32 4294901760, %v14897_v5  ;;  %v14963_v62 = vand.u32 4294901760, %v680_v0  ;;  %v14965_v53 = vand.u32 4294901760, %v664_v17  ;;  %v662_v5 = vld [vmem:[%s15302_s0 + $0x700] sm:$0xff] }
 0x315   : > { %v14945_v45 = vsub.f32 %v14826_v42, %v16723_v29  ;;  %9286 = vmatpush3.msra.mxu0 %v14732_v16  ;;  %v16724_v29 = vand.u32 4294901760, %v14737_v9  ;;  %v16726_v42 = vand.u32 4294901760, %v14756_v54  ;;  %v7013_v8 = vand.u32 4294901760, %v14913_v11  ;;  %v678_v9 = vld [vmem:[%s15302_s0 + $0x780] sm:$0xff]  ;;  %7065 = vmatprep.mubr.f32.mxu1 %v14925_v6 }
 0x316   : > { %16725 = vst [vmem:[#allocation12_spill] sm:$0xff] %v14963_v62  ;;  %9287 = vmatprep.subr.mxu0 %v14747_v52  ;;  %v14980_v24 = vsub.f32 %v14791_v7, %v14925_v6  ;;  %v16727_v54 = vand.u32 4294901760, %v14775_v18  ;;  %v14990_v11 = vand.u32 4294901760, %v663_v20  ;;  %v14994_v52 = vsub.f32 %v437_v47, %v14937_v59  ;;  %v16765_v6 = vld [vmem:[#allocation20_spill] sm:$0xff] }
 0x317   : > { %9313 = vmatpush3.msra.mxu1 %v16724_v29  ;;  %v14983_v29 = vsub.f32 %v681_v38, %v14904_v1  ;;  %9288 = vmatpush3.msra.mxu0 %v14770_v14  ;;  %v16728_v7 = vand.u32 4294901760, %v14798_v46  ;;  %v6901_v38 = vand.u32 4294901760, %v14945_v45  ;;  %v16729_v14 = vand.u32 4294901760, %v14885_v37 }
 0x318   : > { %9314 = vmatprep.subr.mxu1 %v16726_v42  ;;  %v14988_v42 = vand.u32 4294901760, %v679_v32  ;;  %9289 = vmatprep.subr.mxu0 %v14815_v10  ;;  %v16731_v47 = vand.u32 4294901760, %v14820_v31  ;;  %v15010_v10 = vand.u32 4294901760, %v678_v9  ;;  %v15012_v46 = vand.u32 4294901760, %v662_v5 }
 0x319   : > { %9315 = vmatpush3.msra.mxu1 %v16727_v54  ;;  %v7019_v18 = vsub.f32 %v14885_v37, %v16729_v14  ;;  %v16730_v54 = vand.u32 4294901760, %v14854_v36  ;;  %9290 = vmatpush3.msra.mxu0 %v14800_v4  ;;  %v15020_v14 = vsub.f32 %v664_v17, %v14965_v53  ;;  %v16733_v45 = vand.u32 4294901760, %v14892_v49 }
 0x31a   : > { %9316 = vmatprep.subr.mxu1 %v16728_v7  ;;  %v15016_v7 = vsub.f32 %v680_v0, %v14963_v62  ;;  %9291 = vmatprep.subr.mxu0 %v14840_v56  ;;  %v15029_v0 = vsub.f32 %v663_v20, %v14990_v11  ;;  %v15036_v56 = vsub.f32 %v679_v32, %v14988_v42  ;;  %v16736_v32 = vand.u32 4294901760, %v14932_v58 }
 0x31b   : > { %v6907_v60 = vsub.f32 %v14854_v36, %v16730_v54  ;;  %9317 = vmatpush3.msra.mxu1 %v16731_v47  ;;  %v16732_v54 = vand.u32 4294901760, %v14922_v13  ;;  %9292 = vmatpush3.msra.mxu0 %v14842_v57  ;;  %v16734_v47 = vand.u32 4294901760, %v14956_v61 }
 0x31c   : > { %9318 = vmatprep.subr.mxu1 %v6999_v40  ;;  %v6914_v40 = vsub.f32 %v14892_v49, %v16733_v45  ;;  %9293 = vmatprep.subr.mxu0 %v14881_v50  ;;  %v15045_v45 = vsub.f32 %v662_v5, %v15012_v46  ;;  %v6921_v17 = vsub.f32 %v14932_v58, %v16736_v32  ;;  %v16739_v5 = vand.u32 4294901760, %v14983_v29 }
 0x31d   : > { %v7026_v31 = vsub.f32 %v14922_v13, %v16732_v54  ;;  %9319 = vmatpush3.msra.mxu1 %v6887_v12  ;;  %v7020_v54 = vand.u32 4294901760, %v7019_v18  ;;  %v6908_v16 = vand.u32 4294901760, %v6907_v60  ;;  %v7033_v12 = vsub.f32 %v14956_v61, %v16734_v47  ;;  %9294 = vmatpush3.msra.mxu0 %v14874_v44 }
 0x31e   : > { %9320 = vmatprep.subr.mxu1 %v7006_v39  ;;  %16735 = vst [vmem:[#allocation6_spill] sm:$0xff] %v15045_v45  ;;  %v15052_v60 = vsub.f32 %v678_v9, %v15010_v10  ;;  %9295 = vmatprep.subr.mxu0 %v14904_v1  ;;  %v16738_v47 = vand.u32 4294901760, %v14980_v24  ;;  %v7040_v20 = vsub.f32 %v14983_v29, %v16739_v5  ;;  %v6915_v32 = vand.u32 4294901760, %v6914_v40 }
 0x31f   : > { %9321 = vmatpush3.msra.mxu1 %v6894_v30  ;;  %v7027_v18 = vand.u32 4294901760, %v7026_v31  ;;  %9296 = vmatpush3.msra.mxu0 %v14876_v33  ;;  %v16740_v9 = vand.u32 4294901760, %v14994_v52  ;;  %v7034_v31 = vand.u32 4294901760, %v7033_v12  ;;  %v16742_v40 = vand.u32 4294901760, %v15016_v7 }
 0x320   : > { %16737 = vst [vmem:[#allocation31_spill] sm:$0xff] %v15052_v60  ;;  %9322 = vmatprep.subr.mxu1 %v7013_v8  ;;  %v6827_v30 = vsub.f32 %v14980_v24, %v16738_v47  ;;  %9297 = vmatprep.subr.mxu0 %v14963_v62  ;;  %v16741_v47 = vand.u32 4294901760, %v14935_v2  ;;  %v15839_v8 = vand.u32 4294901760, %v15052_v60  ;;  %v7041_v12 = vand.u32 4294901760, %v7040_v20 }
 0x321   : > { %9323 = vmatpush3.msra.mxu1 %v6901_v38  ;;  %v6833_v39 = vsub.f32 %v14994_v52, %v16740_v9  ;;  %9298 = vmatpush3.msra.mxu0 %v14965_v53  ;;  %v6922_v38 = vand.u32 4294901760, %v6921_v17  ;;  %v7047_v9 = vsub.f32 %v15016_v7, %v16742_v40  ;;  %v16743_v62 = vand.u32 4294901760, %v15020_v14 }
 0x322   : > { %9324 = vmatprep.subr.mxu1 %v7020_v54  ;;  %v6928_v5 = vsub.f32 %v14935_v2, %v16741_v47  ;;  %9299 = vmatprep.subr.mxu0 %v14988_v42  ;;  %v6828_v54 = vand.u32 4294901760, %v6827_v30  ;;  %v15838_v44 = vand.u32 4294901760, %v15045_v45  ;;  %v16744_v17 = vand.u32 4294901760, %v15036_v56 }
 0x323   : > { %9325 = vmatpush3.msra.mxu1 %v6908_v16  ;;  %v6935_v47 = vsub.f32 %v15020_v14, %v16743_v62  ;;  %9300 = vmatpush3.msra.mxu0 %v14990_v11  ;;  %v6834_v16 = vand.u32 4294901760, %v6833_v39  ;;  %v16745_v20 = vand.u32 4294901760, %v15029_v0  ;;  %v7048_v62 = vand.u32 4294901760, %v7047_v9 }
 0x324   : > { %9326 = vmatprep.subr.mxu1 %v7027_v18  ;;  %v7054_v40 = vsub.f32 %v15036_v56, %v16744_v17  ;;  %9301 = vmatprep.subr.mxu0 %v15010_v10  ;;  %v6929_v18 = vand.u32 4294901760, %v6928_v5  ;;  %v7061_v39 = vsub.f32 %v15052_v60, %v15839_v8  ;;  %v16749_v17 = vld [vmem:[#allocation35_spill] sm:$0xff]  ;;  %v16763_v8 = vld [vmem:[#allocation24_spill] sm:$0xff] }
 0x325   : > { %9327 = vmatpush3.msra.mxu1 %v6915_v32  ;;  %v6942_v30 = vsub.f32 %v15029_v0, %v16745_v20  ;;  %9302 = vmatpush3.msra.mxu0 %v15012_v46  ;;  %v6936_v32 = vand.u32 4294901760, %v6935_v47  ;;  %v16747_v47 = vld [vmem:[#allocation28_spill] sm:$0xff]  ;;  %v16752_v20 = vld [vmem:[#allocation10_spill] sm:$0xff] }
 0x326   : > { %9328 = vmatprep.subr.mxu1 %v7034_v31  ;;  %6829 = vmatprep.mubr.f32.mxu0 %v6828_v54  ;;  %v6949_v31 = vsub.f32 %v15045_v45, %v15838_v44  ;;  %v7055_v5 = vand.u32 4294901760, %v7054_v40  ;;  %v7062_v9 = vand.u32 4294901760, %v7061_v39  ;;  %v16750_v40 = vld [vmem:[#allocation33_spill] sm:$0xff]  ;;  %v16762_v44 = vld [vmem:[#allocation18_spill] sm:$0xff] }
 0x327   : > { %9329 = vmatpush3.msra.mxu1 %v6922_v38  ;;  %9341 = vmatprep.subr.mxu0 %v14533_v35  ;;  %v6943_v38 = vand.u32 4294901760, %v6942_v30  ;;  %v16753_v30 = vld [vmem:[#allocation16_spill] sm:$0xff]  ;;  %v16755_v39 = vld [vmem:[#allocation5_spill] sm:$0xff] }
 0x328   : > { %9330 = vmatprep.subr.mxu1 %v7041_v12  ;;  %6835 = vmatmul.mubr.f32.vlgmr.msra.gmra.mxu0 %v6834_v16  ;;  %v6950_v54 = vand.u32 4294901760, %v6949_v31  ;;  %v16746_v12 = vld [vmem:[#allocation17_spill] sm:$0xff]  ;;  %v16748_v16 = vld [vmem:[#allocation14_spill] sm:$0xff] }
 0x329   : > { %9331 = vmatpush3.msra.mxu1 %v6929_v18  ;;  %9342 = vmatpush3.msra.mxu0 %v14545_v3  ;;  %v16751_v18 = vld [vmem:[#allocation7_spill] sm:$0xff]  ;;  %v16757_v31 = vld [vmem:[#allocation30_spill] sm:$0xff] }
 0x32a   : > { %9332 = vmatprep.subr.mxu1 %v7048_v62  ;;  %9343 = vmatprep.subr.mxu0 %v14562_v25  ;;  %v16754_v62 = vld [vmem:[#allocation11_spill] sm:$0xff] }
 0x32b   : > { %9333 = vmatpush3.msra.mxu1 %v6936_v32  ;;  %9344 = vmatpush3.msra.mxu0 %v14582_v41  ;;  %v16756_v32 = vld [vmem:[#allocation26_spill] sm:$0xff] }
 0x32c   : > { %9334 = vmatprep.subr.mxu1 %v7055_v5  ;;  %9345 = vmatprep.subr.mxu0 %v14610_v55  ;;  %v16758_v5 = vld [vmem:[#allocation29_spill] sm:$0xff] }
 0x32d   : > { %9335 = vmatpush3.msra.mxu1 %v6943_v38  ;;  %9346 = vmatpush3.msra.mxu0 %v14617_v48  ;;  %v16759_v38 = vld [vmem:[#allocation22_spill] sm:$0xff] }
 0x32e   : > { %9336 = vmatprep.subr.mxu1 %v7062_v9  ;;  %9347 = vmatprep.subr.mxu0 %v14637_v21  ;;  %v16760_v9 = vld [vmem:[#allocation9_spill] sm:$0xff] }
 0x32f   : > { %9337 = vmatpush3.msra.mxu1 %v6950_v54  ;;  %9348 = vmatpush3.msra.mxu0 %v14628_v34  ;;  %v16761_v54 = vld [vmem:[#allocation23_spill] sm:$0xff] }
 0x330   : > { %7067 = vmatmul.mubr.f32.vlgmr.msra.gmra.mxu1 %v14937_v59  ;;  %9349 = vmatprep.subr.mxu0 %v14660_v43  ;;  %v16764_v59 = vld [vmem:[#allocation4_spill] sm:$0xff] }
 0x331   : > { %9376 = vmatprep.subr.mxu1 %v14508_v26  ;;  %9350 = vmatpush3.msra.mxu0 %v14666_v28 }
 0x332   : > { %9377 = vmatpush3.msra.mxu1 %v14519_v23  ;;  %9351 = vmatprep.subr.mxu0 %v14696_v15 }
 0x333   : > { %9378 = vmatprep.subr.mxu1 %v14524_v63  ;;  %9352 = vmatpush3.msra.mxu0 %v14702_v22 }
 0x334   : > { %9379 = vmatpush3.msra.mxu1 %v16746_v12  ;;  %9353 = vmatprep.subr.mxu0 %v14763_v19 }
 0x335   : > { %9380 = vmatprep.subr.mxu1 %v16747_v47  ;;  %9354 = vmatpush3.msra.mxu0 %v16748_v16 }
 0x336   : > { %9381 = vmatpush3.msra.mxu1 %v16749_v17  ;;  %9355 = vmatprep.subr.mxu0 %v14788_v51 }
 0x337   : > { %9382 = vmatprep.subr.mxu1 %v16750_v40  ;;  %9356 = vmatpush3.msra.mxu0 %v14784_v27 }
 0x338   : > { %9383 = vmatpush3.msra.mxu1 %v16751_v18  ;;  %9357 = vmatprep.subr.mxu0 %v16752_v20 }
 0x339   : > { %9384 = vmatprep.subr.mxu1 %v16753_v30  ;;  %9358 = vmatpush3.msra.mxu0 %v16754_v62 }
 0x33a   : > { %9385 = vmatpush3.msra.mxu1 %v16755_v39  ;;  %9359 = vmatprep.subr.mxu0 %v14885_v37 }
 0x33b   : > { %9386 = vmatprep.subr.mxu1 %v16756_v32  ;;  %9360 = vmatpush3.msra.mxu0 %v14854_v36 }
 0x33c   : > { %9387 = vmatpush3.msra.mxu1 %v16757_v31  ;;  %9361 = vmatprep.subr.mxu0 %v14922_v13 }
 0x33d   : > { %9388 = vmatprep.subr.mxu1 %v16758_v5  ;;  %9362 = vmatpush3.msra.mxu0 %v14892_v49 }
 0x33e   : > { %9389 = vmatpush3.msra.mxu1 %v16759_v38  ;;  %9363 = vmatprep.subr.mxu0 %v14956_v61 }
 0x33f   : > { %9390 = vmatprep.subr.mxu1 %v16760_v9  ;;  %9364 = vmatpush3.msra.mxu0 %v14932_v58 }
 0x340   : > { %9391 = vmatpush3.msra.mxu1 %v16761_v54  ;;  %9365 = vmatprep.subr.mxu0 %v14983_v29 }
 0x341   : > { %9392 = vmatprep.subr.mxu1 %v16762_v44  ;;  %9366 = vmatpush3.msra.mxu0 %v14935_v2 }
 0x342   : > { %9393 = vmatpush3.msra.mxu1 %v16763_v8  ;;  %9367 = vmatprep.subr.mxu0 %v15016_v7 }
 0x343   : > { %9394 = vmatprep.subr.mxu1 %v16764_v59  ;;  %9368 = vmatpush3.msra.mxu0 %v15020_v14  ;;  %v16766_v59 = vld [vmem:[#allocation8_spill] sm:$0xff] }
 0x344   : > { %9395 = vmatpush3.msra.mxu1 %v14800_v4  ;;  %9369 = vmatprep.subr.mxu0 %v15036_v56 }
 0x345   : > { %9396 = vmatprep.subr.mxu1 %v16765_v6  ;;  %9370 = vmatpush3.msra.mxu0 %v15029_v0  ;;  %v16767_v6 = vand.u32 4294901760, %v14533_v35  ;;  %v16772_v35 = vand.u32 4294901760, %v14610_v55  ;;  %v16777_v55 = vand.u32 4294901760, %v14994_v52 }
 0x346   : > { %9397 = vmatpush3.msra.mxu1 %v14842_v57  ;;  %9371 = vmatprep.subr.mxu0 %v15052_v60  ;;  %v16768_v57 = vand.u32 4294901760, %v14545_v3  ;;  %v16769_v60 = vld [vmem:[#allocation12_spill] sm:$0xff]  ;;  %v16773_v3 = vand.u32 4294901760, %v14617_v48  ;;  %v8883_v48 = vpop.f32.mrf.mxu0 }
 0x347   : > { %9398 = vmatprep.subr.mxu1 %v14881_v50  ;;  %9372 = vmatpush3.msra.mxu0 %v15045_v45  ;;  %v16770_v45 = vand.u32 4294901760, %v14562_v25  ;;  %v16774_v25 = vand.u32 4294901760, %v14637_v21  ;;  %v16779_v21 = vand.u32 4294901760, %v14666_v28  ;;  %v8918_v28 = vpop.f32.mrf.mxu1 }
 0x348   : > { %7202 = vmatprep.mubr.f32.mxu0 %v14980_v24  ;;  %9399 = vmatpush3.msra.mxu1 %v16766_v59  ;;  %v16771_v59 = vand.u32 4294901760, %v14582_v41  ;;  %v16775_v41 = vand.u32 4294901760, %v14980_v24  ;;  %v16787_v24 = vand.u32 4294901760, %v16754_v62 }
 0x349   : > { %7205 = vmatmul.mubr.f32.vlgmr.msra.gmra.mxu0 %v14994_v52  ;;  %9400 = vmatprep.subr.mxu1 %v14904_v1  ;;  %v16783_v52 = vand.u32 4294901760, %v16748_v16  ;;  %v16791_v16 = vand.u32 4294901760, %v14892_v49  ;;  %v16794_v49 = vand.u32 4294901760, %v14983_v29 }
 0x34a   : > { %9411 = vmatprep.subr.mxu0 %v16767_v6  ;;  %9401 = vmatpush3.msra.mxu1 %v14876_v33  ;;  %v16780_v6 = vand.u32 4294901760, %v14696_v15  ;;  %v16785_v15 = vand.u32 4294901760, %v14784_v27 }
 0x34b   : > { %9412 = vmatpush3.msra.mxu0 %v16768_v57  ;;  %9402 = vmatprep.subr.mxu1 %v16769_v60  ;;  %v16778_v57 = vand.u32 4294901760, %v14660_v43  ;;  %v16782_v43 = vand.u32 4294901760, %v14763_v19  ;;  %v8919_v19 = vpop.f32.mrf.mxu1 }
 0x34c   : > { %9413 = vmatprep.subr.mxu0 %v16770_v45  ;;  %9403 = vmatpush3.msra.mxu1 %v14965_v53 }
 0x34d   : > { %9414 = vmatpush3.msra.mxu0 %v16771_v59  ;;  %9404 = vmatprep.subr.mxu1 %v14988_v42  ;;  %v16776_v59 = vand.u32 4294901760, %v14628_v34  ;;  %v16781_v34 = vand.u32 4294901760, %v14702_v22  ;;  %v16786_v22 = vand.u32 4294901760, %v16752_v20  ;;  %v8988_v45 = vpop.f32.mrf.mxu1 }
 0x34e   : > { %9415 = vmatprep.subr.mxu0 %v16772_v35  ;;  %9405 = vmatpush3.msra.mxu1 %v14990_v11 }
 0x34f   : > { %9416 = vmatpush3.msra.mxu0 %v16773_v3  ;;  %9406 = vmatprep.subr.mxu1 %v15010_v10 }
 0x350   : > { %9417 = vmatprep.subr.mxu0 %v16774_v25  ;;  %9407 = vmatpush3.msra.mxu1 %v15012_v46  ;;  %v16808_v25 = vld [vmem:[#allocation8_spill] sm:$0xff] }
 0x351   : > { %7309 = vmatprep.mubr.f32.mxu1 %v16775_v41  ;;  %9418 = vmatpush3.msra.mxu0 %v16776_v59 }
 0x352   : > { %7313 = vmatmul.mubr.f32.vlgmr.msra.gmra.mxu1 %v16777_v55  ;;  %9419 = vmatprep.subr.mxu0 %v16778_v57 }
 0x353   : > { %9446 = vmatprep.subr.mxu1 %v14508_v26  ;;  %9420 = vmatpush3.msra.mxu0 %v16779_v21  ;;  %v8884_v26 = vpop.f32.mrf.mxu0 }
 0x354   : > { %9447 = vmatpush3.msra.mxu1 %v14519_v23  ;;  %9421 = vmatprep.subr.mxu0 %v16780_v6  ;;  %v16784_v23 = vand.u32 4294901760, %v14788_v51  ;;  %v16788_v51 = vand.u32 4294901760, %v14885_v37 }
 0x355   : > { %9448 = vmatprep.subr.mxu1 %v14524_v63  ;;  %9422 = vmatpush3.msra.mxu0 %v16781_v34  ;;  %v8953_v63 = vpop.f32.mrf.mxu0 }
 0x356   : > { %9449 = vmatpush3.msra.mxu1 %v16746_v12  ;;  %9423 = vmatprep.subr.mxu0 %v16782_v43  ;;  %v16789_v12 = vand.u32 4294901760, %v14854_v36  ;;  %v8989_v36 = vpop.f32.mrf.mxu1 }
 0x357   : > { %9450 = vmatprep.subr.mxu1 %v16747_v47  ;;  %9424 = vmatpush3.msra.mxu0 %v16783_v52  ;;  %v8954_v27 = vpop.f32.mrf.mxu0  ;;  %v16790_v47 = vand.u32 4294901760, %v14922_v13  ;;  %v8885_v13 = vadd.f32 %v8884_v26, %v8883_v48 }
 0x358   : > { %9451 = vmatpush3.msra.mxu1 %v16749_v17  ;;  %9425 = vmatprep.subr.mxu0 %v16784_v23  ;;  %v8920_v17 = vadd.f32 %v8919_v19, %v8918_v28  ;;  %v8955_v20 = vadd.f32 %v8954_v27, %v8953_v63 }
 0x359   : > { %9452 = vmatprep.subr.mxu1 %v16750_v40  ;;  %9426 = vmatpush3.msra.mxu0 %v16785_v15  ;;  %v16792_v40 = vand.u32 4294901760, %v14956_v61 }
 0x35a   : > { %9453 = vmatpush3.msra.mxu1 %v16751_v18  ;;  %9427 = vmatprep.subr.mxu0 %v16786_v22  ;;  %v16793_v18 = vand.u32 4294901760, %v14932_v58  ;;  %v5345_v62 = vadd.f32 %v8920_v17, %v8885_v13  ;;  %v16796_v58 = vand.u32 4294901760, %v15016_v7 }
 0x35b   : > { %9454 = vmatprep.subr.mxu1 %v16753_v30  ;;  %9428 = vmatpush3.msra.mxu0 %v16787_v24  ;;  %v16795_v30 = vand.u32 4294901760, %v14935_v2  ;;  %v16800_v2 = vld [vmem:[#allocation20_spill] sm:$0xff] }
 0x35c   : > { %9455 = vmatpush3.msra.mxu1 %v16755_v39  ;;  %9429 = vmatprep.subr.mxu0 %v16788_v51  ;;  %v8990_v39 = vadd.f32 %v8989_v36, %v8988_v45  ;;  %v5483_v29 = vadd.f32 %v8955_v20, %v5345_v62 }
 0x35d   : > { %9456 = vmatprep.subr.mxu1 %v16756_v32  ;;  %9430 = vmatpush3.msra.mxu0 %v16789_v12  ;;  %v9023_v37 = vpop.f32.mrf.mxu0  ;;  %v16797_v32 = vld [vmem:[#allocation4_spill] sm:$0xff] }
 0x35e   : > { %9457 = vmatpush3.msra.mxu1 %v16757_v31  ;;  %9431 = vmatprep.subr.mxu0 %v16790_v47  ;;  %v16798_v31 = vand.u32 4294901760, %v15020_v14 }
 0x35f   : > { %9458 = vmatprep.subr.mxu1 %v16758_v5  ;;  %9432 = vmatpush3.msra.mxu0 %v16791_v16  ;;  %v9024_v61 = vpop.f32.mrf.mxu0  ;;  %v16801_v5 = vand.u32 4294901760, %v15029_v0  ;;  %v16809_v0 = vld [vmem:[#allocation19_spill] sm:$0xff] }
 0x360   : > { %9459 = vmatpush3.msra.mxu1 %v16759_v38  ;;  %9433 = vmatprep.subr.mxu0 %v16792_v40  ;;  %v16802_v38 = vld [vmem:[#allocation34_spill] sm:$0xff] }
 0x361   : > { %9460 = vmatprep.subr.mxu1 %v16760_v9  ;;  %9434 = vmatpush3.msra.mxu0 %v16793_v18  ;;  %v5591_v9 = vadd.f32 %v8990_v39, %v5483_v29 }
 0x362   : > { %9461 = vmatpush3.msra.mxu1 %v16761_v54  ;;  %9435 = vmatprep.subr.mxu0 %v16794_v49  ;;  %v16803_v54 = vld [vmem:[#allocation31_spill] sm:$0xff] }
 0x363   : > { %9462 = vmatprep.subr.mxu1 %v16762_v44  ;;  %9436 = vmatpush3.msra.mxu0 %v16795_v30  ;;  %v16799_v44 = vand.u32 4294901760, %v15036_v56  ;;  %v16804_v35 = vand.u32 4294901760, %v16803_v54  ;;  %v16807_v56 = vld [vmem:[#allocation21_spill] sm:$0xff] }
 0x364   : > { %9463 = vmatpush3.msra.mxu1 %v16763_v8  ;;  %9437 = vmatprep.subr.mxu0 %v16796_v58  ;;  %v9025_v8 = vadd.f32 %v9024_v61, %v9023_v37 }
 0x365   : > { %9464 = vmatprep.subr.mxu1 %v16797_v32  ;;  %9438 = vmatpush3.msra.mxu0 %v16798_v31 }
 0x366   : > { %9465 = vmatpush3.msra.mxu1 %v14800_v4  ;;  %9439 = vmatprep.subr.mxu0 %v16799_v44  ;;  %v9058_v7 = vpop.f32.mrf.mxu1  ;;  %v16805_v4 = vld [vmem:[#allocation6_spill] sm:$0xff]  ;;  %v5759_v41 = vadd.f32 %v9025_v8, %v5591_v9  ;;  %v7652_v44 = vld [vmem:[%s11931_s24] sm:$0xff] (%p9627_p6) }
 0x367   : > { %9466 = vmatprep.subr.mxu1 %v16800_v2  ;;  %9440 = vmatpush3.msra.mxu0 %v16801_v5  ;;  %v16806_v14 = vand.u32 4294901760, %v16805_v4  ;;  %v7654_v2 = vld [vmem:[%s11931_s24 + $0x8] sm:$0xff] (%p9627_p6)  ;;  %v7656_v8 = vld [vmem:[%s11931_s24 + $0x10] sm:$0xff] (%p9627_p6)  ;;  %7653 = vst [vmem:[%s7609_s29] sm:$0xff] (%p9627_p6), %v7652_v44  ;;  %v7658_v5 = vld [vmem:[%s11931_s24 + $0x18] sm:$0xff] (%p9627_p6) }
 0x368   : > { %9467 = vmatpush3.msra.mxu1 %v16802_v38  ;;  %9441 = vmatprep.subr.mxu0 %v16804_v35  ;;  %v9059_v3 = vpop.f32.mrf.mxu1  ;;  %7655 = vst [vmem:[%s7609_s29 + $0x18] sm:$0xff] (%p9627_p6), %v7654_v2  ;;  %7657 = vst [vmem:[%s7609_s29 + $0x30] sm:$0xff] (%p9627_p6), %v7656_v8  ;;  %v7660_v38 = vld [vmem:[%s11931_s24 + $0x20] sm:$0xff] (%p9627_p6) }
 0x369   : > { %9468 = vmatprep.subr.mxu1 %v14881_v50  ;;  %9442 = vmatpush3.msra.mxu0 %v16806_v14  ;;  %v9060_v59 = vadd.f32 %v9059_v3, %v9058_v7  ;;  %7659 = vst [vmem:[%s7609_s29 + $0x48] sm:$0xff] (%p9627_p6), %v7658_v5  ;;  %7661 = vst [vmem:[%s7609_s29 + $0x60] sm:$0xff] (%p9627_p6), %v7660_v38 }
 0x36a   : > { %7479 = vmatprep.mubr.f32.mxu0 %v16807_v56  ;;  %9469 = vmatpush3.msra.mxu1 %v16808_v25 }
 0x36b   : > { %7481 = vmatmul.mubr.f32.vlgmr.msra.gmra.mxu0 %v16809_v0  ;;  %9470 = vmatprep.subr.mxu1 %v14904_v1  ;;  %v5863_v55 = vadd.f32 %v9060_v59, %v5759_v41 }
 0x36c   : > { %7583 = vmatprep.mubr.f32.mxu1 %v16807_v56  ;;  %9471 = vmatpush3.msra.mxu1 %v14876_v33 }
 0x36d   : > { %9472 = vmatprep.subr.mxu1 %v16769_v60  ;;  %7595 = vst [vmem:[%s11931_s24 + $0x28] sm:$0xff] %v5863_v55 }
 0x36e   : > { %9473 = vmatpush3.msra.mxu1 %v14965_v53 }
 0x36f   : > { %9474 = vmatprep.subr.mxu1 %v14988_v42 }
 0x370   : > { %9475 = vmatpush3.msra.mxu1 %v14990_v11 }
 0x371   : > { %9476 = vmatprep.subr.mxu1 %v15010_v10 }
 0x372   : > { %9477 = vmatpush3.msra.mxu1 %v15012_v46 }
 0x373   : > { %7585 = vmatmul.mubr.f32.vlgmr.msra.gmra.mxu1 %v16809_v0 }
 0x374   : > { %v7662_v7 = vld [vmem:[%s11931_s24 + $0x28] sm:$0xff] (%p9627_p6) }
 0x375   : > { %7663 = vst [vmem:[%s7609_s29 + $0x78] sm:$0xff] (%p9627_p6), %v7662_v7 }
 0x381   : > { %v9093_v50 = vpop.f32.mrf.mxu0 }
 0x383   : > { %v9094_v1 = vpop.f32.mrf.mxu0 }
 0x384   : > { %v9095_v42 = vadd.f32 %v9094_v1, %v9093_v50 }
 0x389   : > { %v9128_v57 = vpop.f32.mrf.mxu1 }
 0x38b   : > { %v9129_v48 = vpop.f32.mrf.mxu1 }
 0x38c   : > { %v9130_v53 = vadd.f32 %v9129_v48, %v9128_v57 }
 0x38e   : > { %v6207_v26 = vadd.f32 %v9130_v53, %v9095_v42 }
 0x3a2   : > { %v9163_v33 = vpop.f32.mrf.mxu0 }
 0x3a4   : > { %v9164_v21 = vpop.f32.mrf.mxu0 }
 0x3a5   : > { %v9165_v43 = vadd.f32 %v9164_v21, %v9163_v33 }
 0x3a7   : > { %v6345_v28 = vadd.f32 %v9165_v43, %v6207_v26 }
 0x3ab   : > { %v9198_v60 = vpop.f32.mrf.mxu1 }
 0x3ad   : > { %v9199_v34 = vpop.f32.mrf.mxu1 }
 0x3ae   : > { %v9200_v10 = vadd.f32 %v9199_v34, %v9198_v60 }
 0x3b0   : > { %v6453_v23 = vadd.f32 %v9200_v10, %v6345_v28 }
 0x3c4   : > { %v9233_v6 = vpop.f32.mrf.mxu0 }
 0x3c6   : > { %v9234_v11 = vpop.f32.mrf.mxu0 }
 0x3c7   : > { %v9235_v46 = vadd.f32 %v9234_v11, %v9233_v6 }
 0x3c9   : > { %v6621_v15 = vadd.f32 %v9235_v46, %v6453_v23 }
 0x3cd   : > { %v9268_v52 = vpop.f32.mrf.mxu1 }
 0x3cf   : > { %v9269_v63 = vpop.f32.mrf.mxu1 }
 0x3d0   : > { %v9270_v22 = vadd.f32 %v9269_v63, %v9268_v52 }
 0x3d2   : > { %v6725_v19 = vadd.f32 %v9270_v22, %v6621_v15 }
 0x3d4   : > { %7596 = vst [vmem:[%s11931_s24 + $0x30] sm:$0xff] %v6725_v19 }
 0x3db   : > { %v7664_v9 = vld [vmem:[%s11931_s24 + $0x30] sm:$0xff] (%p9627_p6) }
 0x3dc   : > { %7665 = vst [vmem:[%s7609_s29 + $0x90] sm:$0xff] (%p9627_p6), %v7664_v9 }
 0x3e8   : > { %v9303_v24 = vpop.f32.mrf.mxu0 }
 0x3ea   : > { %v9304_v51 = vpop.f32.mrf.mxu0 }
 0x3eb   : > { %v9305_v36 = vadd.f32 %v9304_v51, %v9303_v24 }
 0x3f0   : > { %v9338_v27 = vpop.f32.mrf.mxu1 }
 0x3f2   : > { %v9339_v12 = vpop.f32.mrf.mxu1 }
 0x3f3   : > { %v9340_v17 = vadd.f32 %v9339_v12, %v9338_v27 }
 0x3f5   : > { %v7069_v20 = vadd.f32 %v9340_v17, %v9305_v36 }
 0x409   : > { %v9373_v45 = vpop.f32.mrf.mxu0 }
 0x40b   : > { %v9374_v47 = vpop.f32.mrf.mxu0 }
 0x40c   : > { %v9375_v18 = vadd.f32 %v9374_v47, %v9373_v45 }
 0x40e   : > { %v7207_v30 = vadd.f32 %v9375_v18, %v7069_v20 }
 0x412   : > { %v9408_v16 = vpop.f32.mrf.mxu1 }
 0x414   : > { %v9409_v40 = vpop.f32.mrf.mxu1 }
 0x415   : > { %v9410_v49 = vadd.f32 %v9409_v40, %v9408_v16 }
 0x417   : > { %v7315_v39 = vadd.f32 %v9410_v49, %v7207_v30 }
 0x42b   : > { %v9443_v37 = vpop.f32.mrf.mxu0 }
 0x42d   : > { %v9444_v13 = vpop.f32.mrf.mxu0 }
 0x42e   : > { %v9445_v61 = vadd.f32 %v9444_v13, %v9443_v37 }
 0x430   : > { %v7483_v32 = vadd.f32 %v9445_v61, %v7315_v39 }
 0x433   : > { %v9478_v62 = vpop.f32.mrf.mxu1 }
 0x435   : > { %v9479_v58 = vpop.f32.mrf.mxu1 }
 0x436   : > { %v9480_v31 = vadd.f32 %v9479_v58, %v9478_v62  ;;  %7604 = sbr.rel (!%p9627_p6) target bundleno = 1091 (0x443), region = 74 }
 0x438   : > { %v7587_v29 = vadd.f32 %v9480_v31, %v7483_v32 }
 0x43a   : > { %7597 = vst [vmem:[%s11931_s24 + $0x38] sm:$0xff] %v7587_v29 }
 0x441   : > { %v7666_v54 = vld [vmem:[%s11931_s24 + $0x38] sm:$0xff] }
 0x442   : > { %7667 = vst [vmem:[%s7609_s29 + $0xa8] sm:$0xff] %v7666_v54 }
 0x443 PF: > { %s13_s16 = sadd.s32 1, %s9569_s16   ;;  %s16810_s12 = smov %s9557_s13 }
 0x444   : > { %p10_p0 = scmp.ge.s32.totalorder %s13_s16, 5   ;;  %s16811_s13 = smov %s9632_s22 }
 0x445   : > { %s16812_s14 = smov %s9565_s15  ;;  %s16813_s15 = smov %s16815_s17 }
 0x446   :  { %12 = sbr.rel (!%p10_p0) target bundleno = 3 (0x3), region = 149 }

</bundles_post_ra>
